<compile_context>
chip_gen: v6e
topology: v6e:2x2x1
jax: 0.10.0
libtpu: 0.0.40
codegen_flags: <defaults>
</compile_context>

<pallas_src>
import jax
import jax.numpy as jnp
import numpy as np
from jax.experimental import pallas as pl
from jax.experimental.pallas import tpu as pltpu


# ---------------------------------------------------------------------------
# VMEM budget (generation-aware: v7x has 64 MiB/TC, v5e/v6e have 128 MiB)
# ---------------------------------------------------------------------------
def _vmem_limit_bytes():
    fallback = 64 * 1024 * 1024  # v7x physical VMEM per TensorCore
    try:
        cap = getattr(pltpu.get_tpu_info(), "vmem_capacity_bytes", None) or fallback
    except Exception:
        cap = fallback
    return int(cap * 3 // 4)  # headroom for double-buffering


_VMEM_LIMIT = _vmem_limit_bytes()


def _fits_vmem(H, W, K, tco, out_itemsize):
    """Conservative per-step footprint estimate for the resident-Cin kernel."""
    x_blk = (H + 2) * W * K * 2          # bf16 input block
    w_blk = 3 * K * tco * 2              # bf16 weight block
    o_blk = H * W * tco * out_itemsize   # output block
    acc = H * W * tco * 4                # local f32 accumulator
    need = 2 * (x_blk + w_blk + o_blk) + acc + (64 << 10)  # double-buffered + slack
    return need <= _VMEM_LIMIT


# ---------------------------------------------------------------------------
# Pallas kernels
# ---------------------------------------------------------------------------
def _conv3x3_bn_relu_kernel(x_ref, w_ref, scale_ref, shift_ref, o_ref):
    """Fused 3x3 conv + folded-BN + ReLU, whole Cin reduction resident.

    x_ref:     (1, H+2, W, K)  bf16, dx taps pre-gathered into channels (K = 3*Cin)
    w_ref:     (3, K, Cout_t)  bf16
    scale_ref: (1, Cout_t)     f32 folded BN scale
    shift_ref: (1, Cout_t)     f32 folded BN shift (includes conv bias)
    o_ref:     (1, H, W, Cout_t)
    """
    H, W = o_ref.shape[1], o_ref.shape[2]
    K = x_ref.shape[-1]
    # 3 MXU matmuls (one per dy tap row), accumulated locally in f32.
    acc = jnp.dot(x_ref[0, 0:H].reshape(H * W, K), w_ref[0],
                  preferred_element_type=jnp.float32)
    acc = acc + jnp.dot(x_ref[0, 1:1 + H].reshape(H * W, K), w_ref[1],
                        preferred_element_type=jnp.float32)
    acc = acc + jnp.dot(x_ref[0, 2:2 + H].reshape(H * W, K), w_ref[2],
                        preferred_element_type=jnp.float32)
    out = jnp.maximum(acc * scale_ref[...] + shift_ref[...], 0.0)
    o_ref[...] = out.reshape(o_ref.shape).astype(o_ref.dtype)


def _conv3x3_bn_relu_acc_kernel(x_ref, w_ref, scale_ref, shift_ref, o_ref, acc_ref):
    """Fallback: K (= 3*Cin) tiled across a reduction grid axis (axis 2).

    Same layouts as above but the gathered K axis is blocked; one accumulator
    read-modify-write per grid step.
    """
    H, W = o_ref.shape[1], o_ref.shape[2]
    tk = x_ref.shape[-1]
    ki = pl.program_id(2)

    @pl.when(ki == 0)
    def _():
        acc_ref[...] = jnp.zeros_like(acc_ref)

    acc = jnp.dot(x_ref[0, 0:H].reshape(H * W, tk), w_ref[0],
                  preferred_element_type=jnp.float32)
    acc = acc + jnp.dot(x_ref[0, 1:1 + H].reshape(H * W, tk), w_ref[1],
                        preferred_element_type=jnp.float32)
    acc = acc + jnp.dot(x_ref[0, 2:2 + H].reshape(H * W, tk), w_ref[2],
                        preferred_element_type=jnp.float32)
    acc_ref[...] += acc  # single scratch RMW per step

    @pl.when(ki == pl.num_programs(2) - 1)
    def _():
        out = jnp.maximum(acc_ref[...] * scale_ref[...] + shift_ref[...], 0.0)
        o_ref[...] = out.reshape(o_ref.shape).astype(o_ref.dtype)


# ---------------------------------------------------------------------------
# Pallas wrappers
# ---------------------------------------------------------------------------
def _dx_gather(x):
    """(N, H, W, C) -> (N, H+2, W, 3*C) bf16 with zero padding; channel index dx*C + c."""
    N, H, W, C = x.shape
    xp = jnp.pad(x.astype(jnp.bfloat16), ((0, 0), (1, 1), (1, 1), (0, 0)))
    return jnp.concatenate([xp[:, :, dx:dx + W, :] for dx in range(3)], axis=-1)


def conv3x3_bn_relu(x, w, scale, shift, out_dtype=jnp.float32):
    """Fused Conv2d(3x3, pad=1) + folded BatchNorm + ReLU. x: (N,H,W,Cin) NHWC."""
    N, H, W, Cin = x.shape
    Cout = w.shape[-1]
    K = 3 * Cin

    # Lane-dense output-channel tile: 256 fills the v6e/v7x MXU; falls back cleanly.
    tco = 256 if Cout % 256 == 0 else (128 if Cout % 128 == 0 else Cout)

    x3 = _dx_gather(x)                                   # (N, H+2, W, 3*Cin) bf16
    w3 = w.astype(jnp.bfloat16).reshape(3, K, Cout)      # (dy, dx*Cin + c, cout)
    scale2 = scale.reshape(1, Cout).astype(jnp.float32)
    shift2 = shift.reshape(1, Cout).astype(jnp.float32)
    out_shape = jax.ShapeDtypeStruct((N, H, W, Cout), out_dtype)
    itemsize = jnp.dtype(out_dtype).itemsize

    if _fits_vmem(H, W, K, tco, itemsize):
        # Whole reduction resident: 2-D parallel grid, no scratch, direct store.
        return pl.pallas_call(
            _conv3x3_bn_relu_kernel,
            out_shape=out_shape,
            grid=(N, Cout // tco),
            in_specs=[
                pl.BlockSpec((1, H + 2, W, K), lambda n, co: (n, 0, 0, 0)),
                pl.BlockSpec((3, K, tco), lambda n, co: (0, 0, co)),
                pl.BlockSpec((1, tco), lambda n, co: (0, co)),
                pl.BlockSpec((1, tco), lambda n, co: (0, co)),
            ],
            out_specs=pl.BlockSpec((1, H, W, tco), lambda n, co: (n, 0, 0, co)),
            compiler_params=pltpu.CompilerParams(
                dimension_semantics=("parallel", "parallel"),
                vmem_limit_bytes=_VMEM_LIMIT),
        )(x3, w3, scale2, shift2)

    # K-tiled fallback (very large Cin): reduction axis innermost, VMEM accumulator.
    tci = None
    for cand in (512, 256, 128):
        if Cin % cand == 0 and _fits_vmem(H, W, 3 * cand, tco, itemsize):
            tci = cand
            break
    if tci is None:
        # TODO(synk): spatial (H-row, halo) tiling for very large images / odd channels.
        tci = Cin
    tk = 3 * tci

    return pl.pallas_call(
        _conv3x3_bn_relu_acc_kernel,
        out_shape=out_shape,
        grid=(N, Cout // tco, K // tk),
        in_specs=[
            pl.BlockSpec((1, H + 2, W, tk), lambda n, co, k: (n, 0, 0, k)),
            pl.BlockSpec((3, tk, tco), lambda n, co, k: (0, k, co)),
            pl.BlockSpec((1, tco), lambda n, co, k: (0, co)),
            pl.BlockSpec((1, tco), lambda n, co, k: (0, co)),
        ],
        out_specs=pl.BlockSpec((1, H, W, tco), lambda n, co, k: (n, 0, 0, co)),
        scratch_shapes=[pltpu.VMEM((H * W, tco), jnp.float32)],
        compiler_params=pltpu.CompilerParams(
            dimension_semantics=("parallel", "parallel", "arbitrary"),
            vmem_limit_bytes=_VMEM_LIMIT),
    )(x3, w3, scale2, shift2)


# ---------------------------------------------------------------------------
# BatchNorm folding (eval mode) and DoubleConv forward
# ---------------------------------------------------------------------------
def _fold_bn(conv_bias, bn, eps=1e-5):
    gamma, beta, mean, var = bn
    scale = gamma / jnp.sqrt(var + eps)
    shift = (conv_bias - mean) * scale + beta
    return scale, shift


def double_conv(x_nchw, p):
    """DoubleConv forward: (Conv3x3 -> BN -> ReLU) x 2. NCHW in, NCHW out."""
    x = jnp.transpose(x_nchw, (0, 2, 3, 1))                       # NCHW -> NHWC
    s1, sh1 = _fold_bn(p['b1'], p['bn1'])
    x = conv3x3_bn_relu(x, p['w1'], s1, sh1, out_dtype=jnp.bfloat16)  # bf16 intermediate
    s2, sh2 = _fold_bn(p['b2'], p['bn2'])
    x = conv3x3_bn_relu(x, p['w2'], s2, sh2, out_dtype=jnp.float32)
    return jnp.transpose(x, (0, 3, 1, 2))                         # NHWC -> NCHW


def double_conv_ref(x_nchw, p):
    """Pure-JAX reference (same bf16 operand cast, f32 accumulation)."""
    x = jnp.transpose(x_nchw, (0, 2, 3, 1))
    for w, b, bn in ((p['w1'], p['b1'], p['bn1']), (p['w2'], p['b2'], p['bn2'])):
        s, sh = _fold_bn(b, bn)
        y = jax.lax.conv_general_dilated(
            x.astype(jnp.bfloat16), w.astype(jnp.bfloat16),
            window_strides=(1, 1), padding='SAME',
            dimension_numbers=('NHWC', 'HWIO', 'NHWC'),
            preferred_element_type=jnp.float32)
        x = jnp.maximum(y * s + sh, 0.0)
    return jnp.transpose(x, (0, 3, 1, 2))


# ---------------------------------------------------------------------------
# Deterministic synthetic parameters
# ---------------------------------------------------------------------------
def _init_conv(key, cin, cout):
    kw_, kb = jax.random.split(key)
    fan_in = 9 * cin
    w = jax.random.normal(kw_, (3, 3, cin, cout), jnp.float32) / np.sqrt(fan_in)
    b = 0.01 * jax.random.normal(kb, (cout,), jnp.float32)
    return w, b


def _init_bn(key, c):
    k1, k2, k3, k4 = jax.random.split(key, 4)
    gamma = 1.0 + 0.1 * jax.random.normal(k1, (c,), jnp.float32)
    beta = 0.1 * jax.random.normal(k2, (c,), jnp.float32)
    mean = 0.1 * jax.random.normal(k3, (c,), jnp.float32)
    var = 0.5 + jax.random.uniform(k4, (c,), jnp.float32)
    return (gamma, beta, mean, var)


def init_double_conv_params(key, cin, cout):
    k1, k2, k3, k4 = jax.random.split(key, 4)
    w1, b1 = _init_conv(k1, cin, cout)
    w2, b2 = _init_conv(k3, cout, cout)
    return dict(w1=w1, b1=b1, bn1=_init_bn(k2, cout),
                w2=w2, b2=b2, bn2=_init_bn(k4, cout))


# ---------------------------------------------------------------------------
if __name__ == "__main__":
    key = jax.random.PRNGKey(0)
    kx, kp = jax.random.split(key)

    N, CIN, H, W, COUT = 2, 4, 16, 16, 256
    x = jax.random.normal(kx, (N, CIN, H, W), jnp.float32)          # NCHW like PyTorch
    params = init_double_conv_params(kp, CIN, COUT)

    fwd = jax.jit(double_conv)
    out = jax.block_until_ready(fwd(x, params))
    assert out.shape == (N, COUT, H, W), out.shape
    assert bool(jnp.all(jnp.isfinite(out)))

    ref = jax.block_until_ready(jax.jit(double_conv_ref)(x, params))
    err = float(jnp.max(jnp.abs(out - ref)))
    assert err < 1e-1, f"max abs err vs reference: {err}"

    print("KERNEL_OK")
</pallas_src>

<mosaic_0001>
module attributes {stable_mosaic.version = 11 : i64} {
  func.func @_conv3x3_bn_relu_kernel(%arg0: i32, %arg1: i32, %arg2: memref<1x18x16x12xbf16, #tpu.memory_space<vmem>>, %arg3: memref<3x12x256xbf16, #tpu.memory_space<vmem>>, %arg4: memref<1x256xf32, #tpu.memory_space<vmem>>, %arg5: memref<1x256xf32, #tpu.memory_space<vmem>>, %arg6: memref<1x16x16x256xbf16, #tpu.memory_space<vmem>>) attributes {dimension_semantics = [#tpu.dimension_semantics<parallel>, #tpu.dimension_semantics<parallel>], iteration_bounds = array<i64: 2, 1>, scalar_prefetch = 0 : i64, scratch_operands = 0 : i64, tpu.core_type = #tpu.core_type<tc>, window_params = [{transform_indices = @transform_0, window_bounds = array<i64: 1, 18, 16, 12>}, {transform_indices = @transform_1, window_bounds = array<i64: 3, 12, 256>}, {transform_indices = @transform_2, window_bounds = array<i64: 1, 256>}, {transform_indices = @transform_3, window_bounds = array<i64: 1, 256>}, {transform_indices = @transform_4, window_bounds = array<i64: 1, 16, 16, 256>}]} {
    %c0 = arith.constant 0 : index
    %c0_0 = arith.constant 0 : index
    %c0_1 = arith.constant 0 : index
    %c0_2 = arith.constant 0 : index
    %0 = vector.load %arg2[%c0, %c0_0, %c0_1, %c0_2] : memref<1x18x16x12xbf16, #tpu.memory_space<vmem>>, vector<1x16x16x12xbf16>
    %1 = vector.shape_cast %0 : vector<1x16x16x12xbf16> to vector<16x16x12xbf16>
    %2 = vector.shape_cast %1 : vector<16x16x12xbf16> to vector<256x12xbf16>
    %c0_3 = arith.constant 0 : index
    %c0_4 = arith.constant 0 : index
    %c0_5 = arith.constant 0 : index
    %3 = vector.load %arg3[%c0_3, %c0_4, %c0_5] : memref<3x12x256xbf16, #tpu.memory_space<vmem>>, vector<1x12x256xbf16>
    %4 = vector.shape_cast %3 : vector<1x12x256xbf16> to vector<12x256xbf16>
    %cst = arith.constant dense<0.000000e+00> : vector<256x256xf32>
    %5 = tpu.matmul %2, %4, %cst {dimension_numbers = #tpu.dot_dimension_numbers<[1], [0], [0], [1], [0, 0, 1, 1], [], []>} : vector<256x12xbf16>, vector<12x256xbf16>, vector<256x256xf32> -> vector<256x256xf32>
    %c0_6 = arith.constant 0 : index
    %c1 = arith.constant 1 : index
    %c0_7 = arith.constant 0 : index
    %c0_8 = arith.constant 0 : index
    %6 = vector.load %arg2[%c0_6, %c1, %c0_7, %c0_8] : memref<1x18x16x12xbf16, #tpu.memory_space<vmem>>, vector<1x16x16x12xbf16>
    %7 = vector.shape_cast %6 : vector<1x16x16x12xbf16> to vector<16x16x12xbf16>
    %8 = vector.shape_cast %7 : vector<16x16x12xbf16> to vector<256x12xbf16>
    %c1_9 = arith.constant 1 : index
    %c0_10 = arith.constant 0 : index
    %c0_11 = arith.constant 0 : index
    %9 = vector.load %arg3[%c1_9, %c0_10, %c0_11] : memref<3x12x256xbf16, #tpu.memory_space<vmem>>, vector<1x12x256xbf16>
    %10 = vector.shape_cast %9 : vector<1x12x256xbf16> to vector<12x256xbf16>
    %cst_12 = arith.constant dense<0.000000e+00> : vector<256x256xf32>
    %11 = tpu.matmul %8, %10, %cst_12 {dimension_numbers = #tpu.dot_dimension_numbers<[1], [0], [0], [1], [0, 0, 1, 1], [], []>} : vector<256x12xbf16>, vector<12x256xbf16>, vector<256x256xf32> -> vector<256x256xf32>
    %12 = arith.addf %5, %11 : vector<256x256xf32>
    %c0_13 = arith.constant 0 : index
    %c2 = arith.constant 2 : index
    %c0_14 = arith.constant 0 : index
    %c0_15 = arith.constant 0 : index
    %13 = vector.load %arg2[%c0_13, %c2, %c0_14, %c0_15] : memref<1x18x16x12xbf16, #tpu.memory_space<vmem>>, vector<1x16x16x12xbf16>
    %14 = vector.shape_cast %13 : vector<1x16x16x12xbf16> to vector<16x16x12xbf16>
    %15 = vector.shape_cast %14 : vector<16x16x12xbf16> to vector<256x12xbf16>
    %c2_16 = arith.constant 2 : index
    %c0_17 = arith.constant 0 : index
    %c0_18 = arith.constant 0 : index
    %16 = vector.load %arg3[%c2_16, %c0_17, %c0_18] : memref<3x12x256xbf16, #tpu.memory_space<vmem>>, vector<1x12x256xbf16>
    %17 = vector.shape_cast %16 : vector<1x12x256xbf16> to vector<12x256xbf16>
    %cst_19 = arith.constant dense<0.000000e+00> : vector<256x256xf32>
    %18 = tpu.matmul %15, %17, %cst_19 {dimension_numbers = #tpu.dot_dimension_numbers<[1], [0], [0], [1], [0, 0, 1, 1], [], []>} : vector<256x12xbf16>, vector<12x256xbf16>, vector<256x256xf32> -> vector<256x256xf32>
    %19 = arith.addf %12, %18 : vector<256x256xf32>
    %c0_20 = arith.constant 0 : index
    %c0_21 = arith.constant 0 : index
    %20 = vector.load %arg4[%c0_20, %c0_21] : memref<1x256xf32, #tpu.memory_space<vmem>>, vector<1x256xf32>
    %21 = vector.broadcast %20 : vector<1x256xf32> to vector<256x256xf32>
    %22 = arith.mulf %19, %21 : vector<256x256xf32>
    %c0_22 = arith.constant 0 : index
    %c0_23 = arith.constant 0 : index
    %23 = vector.load %arg5[%c0_22, %c0_23] : memref<1x256xf32, #tpu.memory_space<vmem>>, vector<1x256xf32>
    %24 = vector.broadcast %23 : vector<1x256xf32> to vector<256x256xf32>
    %25 = arith.addf %22, %24 : vector<256x256xf32>
    %cst_24 = arith.constant 0.000000e+00 : f32
    %26 = vector.broadcast %cst_24 : f32 to vector<256x256xf32>
    %27 = arith.maximumf %25, %26 : vector<256x256xf32>
    %28 = vector.shape_cast %27 : vector<256x256xf32> to vector<1x16x16x256xf32>
    %29 = arith.truncf %28 : vector<1x16x16x256xf32> to vector<1x16x16x256xbf16>
    %c0_25 = arith.constant 0 : index
    %c0_26 = arith.constant 0 : index
    %c0_27 = arith.constant 0 : index
    %c0_28 = arith.constant 0 : index
    %30 = vector.load %arg6[%c0_25, %c0_26, %c0_27, %c0_28] : memref<1x16x16x256xbf16, #tpu.memory_space<vmem>>, vector<1x16x16x256xbf16>
    tpu.vector_store %arg6[%c0_25, %c0_26, %c0_27, %c0_28], %29 {strides = array<i32>} : memref<1x16x16x256xbf16, #tpu.memory_space<vmem>>, vector<1x16x16x256xbf16>,
    return
  }
  func.func @transform_0(%arg0: i32, %arg1: i32) -> (i32, i32, i32, i32) {
    %c0_i32 = arith.constant 0 : i32
    %c0_i32_0 = arith.constant 0 : i32
    %c0_i32_1 = arith.constant 0 : i32
    %c0_i32_2 = arith.constant 0 : i32
    return %arg0, %c0_i32, %c0_i32_0, %c0_i32_1 : i32, i32, i32, i32
  }
  func.func @transform_1(%arg0: i32, %arg1: i32) -> (i32, i32, i32) {
    %c0_i32 = arith.constant 0 : i32
    %c0_i32_0 = arith.constant 0 : i32
    %c0_i32_1 = arith.constant 0 : i32
    return %c0_i32, %c0_i32_0, %arg1 : i32, i32, i32
  }
  func.func @transform_2(%arg0: i32, %arg1: i32) -> (i32, i32) {
    %c0_i32 = arith.constant 0 : i32
    %c0_i32_0 = arith.constant 0 : i32
    return %c0_i32, %arg1 : i32, i32
  }
  func.func @transform_3(%arg0: i32, %arg1: i32) -> (i32, i32) {
    %c0_i32 = arith.constant 0 : i32
    %c0_i32_0 = arith.constant 0 : i32
    return %c0_i32, %arg1 : i32, i32
  }
  func.func @transform_4(%arg0: i32, %arg1: i32) -> (i32, i32, i32, i32) {
    %c0_i32 = arith.constant 0 : i32
    %c0_i32_0 = arith.constant 0 : i32
    %c0_i32_1 = arith.constant 0 : i32
    return %arg0, %c0_i32, %c0_i32_0, %arg1 : i32, i32, i32, i32
  }
}

module attributes {stable_mosaic.version = 11 : i64} {
  func.func @_conv3x3_bn_relu_kernel(%arg0: i32, %arg1: i32, %arg2: memref<1x18x16x768xbf16, #tpu.memory_space<vmem>>, %arg3: memref<3x768x256xbf16, #tpu.memory_space<vmem>>, %arg4: memref<1x256xf32, #tpu.memory_space<vmem>>, %arg5: memref<1x256xf32, #tpu.memory_space<vmem>>, %arg6: memref<1x16x16x256xf32, #tpu.memory_space<vmem>>) attributes {dimension_semantics = [#tpu.dimension_semantics<parallel>, #tpu.dimension_semantics<parallel>], iteration_bounds = array<i64: 2, 1>, scalar_prefetch = 0 : i64, scratch_operands = 0 : i64, tpu.core_type = #tpu.core_type<tc>, window_params = [{transform_indices = @transform_0, window_bounds = array<i64: 1, 18, 16, 768>}, {transform_indices = @transform_1, window_bounds = array<i64: 3, 768, 256>}, {transform_indices = @transform_2, window_bounds = array<i64: 1, 256>}, {transform_indices = @transform_3, window_bounds = array<i64: 1, 256>}, {transform_indices = @transform_4, window_bounds = array<i64: 1, 16, 16, 256>}]} {
    %c0 = arith.constant 0 : index
    %c0_0 = arith.constant 0 : index
    %c0_1 = arith.constant 0 : index
    %c0_2 = arith.constant 0 : index
    %0 = vector.load %arg2[%c0, %c0_0, %c0_1, %c0_2] : memref<1x18x16x768xbf16, #tpu.memory_space<vmem>>, vector<1x16x16x768xbf16>
    %1 = vector.shape_cast %0 : vector<1x16x16x768xbf16> to vector<16x16x768xbf16>
    %2 = vector.shape_cast %1 : vector<16x16x768xbf16> to vector<256x768xbf16>
    %c0_3 = arith.constant 0 : index
    %c0_4 = arith.constant 0 : index
    %c0_5 = arith.constant 0 : index
    %3 = vector.load %arg3[%c0_3, %c0_4, %c0_5] : memref<3x768x256xbf16, #tpu.memory_space<vmem>>, vector<1x768x256xbf16>
    %4 = vector.shape_cast %3 : vector<1x768x256xbf16> to vector<768x256xbf16>
    %cst = arith.constant dense<0.000000e+00> : vector<256x256xf32>
    %5 = tpu.matmul %2, %4, %cst {dimension_numbers = #tpu.dot_dimension_numbers<[1], [0], [0], [1], [0, 0, 1, 1], [], []>} : vector<256x768xbf16>, vector<768x256xbf16>, vector<256x256xf32> -> vector<256x256xf32>
    %c0_6 = arith.constant 0 : index
    %c1 = arith.constant 1 : index
    %c0_7 = arith.constant 0 : index
    %c0_8 = arith.constant 0 : index
    %6 = vector.load %arg2[%c0_6, %c1, %c0_7, %c0_8] : memref<1x18x16x768xbf16, #tpu.memory_space<vmem>>, vector<1x16x16x768xbf16>
    %7 = vector.shape_cast %6 : vector<1x16x16x768xbf16> to vector<16x16x768xbf16>
    %8 = vector.shape_cast %7 : vector<16x16x768xbf16> to vector<256x768xbf16>
    %c1_9 = arith.constant 1 : index
    %c0_10 = arith.constant 0 : index
    %c0_11 = arith.constant 0 : index
    %9 = vector.load %arg3[%c1_9, %c0_10, %c0_11] : memref<3x768x256xbf16, #tpu.memory_space<vmem>>, vector<1x768x256xbf16>
    %10 = vector.shape_cast %9 : vector<1x768x256xbf16> to vector<768x256xbf16>
    %cst_12 = arith.constant dense<0.000000e+00> : vector<256x256xf32>
    %11 = tpu.matmul %8, %10, %cst_12 {dimension_numbers = #tpu.dot_dimension_numbers<[1], [0], [0], [1], [0, 0, 1, 1], [], []>} : vector<256x768xbf16>, vector<768x256xbf16>, vector<256x256xf32> -> vector<256x256xf32>
    %12 = arith.addf %5, %11 : vector<256x256xf32>
    %c0_13 = arith.constant 0 : index
    %c2 = arith.constant 2 : index
    %c0_14 = arith.constant 0 : index
    %c0_15 = arith.constant 0 : index
    %13 = vector.load %arg2[%c0_13, %c2, %c0_14, %c0_15] : memref<1x18x16x768xbf16, #tpu.memory_space<vmem>>, vector<1x16x16x768xbf16>
    %14 = vector.shape_cast %13 : vector<1x16x16x768xbf16> to vector<16x16x768xbf16>
    %15 = vector.shape_cast %14 : vector<16x16x768xbf16> to vector<256x768xbf16>
    %c2_16 = arith.constant 2 : index
    %c0_17 = arith.constant 0 : index
    %c0_18 = arith.constant 0 : index
    %16 = vector.load %arg3[%c2_16, %c0_17, %c0_18] : memref<3x768x256xbf16, #tpu.memory_space<vmem>>, vector<1x768x256xbf16>
    %17 = vector.shape_cast %16 : vector<1x768x256xbf16> to vector<768x256xbf16>
    %cst_19 = arith.constant dense<0.000000e+00> : vector<256x256xf32>
    %18 = tpu.matmul %15, %17, %cst_19 {dimension_numbers = #tpu.dot_dimension_numbers<[1], [0], [0], [1], [0, 0, 1, 1], [], []>} : vector<256x768xbf16>, vector<768x256xbf16>, vector<256x256xf32> -> vector<256x256xf32>
    %19 = arith.addf %12, %18 : vector<256x256xf32>
    %c0_20 = arith.constant 0 : index
    %c0_21 = arith.constant 0 : index
    %20 = vector.load %arg4[%c0_20, %c0_21] : memref<1x256xf32, #tpu.memory_space<vmem>>, vector<1x256xf32>
    %21 = vector.broadcast %20 : vector<1x256xf32> to vector<256x256xf32>
    %22 = arith.mulf %19, %21 : vector<256x256xf32>
    %c0_22 = arith.constant 0 : index
    %c0_23 = arith.constant 0 : index
    %23 = vector.load %arg5[%c0_22, %c0_23] : memref<1x256xf32, #tpu.memory_space<vmem>>, vector<1x256xf32>
    %24 = vector.broadcast %23 : vector<1x256xf32> to vector<256x256xf32>
    %25 = arith.addf %22, %24 : vector<256x256xf32>
    %cst_24 = arith.constant 0.000000e+00 : f32
    %26 = vector.broadcast %cst_24 : f32 to vector<256x256xf32>
    %27 = arith.maximumf %25, %26 : vector<256x256xf32>
    %28 = vector.shape_cast %27 : vector<256x256xf32> to vector<1x16x16x256xf32>
    %c0_25 = arith.constant 0 : index
    %c0_26 = arith.constant 0 : index
    %c0_27 = arith.constant 0 : index
    %c0_28 = arith.constant 0 : index
    %29 = vector.load %arg6[%c0_25, %c0_26, %c0_27, %c0_28] : memref<1x16x16x256xf32, #tpu.memory_space<vmem>>, vector<1x16x16x256xf32>
    tpu.vector_store %arg6[%c0_25, %c0_26, %c0_27, %c0_28], %28 {strides = array<i32>} : memref<1x16x16x256xf32, #tpu.memory_space<vmem>>, vector<1x16x16x256xf32>,
    return
  }
  func.func @transform_0(%arg0: i32, %arg1: i32) -> (i32, i32, i32, i32) {
    %c0_i32 = arith.constant 0 : i32
    %c0_i32_0 = arith.constant 0 : i32
    %c0_i32_1 = arith.constant 0 : i32
    %c0_i32_2 = arith.constant 0 : i32
    return %arg0, %c0_i32, %c0_i32_0, %c0_i32_1 : i32, i32, i32, i32
  }
  func.func @transform_1(%arg0: i32, %arg1: i32) -> (i32, i32, i32) {
    %c0_i32 = arith.constant 0 : i32
    %c0_i32_0 = arith.constant 0 : i32
    %c0_i32_1 = arith.constant 0 : i32
    return %c0_i32, %c0_i32_0, %arg1 : i32, i32, i32
  }
  func.func @transform_2(%arg0: i32, %arg1: i32) -> (i32, i32) {
    %c0_i32 = arith.constant 0 : i32
    %c0_i32_0 = arith.constant 0 : i32
    return %c0_i32, %arg1 : i32, i32
  }
  func.func @transform_3(%arg0: i32, %arg1: i32) -> (i32, i32) {
    %c0_i32 = arith.constant 0 : i32
    %c0_i32_0 = arith.constant 0 : i32
    return %c0_i32, %arg1 : i32, i32
  }
  func.func @transform_4(%arg0: i32, %arg1: i32) -> (i32, i32, i32, i32) {
    %c0_i32 = arith.constant 0 : i32
    %c0_i32_0 = arith.constant 0 : i32
    %c0_i32_1 = arith.constant 0 : i32
    return %arg0, %c0_i32, %c0_i32_0, %arg1 : i32, i32, i32, i32
  }
}

</mosaic_0001>

<bundles_post_ra>
// kernel: double_conv.2
= control target key start
LH: loop header
LB: loop body
LE: loop exit
PB: predicated region body
PF: predicated region fallthrough
CT: control target
= control target key end

     0   :  { %s2405_s15 = smov 0   ;;  %s2407_s16 = smov 0   ;;  %s2981_s0 = inlined_call_operand.vmem [shape: bf16[2,18,16,12], index: 0, kind: input, shape index: {}]   ;;  %s2982_s1 = inlined_call_operand.vmem [shape: bf16[3,12,256], index: 1, kind: input, shape index: {}]   ;;  %s2983_s2 = inlined_call_operand.vmem [shape: f32[1,256], index: 2, kind: input, shape index: {}]   ;;  %s2984_s3 = inlined_call_operand.vmem [shape: f32[1,256], index: 3, kind: input, shape index: {}]   ;;  %s2985_s4 = inlined_call_operand.vmem [shape: bf16[2,16,16,256], index: 4, kind: output, shape index: {}]  }
   0x1   :  { %s2409_s17 = smov 0  }
   0x2 LB: > { %s26_s18 = sadd.s32 1, %s2373_s16  ;;  %p2026_p0 = scmp.ge.s32.totalorder %s2377_s17, 1  ;;  %s2377_s17 = sphi %s2409_s17, %s14_s17   ;;  %s2373_s16 = sphi %s2407_s16, %s3029_s16   ;;  %s2369_s15 = sphi %s2405_s15, %s3028_s15  }
   0x3   : > { %p28_p1 = scmp.ge.s32.totalorder %s26_s18, 2  ;;  %p207_p2 = scmp.lt.s32.totalorder %s2377_s17, 3 }
   0x5   : > { %s3031_s18 = smov (%p28_p1, %s26_s18), 0  ;;  %p208_p3 = pnand %p2026_p0, %p207_p2 }
   0x7   : > { %211 = sbr.rel (%p208_p3) target bundleno = 416 (0x1a0), region = 36 }
   0xc   : > { %v2298_v0 = vld [vmem:[%s2982_s1 + $0x14] ss:$8 sps:$4 sm:$0x3f]   ;;  %vm489_vm0 = vcmask 1045504   ;;  %p250_p4 = scmp.lt.s32.totalorder %s2369_s15, 1  ;;  %v2379_v4 = vmov 0  }
   0xd   : > { %v2300_v1 = vld [vmem:[%s2982_s1 + $0x10] ss:$8 sps:$4 sm:$0x3f]   ;;  %2270 = vmatprep.subr.msk.bf16.mxu1 %vm489_vm0, %v2298_v0  ;;  %2082 = vmatprep.subr.msk.bf16.mxu0 %vm489_vm0, %v2298_v0  ;;  %v2301_v2 = vld [vmem:[%s2982_s1 + $0x4] ss:$8 sps:$4 sm:$0x3f]  }
   0xe   : > { %v491_v3 = vsel %vm489_vm0, %v2300_v1, 0  ;;  %528 = vmatprep.mubr.bf16.mxu0 %v2379_v4  ;;  %608 = vmatprep.mubr.bf16.mxu1 %v2379_v4  ;;  %s3033_s15 = smov (!%p250_p4, %s2369_s15), 1  ;;  %v2306_v5 = vld [vmem:[%s2982_s1 + $0x24] ss:$8 sps:$4 sm:$0x3f]   ;;  %vm440_vm1 = vcmask 97280  }
   0xf   : > { %2271 = vmatpush1.bf16.msra.mxu1 %v491_v3  ;;  %511 = vmatpush1.bf16.msra.mxu0 %v491_v3  ;;  %v2308_v6 = vld [vmem:[%s2982_s1 + $0x20] ss:$8 sps:$4 sm:$0x3f]   ;;  %s2272_s29 = smul.u32 144, %s3033_s15  ;;  %s2237_s13 = sshll.u32 %s3033_s15, 8 }
  0x10   : > { %2117 = vmatprep.subr.msk.bf16.mxu1 %vm489_vm0, %v2301_v2  ;;  %v2305_v7 = vld [vmem:[%s2982_s1] ss:$8 sps:$4 sm:$0x3f]   ;;  %2186 = vmatprep.subr.msk.bf16.mxu0 %vm489_vm0, %v2306_v5  ;;  %v1197_v9 = vsel %vm489_vm0, %v2308_v6, 0  ;;  %s2759_s19 = scalar_lea.vmem %s2985_s4, %s2237_s13 }
  0x11   : > { %s2454_s8 = scalar_lea.vmem %s2981_s0, %s2272_s29  ;;  %v826_v11 = vsel %vm489_vm0, %v2305_v7, 0 }
  0x12   : > { %v2303_v8 = vld [vmem:[%s2454_s8 + $0x8] sm:$0xff]   ;;  %v2309_v12 = vld [vmem:[%s2454_s8 + $0x10] sm:$0xff]   ;;  %v2311_v14 = vld [vmem:[%s2454_s8 + $0x18] sm:$0xff]  }
  0x13   : > { %v2304_v10 = vld [vmem:[%s2454_s8 + $0x48] sm:$0xff]   ;;  %2083 = vmatmul.mubr.msk.bf16.vlgmr.msra.gmra.mxu0 %vm440_vm1, %v2303_v8  ;;  %v2310_v13 = vld [vmem:[%s2454_s8 + $0x50] sm:$0xff]   ;;  %v2312_v15 = vld [vmem:[%s2454_s8 + $0x58] sm:$0xff]  }
  0x14   : > { %2091 = vmatmul.mubr.msk.bf16.vlgmr.msra.gmra.mxu1 %vm440_vm1, %v2304_v10  ;;  %1217 = vmatpush1.bf16.msra.mxu0 %v1197_v9  ;;  %v2313_v16 = vld [vmem:[%s2454_s8 + $0x20] sm:$0xff]   ;;  %v2315_v18 = vld [vmem:[%s2454_s8 + $0x28] sm:$0xff]   ;;  %v2317_v20 = vld [vmem:[%s2454_s8 + $0x30] sm:$0xff]  }
  0x15   : > { %846 = vmatpush1.bf16.msra.mxu1 %v826_v11  ;;  %538 = vmatprep.mubr.bf16.mxu0 %v2379_v4  ;;  %v2314_v17 = vld [vmem:[%s2454_s8 + $0x60] sm:$0xff]   ;;  %v2316_v19 = vld [vmem:[%s2454_s8 + $0x68] sm:$0xff]   ;;  %v2318_v21 = vld [vmem:[%s2454_s8 + $0x70] sm:$0xff]  }
  0x16   : > { %618 = vmatprep.mubr.bf16.mxu1 %v2379_v4  ;;  %v2319_v22 = vld [vmem:[%s2454_s8 + $0x38] sm:$0xff]   ;;  %v2321_v24 = vld [vmem:[%s2454_s8 + $0x40] sm:$0xff]   ;;  %v2324_v26 = vld [vmem:[%s2454_s8 + $0x10] sm:$0xff]  }
  0x17   : > { %v2320_v23 = vld [vmem:[%s2454_s8 + $0x78] sm:$0xff]   ;;  %v2322_v25 = vld [vmem:[%s2454_s8 + $0x80] sm:$0xff]   ;;  %v2325_v29 = vld [vmem:[%s2454_s8 + $0x8] sm:$0xff]  }
  0x18   : > { %v2323_v27 = vld [vmem:[%s2454_s8] sm:$0xff]   ;;  %v2326_v28 = vld [vmem:[%s2454_s8 + $0x18] sm:$0xff]   ;;  %v2327_v31 = vld [vmem:[%s2454_s8 + $0x10] sm:$0xff]  }
  0x19   : > { %v2328_v30 = vld [vmem:[%s2454_s8 + $0x20] sm:$0xff]   ;;  %v2330_v32 = vld [vmem:[%s2454_s8 + $0x28] sm:$0xff]   ;;  %v2329_v33 = vld [vmem:[%s2454_s8 + $0x18] sm:$0xff]  }
  0x1a   : > { %v2332_v34 = vld [vmem:[%s2454_s8 + $0x30] sm:$0xff]   ;;  %v2331_v35 = vld [vmem:[%s2454_s8 + $0x20] sm:$0xff]   ;;  %v2334_v36 = vld [vmem:[%s2454_s8 + $0x38] sm:$0xff]  }
  0x1b   : > { %2084 = vmatmul.mubr.msk.bf16.gmra.mxu0 %vm440_vm1, %v2309_v12  ;;  %v2333_v37 = vld [vmem:[%s2454_s8 + $0x28] sm:$0xff]   ;;  %v2336_v38 = vld [vmem:[%s2454_s8 + $0x40] sm:$0xff]   ;;  %v2335_v39 = vld [vmem:[%s2454_s8 + $0x30] sm:$0xff]  }
  0x1c   : > { %2092 = vmatmul.mubr.msk.bf16.gmra.mxu1 %vm440_vm1, %v2310_v13  ;;  %548 = vmatprep.mubr.bf16.mxu0 %v2379_v4  ;;  %v2338_v40 = vld [vmem:[%s2454_s8 + $0x48] sm:$0xff]   ;;  %v2337_v41 = vld [vmem:[%s2454_s8 + $0x38] sm:$0xff]   ;;  %v2340_v42 = vld [vmem:[%s2454_s8 + $0x50] sm:$0xff]  }
  0x1d   : > { %628 = vmatprep.mubr.bf16.mxu1 %v2379_v4  ;;  %v2339_v43 = vld [vmem:[%s2454_s8 + $0x40] sm:$0xff]   ;;  %v2342_v44 = vld [vmem:[%s2454_s8 + $0x58] sm:$0xff]   ;;  %v2341_v45 = vld [vmem:[%s2454_s8 + $0x48] sm:$0xff]  }
  0x1e   : > { %v2344_v46 = vld [vmem:[%s2454_s8 + $0x60] sm:$0xff]   ;;  %v2343_v47 = vld [vmem:[%s2454_s8 + $0x50] sm:$0xff]   ;;  %v2346_v48 = vld [vmem:[%s2454_s8 + $0x68] sm:$0xff]  }
  0x1f   : > { %v2345_v49 = vld [vmem:[%s2454_s8 + $0x58] sm:$0xff]   ;;  %v2348_v50 = vld [vmem:[%s2454_s8 + $0x70] sm:$0xff]   ;;  %v2347_v51 = vld [vmem:[%s2454_s8 + $0x60] sm:$0xff]  }
  0x20   : > { %v2350_v52 = vld [vmem:[%s2454_s8 + $0x78] sm:$0xff]   ;;  %v2349_v53 = vld [vmem:[%s2454_s8 + $0x68] sm:$0xff]   ;;  %v2352_v54 = vld [vmem:[%s2454_s8 + $0x80] sm:$0xff]  }
  0x21   : > { %v2351_v55 = vld [vmem:[%s2454_s8 + $0x70] sm:$0xff]   ;;  %v2354_v56 = vld [vmem:[%s2454_s8 + $0x88] sm:$0xff]   ;;  %v2353_v57 = vld [vmem:[%s2454_s8 + $0x78] sm:$0xff]  }
  0x23   : > { %2085 = vmatmul.mubr.msk.bf16.gmra.mxu0 %vm440_vm1, %v2311_v14 }
  0x24   : > { %2093 = vmatmul.mubr.msk.bf16.gmra.mxu1 %vm440_vm1, %v2312_v15  ;;  %558 = vmatprep.mubr.bf16.mxu0 %v2379_v4 }
  0x25   : > { %638 = vmatprep.mubr.bf16.mxu1 %v2379_v4 }
  0x2b   : > { %2086 = vmatmul.mubr.msk.bf16.gmra.mxu0 %vm440_vm1, %v2313_v16 }
  0x2c   : > { %2094 = vmatmul.mubr.msk.bf16.gmra.mxu1 %vm440_vm1, %v2314_v17  ;;  %568 = vmatprep.mubr.bf16.mxu0 %v2379_v4 }
  0x2d   : > { %648 = vmatprep.mubr.bf16.mxu1 %v2379_v4 }
  0x33   : > { %2087 = vmatmul.mubr.msk.bf16.gmra.mxu0 %vm440_vm1, %v2315_v18 }
  0x34   : > { %2095 = vmatmul.mubr.msk.bf16.gmra.mxu1 %vm440_vm1, %v2316_v19  ;;  %578 = vmatprep.mubr.bf16.mxu0 %v2379_v4 }
  0x35   : > { %658 = vmatprep.mubr.bf16.mxu1 %v2379_v4 }
  0x3b   : > { %2088 = vmatmul.mubr.msk.bf16.gmra.mxu0 %vm440_vm1, %v2317_v20 }
  0x3c   : > { %2096 = vmatmul.mubr.msk.bf16.gmra.mxu1 %vm440_vm1, %v2318_v21  ;;  %588 = vmatprep.mubr.bf16.mxu0 %v2379_v4 }
  0x3d   : > { %668 = vmatprep.mubr.bf16.mxu1 %v2379_v4 }
  0x43   : > { %2089 = vmatmul.mubr.msk.bf16.gmra.mxu0 %vm440_vm1, %v2319_v22 }
  0x44   : > { %2097 = vmatmul.mubr.msk.bf16.gmra.mxu1 %vm440_vm1, %v2320_v23  ;;  %598 = vmatprep.mubr.bf16.mxu0 %v2379_v4 }
  0x45   : > { %678 = vmatprep.mubr.bf16.mxu1 %v2379_v4 }
  0x4b   : > { %2090 = vmatmul.mubr.msk.bf16.gmra.mxu0 %vm440_vm1, %v2321_v24 }
  0x4c   : > { %2098 = vmatmul.mubr.msk.bf16.gmra.mxu1 %vm440_vm1, %v2322_v25  ;;  %1234 = vmatprep.mubr.bf16.mxu0 %v2379_v4 }
  0x4d   : > { %863 = vmatprep.mubr.bf16.mxu1 %v2379_v4 }
  0x53   : > { %2187 = vmatmul.mubr.msk.bf16.vlgmr.msra.gmra.mxu0 %vm440_vm1, %v2324_v26 }
  0x54   : > { %2118 = vmatmul.mubr.msk.bf16.vlgmr.msra.gmra.mxu1 %vm440_vm1, %v2323_v27  ;;  %1244 = vmatprep.mubr.bf16.mxu0 %v2379_v4 }
  0x55   : > { %873 = vmatprep.mubr.bf16.mxu1 %v2379_v4 }
  0x5b   : > { %2188 = vmatmul.mubr.msk.bf16.gmra.mxu0 %vm440_vm1, %v2326_v28 }
  0x5c   : > { %2119 = vmatmul.mubr.msk.bf16.gmra.mxu1 %vm440_vm1, %v2325_v29  ;;  %1254 = vmatprep.mubr.bf16.mxu0 %v2379_v4 }
  0x5d   : > { %883 = vmatprep.mubr.bf16.mxu1 %v2379_v4 }
  0x63   : > { %2189 = vmatmul.mubr.msk.bf16.gmra.mxu0 %vm440_vm1, %v2328_v30 }
  0x64   : > { %2120 = vmatmul.mubr.msk.bf16.gmra.mxu1 %vm440_vm1, %v2327_v31  ;;  %1264 = vmatprep.mubr.bf16.mxu0 %v2379_v4 }
  0x65   : > { %893 = vmatprep.mubr.bf16.mxu1 %v2379_v4 }
  0x6b   : > { %2190 = vmatmul.mubr.msk.bf16.gmra.mxu0 %vm440_vm1, %v2330_v32 }
  0x6c   : > { %2121 = vmatmul.mubr.msk.bf16.gmra.mxu1 %vm440_vm1, %v2329_v33  ;;  %1274 = vmatprep.mubr.bf16.mxu0 %v2379_v4 }
  0x6d   : > { %903 = vmatprep.mubr.bf16.mxu1 %v2379_v4 }
  0x73   : > { %2191 = vmatmul.mubr.msk.bf16.gmra.mxu0 %vm440_vm1, %v2332_v34 }
  0x74   : > { %2122 = vmatmul.mubr.msk.bf16.gmra.mxu1 %vm440_vm1, %v2331_v35  ;;  %1284 = vmatprep.mubr.bf16.mxu0 %v2379_v4 }
  0x75   : > { %913 = vmatprep.mubr.bf16.mxu1 %v2379_v4 }
  0x7b   : > { %2192 = vmatmul.mubr.msk.bf16.gmra.mxu0 %vm440_vm1, %v2334_v36 }
  0x7c   : > { %2123 = vmatmul.mubr.msk.bf16.gmra.mxu1 %vm440_vm1, %v2333_v37  ;;  %1294 = vmatprep.mubr.bf16.mxu0 %v2379_v4 }
  0x7d   : > { %923 = vmatprep.mubr.bf16.mxu1 %v2379_v4 }
  0x83   : > { %2193 = vmatmul.mubr.msk.bf16.gmra.mxu0 %vm440_vm1, %v2336_v38 }
  0x84   : > { %2124 = vmatmul.mubr.msk.bf16.gmra.mxu1 %vm440_vm1, %v2335_v39  ;;  %1304 = vmatprep.mubr.bf16.mxu0 %v2379_v4 }
  0x85   : > { %933 = vmatprep.mubr.bf16.mxu1 %v2379_v4 }
  0x8b   : > { %2194 = vmatmul.mubr.msk.bf16.gmra.mxu0 %vm440_vm1, %v2338_v40 }
  0x8c   : > { %2125 = vmatmul.mubr.msk.bf16.gmra.mxu1 %vm440_vm1, %v2337_v41  ;;  %1314 = vmatprep.mubr.bf16.mxu0 %v2379_v4 }
  0x8d   : > { %943 = vmatprep.mubr.bf16.mxu1 %v2379_v4 }
  0x93   : > { %2195 = vmatmul.mubr.msk.bf16.gmra.mxu0 %vm440_vm1, %v2340_v42 }
  0x94   : > { %2126 = vmatmul.mubr.msk.bf16.gmra.mxu1 %vm440_vm1, %v2339_v43  ;;  %1324 = vmatprep.mubr.bf16.mxu0 %v2379_v4 }
  0x95   : > { %953 = vmatprep.mubr.bf16.mxu1 %v2379_v4 }
  0x9b   : > { %2196 = vmatmul.mubr.msk.bf16.gmra.mxu0 %vm440_vm1, %v2342_v44 }
  0x9c   : > { %2127 = vmatmul.mubr.msk.bf16.gmra.mxu1 %vm440_vm1, %v2341_v45  ;;  %1334 = vmatprep.mubr.bf16.mxu0 %v2379_v4 }
  0x9d   : > { %963 = vmatprep.mubr.bf16.mxu1 %v2379_v4 }
  0xa3   : > { %2197 = vmatmul.mubr.msk.bf16.gmra.mxu0 %vm440_vm1, %v2344_v46 }
  0xa4   : > { %2128 = vmatmul.mubr.msk.bf16.gmra.mxu1 %vm440_vm1, %v2343_v47  ;;  %1344 = vmatprep.mubr.bf16.mxu0 %v2379_v4 }
  0xa5   : > { %973 = vmatprep.mubr.bf16.mxu1 %v2379_v4 }
  0xab   : > { %2198 = vmatmul.mubr.msk.bf16.gmra.mxu0 %vm440_vm1, %v2346_v48 }
  0xac   : > { %2129 = vmatmul.mubr.msk.bf16.gmra.mxu1 %vm440_vm1, %v2345_v49  ;;  %1354 = vmatprep.mubr.bf16.mxu0 %v2379_v4  ;;  %v1461_v49 = vlaneseq }
  0xad   : > { %983 = vmatprep.mubr.bf16.mxu1 %v2379_v4 }
  0xb3   : > { %2199 = vmatmul.mubr.msk.bf16.gmra.mxu0 %vm440_vm1, %v2348_v50 }
  0xb4   : > { %2130 = vmatmul.mubr.msk.bf16.gmra.mxu1 %vm440_vm1, %v2347_v51  ;;  %1364 = vmatprep.mubr.bf16.mxu0 %v2379_v4 }
  0xb5   : > { %993 = vmatprep.mubr.bf16.mxu1 %v2379_v4 }
  0xbb   : > { %2200 = vmatmul.mubr.msk.bf16.gmra.mxu0 %vm440_vm1, %v2350_v52 }
  0xbc   : > { %2131 = vmatmul.mubr.msk.bf16.gmra.mxu1 %vm440_vm1, %v2349_v53  ;;  %1374 = vmatprep.mubr.bf16.mxu0 %v2379_v4 }
  0xbd   : > { %1003 = vmatprep.mubr.bf16.mxu1 %v2379_v4 }
  0xc3   : > { %2201 = vmatmul.mubr.msk.bf16.gmra.mxu0 %vm440_vm1, %v2352_v54  ;;  %v1462_v54 = vshrl.u32 %v1461_v49, 7  ;;  %v1535_v49 = vld [vmem:[%s2984_s3] sm:$0x3] }
  0xc4   : > { %2132 = vmatmul.mubr.msk.bf16.gmra.mxu1 %vm440_vm1, %v2351_v55  ;;  %1384 = vmatprep.mubr.bf16.mxu0 %v2379_v4 }
  0xc5   : > { %1013 = vmatprep.mubr.bf16.mxu1 %v2379_v4 }
  0xcb   : > { %2202 = vmatmul.mubr.msk.bf16.gmra.mxu0 %vm440_vm1, %v2354_v56 }
  0xcc   : > { %2133 = vmatmul.mubr.msk.bf16.gmra.mxu1 %vm440_vm1, %v2353_v57 }
  0xd3   : > { %v2600_v58 = vpop.f32.mrf.mxu0 }
  0xd4   : > { %v2602_v59 = vpop.f32.mrf.mxu1 }
  0xd5   : > { %v2604_v60 = vpop.f32.mrf.mxu0 }
  0xd6   : > { %v2606_v61 = vpop.f32.mrf.mxu1 }
  0xd7   : > { %v2608_v62 = vpop.f32.mrf.mxu0 }
  0xd8   : > { %v2610_v63 = vpop.f32.mrf.mxu1 }
  0xd9   : > { %v2612_v0 = vpop.f32.mrf.mxu0 }
  0xda   : > { %v2614_v1 = vpop.f32.mrf.mxu1 }
  0xdb   : > { %v2616_v2 = vpop.f32.mrf.mxu0 }
  0xdc   : > { %v2618_v3 = vpop.f32.mrf.mxu1 }
  0xdd   : > { %v2620_v4 = vpop.f32.mrf.mxu0 }
  0xde   : > { %v2622_v5 = vpop.f32.mrf.mxu1 }
  0xdf   : > { %v2624_v6 = vpop.f32.mrf.mxu0 }
  0xe0   : > { %v2626_v7 = vpop.f32.mrf.mxu1 }
  0xe1   : > { %v2628_v8 = vpop.f32.mrf.mxu0 }
  0xe2   : > { %v2630_v9 = vpop.f32.mrf.mxu1 }
  0xe3   : > { %v2632_v10 = vpop.f32.mrf.mxu0 }
  0xe4   : > { %v2634_v11 = vpop.f32.mrf.mxu1 }
  0xe5   : > { %v2636_v12 = vpop.f32.mrf.mxu0 }
  0xe6   : > { %v2638_v13 = vpop.f32.mrf.mxu1 }
  0xe7   : > { %v2640_v14 = vpop.f32.mrf.mxu0 }
  0xe8   : > { %v2642_v15 = vpop.f32.mrf.mxu1 }
  0xe9   : > { %v2644_v16 = vpop.f32.mrf.mxu0 }
  0xea   : > { %v2646_v17 = vpop.f32.mrf.mxu1 }
  0xeb   : > { %2986 = vst [vmem:[#allocation2_spill] sm:$0xff] %v2646_v17  ;;  %v2648_v18 = vpop.f32.mrf.mxu0 }
  0xec   : > { %v2650_v19 = vpop.f32.mrf.mxu1 }
  0xed   : > { %2987 = vst [vmem:[#allocation3_spill] sm:$0xff] %v2650_v19  ;;  %v2652_v20 = vpop.f32.mrf.mxu0 }
  0xee   : > { %v2654_v21 = vpop.f32.mrf.mxu1 }
  0xef   : > { %2988 = vst [vmem:[#allocation4_spill] sm:$0xff] %v2654_v21  ;;  %v2656_v22 = vpop.f32.mrf.mxu0 }
  0xf0   : > { %v2658_v23 = vpop.f32.mrf.mxu1 }
  0xf1   : > { %2989 = vst [vmem:[#allocation5_spill] sm:$0xff] %v2658_v23  ;;  %v2660_v24 = vpop.f32.mrf.mxu0 }
  0xf2   : > { %v2662_v25 = vpop.f32.mrf.mxu1 }
  0xf3   : > { %2990 = vst [vmem:[#allocation6_spill] sm:$0xff] %v2662_v25  ;;  %v2664_v26 = vpop.f32.mrf.mxu0 }
  0xf4   : > { %v2666_v27 = vpop.f32.mrf.mxu1 }
  0xf5   : > { %2991 = vst [vmem:[#allocation7_spill] sm:$0xff] %v2666_v27  ;;  %v2668_v28 = vpop.f32.mrf.mxu0 }
  0xf6   : > { %v2670_v29 = vpop.f32.mrf.mxu1 }
  0xf7   : > { %2992 = vst [vmem:[#allocation8_spill] sm:$0xff] %v2670_v29  ;;  %v2672_v30 = vpop.f32.mrf.mxu0 }
  0xf8   : > { %v2674_v31 = vpop.f32.mrf.mxu1 }
  0xf9   : > { %2993 = vst [vmem:[#allocation9_spill] sm:$0xff] %v2674_v31  ;;  %v2676_v32 = vpop.f32.mrf.mxu0 }
  0xfa   : > { %v2678_v33 = vpop.f32.mrf.mxu1 }
  0xfb   : > { %2994 = vst [vmem:[#allocation10_spill] sm:$0xff] %v2678_v33  ;;  %v2680_v34 = vpop.f32.mrf.mxu0 }
  0xfc   : > { %v2682_v35 = vpop.f32.mrf.mxu1 }
  0xfd   : > { %2995 = vst [vmem:[#allocation11_spill] sm:$0xff] %v2682_v35  ;;  %v2684_v36 = vpop.f32.mrf.mxu0 }
  0xfe   : > { %v2686_v37 = vpop.f32.mrf.mxu1 }
  0xff   : > { %2996 = vst [vmem:[#allocation12_spill] sm:$0xff] %v2686_v37  ;;  %v2688_v38 = vpop.f32.mrf.mxu0 }
 0x100   : > { %v2690_v39 = vpop.f32.mrf.mxu1 }
 0x101   : > { %2997 = vst [vmem:[#allocation13_spill] sm:$0xff] %v2690_v39  ;;  %v2692_v40 = vpop.f32.mrf.mxu0 }
 0x102   : > { %v2694_v41 = vpop.f32.mrf.mxu1 }
 0x103   : > { %2998 = vst [vmem:[#allocation14_spill] sm:$0xff] %v2694_v41  ;;  %v2696_v42 = vpop.f32.mrf.mxu0 }
 0x104   : > { %v2698_v43 = vpop.f32.mrf.mxu1 }
 0x105   : > { %2999 = vst [vmem:[#allocation15_spill] sm:$0xff] %v2698_v43  ;;  %v2700_v44 = vpop.f32.mrf.mxu0 }
 0x106   : > { %v2702_v45 = vpop.f32.mrf.mxu1 }
 0x107   : > { %3000 = vst [vmem:[#allocation16_spill] sm:$0xff] %v2702_v45  ;;  %v2704_v46 = vpop.f32.mrf.mxu0 }
 0x108   : > { %v2706_v47 = vpop.f32.mrf.mxu1 }
 0x109   : > { %3001 = vst [vmem:[#allocation17_spill] sm:$0xff] %v2706_v47  ;;  %v2708_v48 = vpop.f32.mrf.mxu0  ;;  %v1463_v47 = vsub.s32 0, %v1462_v54 }
 0x10a   : > { %v2710_v50 = vpop.f32.mrf.mxu1 }
 0x10b   : > { %3002 = vst [vmem:[#allocation18_spill] sm:$0xff] %v2710_v50  ;;  %v2712_v51 = vpop.f32.mrf.mxu0  ;;  %v1459_v50 = vld [vmem:[%s2983_s2] sm:$0x3]  ;;  %v2737_v31 = vrot.slane %v1535_v49, %v1463_v47 }
 0x10c   : > { %v2714_v52 = vpop.f32.mrf.mxu1  ;;  %v2735_v37 = vrot.slane %v1459_v50, %v1463_v47 }
 0x10d   : > { %3003 = vst [vmem:[#allocation19_spill] sm:$0xff] %v2714_v52  ;;  %v2716_v53 = vpop.f32.mrf.mxu0  ;;  %v1467_v52 = vsub.s32 1, %v1462_v54 }
 0x10e   : > { %v2718_v55 = vpop.f32.mrf.mxu1 }
 0x10f   : > { %3004 = vst [vmem:[#allocation20_spill] sm:$0xff] %v2718_v55  ;;  %v2720_v56 = vpop.f32.mrf.mxu0  ;;  %v2740_v29 = vrot.slane %v1459_v50, %v1467_v52  ;;  %v2743_v21 = vrot.slane %v1535_v49, %v1467_v52 }
 0x110   : > { %v2722_v57 = vpop.f32.mrf.mxu1 }
 0x111   : > { %3005 = vst [vmem:[#allocation21_spill] sm:$0xff] %v2722_v57  ;;  %v2724_v45 = vpop.f32.mrf.mxu0 }
 0x112   : > { %v2726_v43 = vpop.f32.mrf.mxu1 }
 0x113   : > { %3006 = vst [vmem:[#allocation22_spill] sm:$0xff] %v2726_v43  ;;  %v1236_v41 = vpop.f32.mrf.mxu0 }
 0x114   : > { %v865_v39 = vpop.f32.mrf.mxu1 }
 0x115   : > { %v866_v55 = vadd.f32 %v865_v39, %v2600_v58  ;;  %v1238_v57 = vpop.f32.mrf.mxu0 }
 0x116   : > { %v867_v35 = vpop.f32.mrf.mxu1 }
 0x117   : > { %v1395_v33 = vadd.f32 %v1236_v41, %v866_v55  ;;  %v868_v43 = vadd.f32 %v867_v35, %v2604_v60  ;;  %v1240_v54 = vpop.f32.mrf.mxu0 }
 0x118   : > { %v869_v27 = vpop.f32.mrf.mxu1 }
 0x119   : > { %v1471_v25 = vmul.f32 %v2735_v37, %v1395_v33  ;;  %v1396_v23 = vadd.f32 %v1238_v57, %v868_v43  ;;  %v870_v58 = vadd.f32 %v869_v27, %v2608_v62  ;;  %v1242_v39 = vpop.f32.mrf.mxu0 }
 0x11a   : > { %v871_v19 = vpop.f32.mrf.mxu1 }
 0x11b   : > { %v1547_v41 = vadd.f32 %v2737_v31, %v1471_v25  ;;  %v1472_v47 = vmul.f32 %v2740_v29, %v1396_v23  ;;  %v1397_v55 = vadd.f32 %v1240_v54, %v870_v58  ;;  %v872_v60 = vadd.f32 %v871_v19, %v2612_v0  ;;  %v1246_v35 = vpop.f32.mrf.mxu0 }
 0x11c   : > { %v875_v50 = vpop.f32.mrf.mxu1 }
 0x11d   : > { %v1548_v17 = vadd.f32 %v2743_v21, %v1472_v47  ;;  %v1473_v33 = vmul.f32 %v2735_v37, %v1397_v55  ;;  %v1398_v43 = vadd.f32 %v1242_v39, %v872_v60  ;;  %v1248_v52 = vpop.f32.mrf.mxu0  ;;  %v1611_v57 = vmax.f32 %v1547_v41, 0.0 }
 0x11e   : > { %v876_v62 = vadd.f32 %v875_v50, %v2616_v2  ;;  %v877_v27 = vpop.f32.mrf.mxu1 }
 0x11f   : > { %v1612_v49 = vmax.f32 %v1548_v17, 0.0  ;;  %v1549_v25 = vadd.f32 %v2737_v31, %v1473_v33  ;;  %v1474_v23 = vmul.f32 %v2740_v29, %v1398_v43  ;;  %v878_v0 = vadd.f32 %v877_v27, %v2620_v4  ;;  %v1250_v19 = vpop.f32.mrf.mxu0 }
 0x120   : > { %v1399_v54 = vadd.f32 %v1246_v35, %v876_v62  ;;  %v879_v58 = vpop.f32.mrf.mxu1 }
 0x121   : > { %v2238_v39 = vpack.c.bf16 %v1612_v49, %v1611_v57  ;;  %v1550_v2 = vadd.f32 %v2743_v21, %v1474_v23  ;;  %v1400_v41 = vadd.f32 %v1248_v52, %v878_v0  ;;  %v1252_v17 = vpop.f32.mrf.mxu0  ;;  %v880_v55 = vadd.f32 %v879_v58, %v2624_v6 }
 0x122   : > { %v1475_v47 = vmul.f32 %v2735_v37, %v1399_v54  ;;  %v881_v60 = vpop.f32.mrf.mxu1  ;;  %v1613_v4 = vmax.f32 %v1549_v25, 0.0 }
 0x123   : > { %1867 = vst [vmem:[%s2759_s19] sm:$0xff] %v2238_v39  ;;  %v1614_v50 = vmax.f32 %v1550_v2, 0.0  ;;  %v1476_v33 = vmul.f32 %v2740_v29, %v1400_v41  ;;  %v882_v43 = vadd.f32 %v881_v60, %v2628_v8  ;;  %v1256_v35 = vpop.f32.mrf.mxu0  ;;  %v1401_v62 = vadd.f32 %v1250_v19, %v880_v55 }
 0x124   : > { %v1551_v57 = vadd.f32 %v2737_v31, %v1475_v47  ;;  %v885_v27 = vpop.f32.mrf.mxu1 }
 0x125   : > { %v2239_v52 = vpack.c.bf16 %v1614_v50, %v1613_v4  ;;  %v1552_v49 = vadd.f32 %v2743_v21, %v1476_v33  ;;  %v1402_v23 = vadd.f32 %v1252_v17, %v882_v43  ;;  %v886_v6 = vadd.f32 %v885_v27, %v2632_v10  ;;  %v1258_v0 = vpop.f32.mrf.mxu0 }
 0x126   : > { %v1615_v54 = vmax.f32 %v1551_v57, 0.0  ;;  %v1477_v25 = vmul.f32 %v2735_v37, %v1401_v62  ;;  %v887_v58 = vpop.f32.mrf.mxu1 }
 0x127   : > { %1868 = vst [vmem:[%s2759_s19 + $0x8] sm:$0xff] %v2239_v52  ;;  %v1616_v39 = vmax.f32 %v1552_v49, 0.0  ;;  %v1478_v8 = vmul.f32 %v2740_v29, %v1402_v23  ;;  %v1403_v2 = vadd.f32 %v1256_v35, %v886_v6  ;;  %v888_v19 = vadd.f32 %v887_v58, %v2636_v12  ;;  %v1260_v41 = vpop.f32.mrf.mxu0 }
 0x128   : > { %v1553_v47 = vadd.f32 %v2737_v31, %v1477_v25  ;;  %v889_v55 = vpop.f32.mrf.mxu1 }
 0x129   : > { %v2240_v17 = vpack.c.bf16 %v1616_v39, %v1615_v54  ;;  %v1554_v10 = vadd.f32 %v2743_v21, %v1478_v8  ;;  %v1479_v60 = vmul.f32 %v2735_v37, %v1403_v2  ;;  %v1404_v4 = vadd.f32 %v1258_v0, %v888_v19  ;;  %v1262_v50 = vpop.f32.mrf.mxu0 }
 0x12a   : > { %v1617_v33 = vmax.f32 %v1553_v47, 0.0  ;;  %v890_v43 = vadd.f32 %v889_v55, %v2640_v14  ;;  %v891_v57 = vpop.f32.mrf.mxu1 }
 0x12b   : > { %1869 = vst [vmem:[%s2759_s19 + $0x10] sm:$0xff] %v2240_v17  ;;  %v1618_v35 = vmax.f32 %v1554_v10, 0.0  ;;  %v1555_v12 = vadd.f32 %v2737_v31, %v1479_v60  ;;  %v1480_v62 = vmul.f32 %v2740_v29, %v1404_v4  ;;  %v892_v27 = vadd.f32 %v891_v57, %v2644_v16  ;;  %v1266_v52 = vpop.f32.mrf.mxu0 }
 0x12c   : > { %v1405_v49 = vadd.f32 %v1260_v41, %v890_v43  ;;  %v895_v23 = vpop.f32.mrf.mxu1 }
 0x12d   : > { %v2241_v6 = vpack.c.bf16 %v1618_v35, %v1617_v33  ;;  %v1556_v0 = vadd.f32 %v2743_v21, %v1480_v62  ;;  %v1406_v54 = vadd.f32 %v1262_v50, %v892_v27  ;;  %v1268_v25 = vpop.f32.mrf.mxu0  ;;  %v896_v58 = vadd.f32 %v895_v23, %v2648_v18 }
 0x12e   : > { %v1481_v14 = vmul.f32 %v2735_v37, %v1405_v49  ;;  %v897_v39 = vpop.f32.mrf.mxu1  ;;  %v1619_v8 = vmax.f32 %v1555_v12, 0.0 }
 0x12f   : > { %1870 = vst [vmem:[%s2759_s19 + $0x18] sm:$0xff] %v2241_v6  ;;  %v1620_v2 = vmax.f32 %v1556_v0, 0.0  ;;  %v1482_v19 = vmul.f32 %v2740_v29, %v1406_v54  ;;  %v898_v16 = vadd.f32 %v897_v39, %v2652_v20  ;;  %v1270_v41 = vpop.f32.mrf.mxu0  ;;  %v1407_v55 = vadd.f32 %v1266_v52, %v896_v58 }
 0x130   : > { %v1557_v47 = vadd.f32 %v2737_v31, %v1481_v14  ;;  %v899_v17 = vpop.f32.mrf.mxu1 }
 0x131   : > { %v2242_v10 = vpack.c.bf16 %v1620_v2, %v1619_v8  ;;  %v1558_v60 = vadd.f32 %v2743_v21, %v1482_v19  ;;  %v1408_v4 = vadd.f32 %v1268_v25, %v898_v16  ;;  %v900_v18 = vadd.f32 %v899_v17, %v2656_v22  ;;  %v1272_v50 = vpop.f32.mrf.mxu0 }
 0x132   : > { %v1621_v33 = vmax.f32 %v1557_v47, 0.0  ;;  %v1483_v43 = vmul.f32 %v2735_v37, %v1407_v55  ;;  %v901_v57 = vpop.f32.mrf.mxu1 }
 0x133   : > { %1871 = vst [vmem:[%s2759_s19 + $0x20] sm:$0xff] %v2242_v10  ;;  %v1622_v35 = vmax.f32 %v1558_v60, 0.0  ;;  %v1484_v20 = vmul.f32 %v2740_v29, %v1408_v4  ;;  %v1409_v12 = vadd.f32 %v1270_v41, %v900_v18  ;;  %v902_v62 = vadd.f32 %v901_v57, %v2660_v24  ;;  %v1276_v27 = vpop.f32.mrf.mxu0 }
 0x134   : > { %v1559_v52 = vadd.f32 %v2737_v31, %v1483_v43  ;;  %v905_v49 = vpop.f32.mrf.mxu1 }
 0x135   : > { %v2243_v23 = vpack.c.bf16 %v1622_v35, %v1621_v33  ;;  %v1560_v22 = vadd.f32 %v2743_v21, %v1484_v20  ;;  %v1485_v6 = vmul.f32 %v2735_v37, %v1409_v12  ;;  %v1410_v0 = vadd.f32 %v1272_v50, %v902_v62  ;;  %v1278_v54 = vpop.f32.mrf.mxu0 }
 0x136   : > { %v1623_v25 = vmax.f32 %v1559_v52, 0.0  ;;  %v906_v14 = vadd.f32 %v905_v49, %v2664_v26  ;;  %v907_v58 = vpop.f32.mrf.mxu1 }
 0x137   : > { %1872 = vst [vmem:[%s2759_s19 + $0x28] sm:$0xff] %v2243_v23  ;;  %v1624_v39 = vmax.f32 %v1560_v22, 0.0  ;;  %v1561_v24 = vadd.f32 %v2737_v31, %v1485_v6  ;;  %v1486_v8 = vmul.f32 %v2740_v29, %v1410_v0  ;;  %v908_v2 = vadd.f32 %v907_v58, %v2668_v28  ;;  %v1280_v19 = vpop.f32.mrf.mxu0 }
 0x138   : > { %v1411_v16 = vadd.f32 %v1276_v27, %v906_v14  ;;  %v909_v41 = vpop.f32.mrf.mxu1 }
 0x139   : > { %v2244_v47 = vpack.c.bf16 %v1624_v39, %v1623_v25  ;;  %v1562_v55 = vadd.f32 %v2743_v21, %v1486_v8  ;;  %v1412_v17 = vadd.f32 %v1278_v54, %v908_v2  ;;  %v1282_v10 = vpop.f32.mrf.mxu0  ;;  %v910_v60 = vadd.f32 %v909_v41, %v2672_v30 }
 0x13a   : > { %v1487_v26 = vmul.f32 %v2735_v37, %v1411_v16  ;;  %v911_v4 = vpop.f32.mrf.mxu1  ;;  %v1625_v18 = vmax.f32 %v1561_v24, 0.0 }
 0x13b   : > { %1873 = vst [vmem:[%s2759_s19 + $0x30] sm:$0xff] %v2244_v47  ;;  %v1626_v50 = vmax.f32 %v1562_v55, 0.0  ;;  %v1488_v33 = vmul.f32 %v2740_v29, %v1412_v17  ;;  %v912_v28 = vadd.f32 %v911_v4, %v2676_v32  ;;  %v1286_v43 = vpop.f32.mrf.mxu0  ;;  %v1413_v35 = vadd.f32 %v1280_v19, %v910_v60 }
 0x13c   : > { %v1563_v57 = vadd.f32 %v2737_v31, %v1487_v26  ;;  %v915_v20 = vpop.f32.mrf.mxu1 }
 0x13d   : > { %v2245_v12 = vpack.c.bf16 %v1626_v50, %v1625_v18  ;;  %v1564_v62 = vadd.f32 %v2743_v21, %v1488_v33  ;;  %v1414_v27 = vadd.f32 %v1282_v10, %v912_v28  ;;  %v916_v30 = vadd.f32 %v915_v20, %v2680_v34  ;;  %v1288_v52 = vpop.f32.mrf.mxu0 }
 0x13e   : > { %v1627_v49 = vmax.f32 %v1563_v57, 0.0  ;;  %v1489_v23 = vmul.f32 %v2735_v37, %v1413_v35  ;;  %v917_v22 = vpop.f32.mrf.mxu1 }
 0x13f   : > { %1874 = vst [vmem:[%s2759_s19 + $0x38] sm:$0xff] %v2245_v12  ;;  %v1628_v6 = vmax.f32 %v1564_v62, 0.0  ;;  %v1490_v32 = vmul.f32 %v2740_v29, %v1414_v27  ;;  %v1415_v0 = vadd.f32 %v1286_v43, %v916_v30  ;;  %v918_v54 = vadd.f32 %v917_v22, %v2684_v36  ;;  %v1290_v25 = vpop.f32.mrf.mxu0 }
 0x140   : > { %v1565_v14 = vadd.f32 %v2737_v31, %v1489_v23  ;;  %v919_v58 = vpop.f32.mrf.mxu1 }
 0x141   : > { %v2246_v39 = vpack.c.bf16 %v1628_v6, %v1627_v49  ;;  %v1566_v34 = vadd.f32 %v2743_v21, %v1490_v32  ;;  %v1491_v24 = vmul.f32 %v2735_v37, %v1415_v0  ;;  %v1416_v8 = vadd.f32 %v1288_v52, %v918_v54  ;;  %v1292_v2 = vpop.f32.mrf.mxu0 }
 0x142   : > { %v1629_v19 = vmax.f32 %v1565_v14, 0.0  ;;  %v920_v16 = vadd.f32 %v919_v58, %v2688_v38  ;;  %v921_v41 = vpop.f32.mrf.mxu1 }
 0x143   : > { %1875 = vst [vmem:[%s2759_s19 + $0x40] sm:$0xff] %v2246_v39  ;;  %v1630_v47 = vmax.f32 %v1566_v34, 0.0  ;;  %v1567_v36 = vadd.f32 %v2737_v31, %v1491_v24  ;;  %v1492_v55 = vmul.f32 %v2740_v29, %v1416_v8  ;;  %v922_v17 = vadd.f32 %v921_v41, %v2692_v40  ;;  %v1296_v10 = vpop.f32.mrf.mxu0 }
 0x144   : > { %v1417_v26 = vadd.f32 %v1290_v25, %v920_v16  ;;  %v925_v60 = vpop.f32.mrf.mxu1 }
 0x145   : > { %v2247_v4 = vpack.c.bf16 %v1630_v47, %v1629_v19  ;;  %v1568_v18 = vadd.f32 %v2743_v21, %v1492_v55  ;;  %v1418_v50 = vadd.f32 %v1292_v2, %v922_v17  ;;  %v1298_v33 = vpop.f32.mrf.mxu0  ;;  %v926_v28 = vadd.f32 %v925_v60, %v2696_v42 }
 0x146   : > { %v1493_v38 = vmul.f32 %v2735_v37, %v1417_v26  ;;  %v927_v43 = vpop.f32.mrf.mxu1  ;;  %v1631_v57 = vmax.f32 %v1567_v36, 0.0 }
 0x147   : > { %1876 = vst [vmem:[%s2759_s19 + $0x48] sm:$0xff] %v2247_v4  ;;  %v1632_v35 = vmax.f32 %v1568_v18, 0.0  ;;  %v1494_v20 = vmul.f32 %v2740_v29, %v1418_v50  ;;  %v928_v40 = vadd.f32 %v927_v43, %v2700_v44  ;;  %v1300_v12 = vpop.f32.mrf.mxu0  ;;  %v1419_v27 = vadd.f32 %v1296_v10, %v926_v28 }
 0x148   : > { %v1569_v62 = vadd.f32 %v2737_v31, %v1493_v38  ;;  %v929_v30 = vpop.f32.mrf.mxu1 }
 0x149   : > { %v2248_v52 = vpack.c.bf16 %v1632_v35, %v1631_v57  ;;  %v1570_v49 = vadd.f32 %v2743_v21, %v1494_v20  ;;  %v1420_v23 = vadd.f32 %v1298_v33, %v928_v40  ;;  %v930_v42 = vadd.f32 %v929_v30, %v2704_v46  ;;  %v1302_v22 = vpop.f32.mrf.mxu0 }
 0x14a   : > { %v1633_v6 = vmax.f32 %v1569_v62, 0.0  ;;  %v1495_v32 = vmul.f32 %v2735_v37, %v1419_v27  ;;  %v931_v0 = vpop.f32.mrf.mxu1 }
 0x14b   : > { %1877 = vst [vmem:[%s2759_s19 + $0x50] sm:$0xff] %v2248_v52  ;;  %v1634_v54 = vmax.f32 %v1570_v49, 0.0  ;;  %v1496_v44 = vmul.f32 %v2740_v29, %v1420_v23  ;;  %v1421_v25 = vadd.f32 %v1300_v12, %v930_v42  ;;  %v932_v14 = vadd.f32 %v931_v0, %v2708_v48  ;;  %v1306_v58 = vpop.f32.mrf.mxu0 }
 0x14c   : > { %v1571_v39 = vadd.f32 %v2737_v31, %v1495_v32  ;;  %v935_v34 = vpop.f32.mrf.mxu1 }
 0x14d   : > { %v2249_v24 = vpack.c.bf16 %v1634_v54, %v1633_v6  ;;  %v1572_v46 = vadd.f32 %v2743_v21, %v1496_v44  ;;  %v1497_v8 = vmul.f32 %v2735_v37, %v1421_v25  ;;  %v1422_v2 = vadd.f32 %v1302_v22, %v932_v14  ;;  %v1308_v19 = vpop.f32.mrf.mxu0 }
 0x14e   : > { %v1635_v16 = vmax.f32 %v1571_v39, 0.0  ;;  %v936_v41 = vadd.f32 %v935_v34, %v2712_v51  ;;  %v937_v47 = vpop.f32.mrf.mxu1 }
 0x14f   : > { %1878 = vst [vmem:[%s2759_s19 + $0x58] sm:$0xff] %v2249_v24  ;;  %v1636_v36 = vmax.f32 %v1572_v46, 0.0  ;;  %v1573_v48 = vadd.f32 %v2737_v31, %v1497_v8  ;;  %v1498_v55 = vmul.f32 %v2740_v29, %v1422_v2  ;;  %v938_v17 = vadd.f32 %v937_v47, %v2716_v53  ;;  %v1310_v10 = vpop.f32.mrf.mxu0 }
 0x150   : > { %v1423_v26 = vadd.f32 %v1306_v58, %v936_v41  ;;  %v939_v60 = vpop.f32.mrf.mxu1 }
 0x151   : > { %v2250_v4 = vpack.c.bf16 %v1636_v36, %v1635_v16  ;;  %v1574_v18 = vadd.f32 %v2743_v21, %v1498_v55  ;;  %v1424_v50 = vadd.f32 %v1308_v19, %v938_v17  ;;  %v1312_v33 = vpop.f32.mrf.mxu0  ;;  %v940_v38 = vadd.f32 %v939_v60, %v2720_v56 }
 0x152   : > { %v1499_v51 = vmul.f32 %v2735_v37, %v1423_v26  ;;  %v941_v28 = vpop.f32.mrf.mxu1  ;;  %v1637_v43 = vmax.f32 %v1573_v48, 0.0 }
 0x153   : > { %1879 = vst [vmem:[%s2759_s19 + $0x60] sm:$0xff] %v2250_v4  ;;  %v1638_v57 = vmax.f32 %v1574_v18, 0.0  ;;  %v1500_v35 = vmul.f32 %v2740_v29, %v1424_v50  ;;  %v942_v53 = vadd.f32 %v941_v28, %v2724_v45  ;;  %v1316_v20 = vpop.f32.mrf.mxu0  ;;  %v1425_v12 = vadd.f32 %v1310_v10, %v940_v38 }
 0x154   : > { %v1575_v40 = vadd.f32 %v2737_v31, %v1499_v51  ;;  %v945_v62 = vpop.f32.mrf.mxu1 }
 0x155   : > { %v2251_v27 = vpack.c.bf16 %v1638_v57, %v1637_v43  ;;  %v1576_v30 = vadd.f32 %v2743_v21, %v1500_v35  ;;  %v1426_v52 = vadd.f32 %v1312_v33, %v942_v53  ;;  %v946_v56 = vadd.f32 %v945_v62, %v2602_v59  ;;  %v1318_v49 = vpop.f32.mrf.mxu0 }
 0x156   : > { %v1639_v23 = vmax.f32 %v1575_v40, 0.0  ;;  %v1501_v42 = vmul.f32 %v2735_v37, %v1425_v12  ;;  %v947_v22 = vpop.f32.mrf.mxu1 }
 0x157   : > { %1880 = vst [vmem:[%s2759_s19 + $0x68] sm:$0xff] %v2251_v27  ;;  %v1640_v6 = vmax.f32 %v1576_v30, 0.0  ;;  %v1502_v45 = vmul.f32 %v2740_v29, %v1426_v52  ;;  %v1427_v32 = vadd.f32 %v1316_v20, %v946_v56  ;;  %v948_v0 = vadd.f32 %v947_v22, %v2606_v61  ;;  %v1320_v54 = vpop.f32.mrf.mxu0 }
 0x158   : > { %v1577_v44 = vadd.f32 %v2737_v31, %v1501_v42  ;;  %v949_v25 = vpop.f32.mrf.mxu1 }
 0x159   : > { %v2252_v14 = vpack.c.bf16 %v1640_v6, %v1639_v23  ;;  %v1578_v59 = vadd.f32 %v2743_v21, %v1502_v45  ;;  %v1503_v58 = vmul.f32 %v2735_v37, %v1427_v32  ;;  %v1428_v39 = vadd.f32 %v1318_v49, %v948_v0  ;;  %v1322_v34 = vpop.f32.mrf.mxu0 }
 0x15a   : > { %v1641_v24 = vmax.f32 %v1577_v44, 0.0  ;;  %v950_v46 = vadd.f32 %v949_v25, %v2610_v63  ;;  %v951_v8 = vpop.f32.mrf.mxu1 }
 0x15b   : > { %1881 = vst [vmem:[%s2759_s19 + $0x70] sm:$0xff] %v2252_v14  ;;  %v1642_v2 = vmax.f32 %v1578_v59, 0.0  ;;  %v1579_v61 = vadd.f32 %v2737_v31, %v1503_v58  ;;  %v1504_v19 = vmul.f32 %v2740_v29, %v1428_v39  ;;  %v952_v16 = vadd.f32 %v951_v8, %v2614_v1  ;;  %v1326_v41 = vpop.f32.mrf.mxu0 }
 0x15c   : > { %v1429_v47 = vadd.f32 %v1320_v54, %v950_v46  ;;  %v955_v36 = vpop.f32.mrf.mxu1 }
 0x15d   : > { %v2253_v48 = vpack.c.bf16 %v1642_v2, %v1641_v24  ;;  %v1580_v55 = vadd.f32 %v2743_v21, %v1504_v19  ;;  %v1430_v17 = vadd.f32 %v1322_v34, %v952_v16  ;;  %v1328_v10 = vpop.f32.mrf.mxu0  ;;  %v956_v26 = vadd.f32 %v955_v36, %v2618_v3 }
 0x15e   : > { %v1505_v63 = vmul.f32 %v2735_v37, %v1429_v47  ;;  %v957_v60 = vpop.f32.mrf.mxu1  ;;  %v1643_v4 = vmax.f32 %v1579_v61, 0.0 }
 0x15f   : > { %1882 = vst [vmem:[%s2759_s19 + $0x78] sm:$0xff] %v2253_v48  ;;  %v1644_v18 = vmax.f32 %v1580_v55, 0.0  ;;  %v1506_v50 = vmul.f32 %v2740_v29, %v1430_v17  ;;  %v958_v1 = vadd.f32 %v957_v60, %v2622_v5  ;;  %v1330_v33 = vpop.f32.mrf.mxu0  ;;  %v1431_v38 = vadd.f32 %v1326_v41, %v956_v26  ;;  %v3008_v26 = vld [vmem:[#allocation3_spill] sm:$0xff] }
 0x160   : > { %v1581_v51 = vadd.f32 %v2737_v31, %v1505_v63  ;;  %v959_v28 = vpop.f32.mrf.mxu1 }
 0x161   : > { %v2254_v43 = vpack.c.bf16 %v1644_v18, %v1643_v4  ;;  %v1582_v57 = vadd.f32 %v2743_v21, %v1506_v50  ;;  %v1432_v35 = vadd.f32 %v1328_v10, %v958_v1  ;;  %v960_v3 = vadd.f32 %v959_v28, %v2626_v7  ;;  %v1332_v53 = vpop.f32.mrf.mxu0 }
 0x162   : > { %v1645_v20 = vmax.f32 %v1581_v51, 0.0  ;;  %v1507_v40 = vmul.f32 %v2735_v37, %v1431_v38  ;;  %v961_v12 = vpop.f32.mrf.mxu1  ;;  %v3009_v38 = vld [vmem:[#allocation4_spill] sm:$0xff] }
 0x163   : > { %1883 = vst [vmem:[%s2759_s19 + $0x80] sm:$0xff] %v2254_v43  ;;  %v1646_v62 = vmax.f32 %v1582_v57, 0.0  ;;  %v1508_v5 = vmul.f32 %v2740_v29, %v1432_v35  ;;  %v1433_v27 = vadd.f32 %v1330_v33, %v960_v3  ;;  %v962_v30 = vadd.f32 %v961_v12, %v2630_v9  ;;  %v1336_v52 = vpop.f32.mrf.mxu0 }
 0x164   : > { %v1583_v56 = vadd.f32 %v2737_v31, %v1507_v40  ;;  %v965_v49 = vpop.f32.mrf.mxu1 }
 0x165   : > { %v2255_v23 = vpack.c.bf16 %v1646_v62, %v1645_v20  ;;  %v1584_v7 = vadd.f32 %v2743_v21, %v1508_v5  ;;  %v1509_v42 = vmul.f32 %v2735_v37, %v1433_v27  ;;  %v1434_v22 = vadd.f32 %v1332_v53, %v962_v30  ;;  %v1338_v6 = vpop.f32.mrf.mxu0  ;;  %v3010_v5 = vld [vmem:[#allocation5_spill] sm:$0xff] }
 0x166   : > { %v1647_v45 = vmax.f32 %v1583_v56, 0.0  ;;  %v966_v32 = vadd.f32 %v965_v49, %v2634_v11  ;;  %v967_v0 = vpop.f32.mrf.mxu1 }
 0x167   : > { %1884 = vst [vmem:[%s2759_s19 + $0x88] sm:$0xff] %v2255_v23  ;;  %v1648_v54 = vmax.f32 %v1584_v7, 0.0  ;;  %v1585_v9 = vadd.f32 %v2737_v31, %v1509_v42  ;;  %v1510_v44 = vmul.f32 %v2740_v29, %v1434_v22  ;;  %v968_v25 = vadd.f32 %v967_v0, %v2638_v13  ;;  %v1340_v14 = vpop.f32.mrf.mxu0  ;;  %v3007_v13 = vld [vmem:[#allocation2_spill] sm:$0xff] }
 0x168   : > { %v1435_v59 = vadd.f32 %v1336_v52, %v966_v32  ;;  %v969_v58 = vpop.f32.mrf.mxu1  ;;  %v3011_v23 = vld [vmem:[#allocation6_spill] sm:$0xff] }
 0x169   : > { %v2256_v39 = vpack.c.bf16 %v1648_v54, %v1647_v45  ;;  %v1586_v34 = vadd.f32 %v2743_v21, %v1510_v44  ;;  %v1436_v24 = vadd.f32 %v1338_v6, %v968_v25  ;;  %v1342_v46 = vpop.f32.mrf.mxu0  ;;  %v970_v8 = vadd.f32 %v969_v58, %v2642_v15  ;;  %v3012_v44 = vld [vmem:[#allocation7_spill] sm:$0xff] }
 0x16a   : > { %v1511_v11 = vmul.f32 %v2735_v37, %v1435_v59  ;;  %v971_v2 = vpop.f32.mrf.mxu1  ;;  %v1649_v61 = vmax.f32 %v1585_v9, 0.0 }
 0x16b   : > { %1885 = vst [vmem:[%s2759_s19 + $0x90] sm:$0xff] %v2256_v39  ;;  %v1650_v19 = vmax.f32 %v1586_v34, 0.0  ;;  %v1512_v16 = vmul.f32 %v2740_v29, %v1436_v24  ;;  %v972_v41 = vadd.f32 %v971_v2, %v3007_v13  ;;  %v1346_v47 = vpop.f32.mrf.mxu0  ;;  %v1437_v48 = vadd.f32 %v1340_v14, %v970_v8  ;;  %v3013_v34 = vld [vmem:[#allocation8_spill] sm:$0xff]  ;;  %v3014_v13 = vld [vmem:[#allocation9_spill] sm:$0xff] }
 0x16c   : > { %v1587_v36 = vadd.f32 %v2737_v31, %v1511_v11  ;;  %v975_v55 = vpop.f32.mrf.mxu1 }
 0x16d   : > { %v2257_v17 = vpack.c.bf16 %v1650_v19, %v1649_v61  ;;  %v1588_v10 = vadd.f32 %v2743_v21, %v1512_v16  ;;  %v1438_v63 = vadd.f32 %v1342_v46, %v972_v41  ;;  %v976_v15 = vadd.f32 %v975_v55, %v3008_v26  ;;  %v1348_v60 = vpop.f32.mrf.mxu0  ;;  %v3015_v26 = vld [vmem:[#allocation10_spill] sm:$0xff] }
 0x16e   : > { %v1651_v4 = vmax.f32 %v1587_v36, 0.0  ;;  %v1513_v18 = vmul.f32 %v2735_v37, %v1437_v48  ;;  %v977_v50 = vpop.f32.mrf.mxu1 }
 0x16f   : > { %1886 = vst [vmem:[%s2759_s19 + $0x98] sm:$0xff] %v2257_v17  ;;  %v1652_v1 = vmax.f32 %v1588_v10, 0.0  ;;  %v1514_v33 = vmul.f32 %v2740_v29, %v1438_v63  ;;  %v1439_v51 = vadd.f32 %v1346_v47, %v976_v15  ;;  %v978_v28 = vadd.f32 %v977_v50, %v3009_v38  ;;  %v1350_v43 = vpop.f32.mrf.mxu0 }
 0x170   : > { %v1589_v57 = vadd.f32 %v2737_v31, %v1513_v18  ;;  %v979_v35 = vpop.f32.mrf.mxu1 }
 0x171   : > { %v2258_v3 = vpack.c.bf16 %v1652_v1, %v1651_v4  ;;  %v1590_v53 = vadd.f32 %v2743_v21, %v1514_v33  ;;  %v1515_v20 = vmul.f32 %v2735_v37, %v1439_v51  ;;  %v1440_v40 = vadd.f32 %v1348_v60, %v978_v28  ;;  %v1352_v12 = vpop.f32.mrf.mxu0 }
 0x172   : > { %v1653_v62 = vmax.f32 %v1589_v57, 0.0  ;;  %v980_v27 = vadd.f32 %v979_v35, %v3010_v5  ;;  %v981_v30 = vpop.f32.mrf.mxu1 }
 0x173   : > { %1887 = vst [vmem:[%s2759_s19 + $0xa0] sm:$0xff] %v2258_v3  ;;  %v1654_v52 = vmax.f32 %v1590_v53, 0.0  ;;  %v1591_v56 = vadd.f32 %v2737_v31, %v1515_v20  ;;  %v1516_v49 = vmul.f32 %v2740_v29, %v1440_v40  ;;  %v982_v7 = vadd.f32 %v981_v30, %v3011_v23  ;;  %v1356_v42 = vpop.f32.mrf.mxu0  ;;  %v3017_v40 = vld [vmem:[#allocation12_spill] sm:$0xff] }
 0x174   : > { %v1441_v22 = vadd.f32 %v1350_v43, %v980_v27  ;;  %v985_v6 = vpop.f32.mrf.mxu1  ;;  %v3016_v43 = vld [vmem:[#allocation11_spill] sm:$0xff] }
 0x175   : > { %v2259_v45 = vpack.c.bf16 %v1654_v52, %v1653_v62  ;;  %v1592_v32 = vadd.f32 %v2743_v21, %v1516_v49  ;;  %v1442_v0 = vadd.f32 %v1352_v12, %v982_v7  ;;  %v1358_v54 = vpop.f32.mrf.mxu0  ;;  %v986_v25 = vadd.f32 %v985_v6, %v3012_v44  ;;  %v3018_v7 = vld [vmem:[#allocation13_spill] sm:$0xff] }
 0x176   : > { %v1517_v9 = vmul.f32 %v2735_v37, %v1441_v22  ;;  %v987_v14 = vpop.f32.mrf.mxu1  ;;  %v1655_v59 = vmax.f32 %v1591_v56, 0.0 }
 0x177   : > { %1888 = vst [vmem:[%s2759_s19 + $0xa8] sm:$0xff] %v2259_v45  ;;  %v1656_v58 = vmax.f32 %v1592_v32, 0.0  ;;  %v1518_v39 = vmul.f32 %v2740_v29, %v1442_v0  ;;  %v988_v24 = vadd.f32 %v987_v14, %v3013_v34  ;;  %v1360_v46 = vpop.f32.mrf.mxu0  ;;  %v1443_v8 = vadd.f32 %v1356_v42, %v986_v25  ;;  %v3019_v0 = vld [vmem:[#allocation14_spill] sm:$0xff]  ;;  %v3020_v34 = vld [vmem:[#allocation15_spill] sm:$0xff] }
 0x178   : > { %v1593_v11 = vadd.f32 %v2737_v31, %v1517_v9  ;;  %v989_v2 = vpop.f32.mrf.mxu1 }
 0x179   : > { %v2260_v61 = vpack.c.bf16 %v1656_v58, %v1655_v59  ;;  %v1594_v19 = vadd.f32 %v2743_v21, %v1518_v39  ;;  %v1444_v16 = vadd.f32 %v1358_v54, %v988_v24  ;;  %v990_v41 = vadd.f32 %v989_v2, %v3014_v13  ;;  %v1362_v47 = vpop.f32.mrf.mxu0  ;;  %v3021_v13 = vld [vmem:[#allocation16_spill] sm:$0xff] }
 0x17a   : > { %v1657_v36 = vmax.f32 %v1593_v11, 0.0  ;;  %v1519_v48 = vmul.f32 %v2735_v37, %v1443_v8  ;;  %v991_v55 = vpop.f32.mrf.mxu1 }
 0x17b   : > { %1889 = vst [vmem:[%s2759_s19 + $0xb0] sm:$0xff] %v2260_v61  ;;  %v1658_v17 = vmax.f32 %v1594_v19, 0.0  ;;  %v1520_v10 = vmul.f32 %v2740_v29, %v1444_v16  ;;  %v1445_v63 = vadd.f32 %v1360_v46, %v990_v41  ;;  %v992_v15 = vadd.f32 %v991_v55, %v3015_v26  ;;  %v1366_v60 = vpop.f32.mrf.mxu0 }
 0x17c   : > { %v1595_v4 = vadd.f32 %v2737_v31, %v1519_v48  ;;  %v995_v18 = vpop.f32.mrf.mxu1 }
 0x17d   : > { %v2261_v50 = vpack.c.bf16 %v1658_v17, %v1657_v36  ;;  %v1596_v1 = vadd.f32 %v2743_v21, %v1520_v10  ;;  %v1521_v33 = vmul.f32 %v2735_v37, %v1445_v63  ;;  %v1446_v51 = vadd.f32 %v1362_v47, %v992_v15  ;;  %v1368_v38 = vpop.f32.mrf.mxu0 }
 0x17e   : > { %v1659_v28 = vmax.f32 %v1595_v4, 0.0  ;;  %v996_v57 = vadd.f32 %v995_v18, %v3016_v43  ;;  %v997_v35 = vpop.f32.mrf.mxu1 }
 0x17f   : > { %1890 = vst [vmem:[%s2759_s19 + $0xb8] sm:$0xff] %v2261_v50  ;;  %v1660_v3 = vmax.f32 %v1596_v1, 0.0  ;;  %v1597_v53 = vadd.f32 %v2737_v31, %v1521_v33  ;;  %v1522_v20 = vmul.f32 %v2740_v29, %v1446_v51  ;;  %v998_v12 = vadd.f32 %v997_v35, %v3017_v40  ;;  %v1370_v62 = vpop.f32.mrf.mxu0  ;;  %v3023_v51 = vld [vmem:[#allocation18_spill] sm:$0xff] }
 0x180   : > { %v1447_v5 = vadd.f32 %v1366_v60, %v996_v57  ;;  %v999_v27 = vpop.f32.mrf.mxu1  ;;  %v3022_v60 = vld [vmem:[#allocation17_spill] sm:$0xff] }
 0x181   : > { %v2262_v30 = vpack.c.bf16 %v1660_v3, %v1659_v28  ;;  %v1598_v52 = vadd.f32 %v2743_v21, %v1522_v20  ;;  %v1448_v56 = vadd.f32 %v1368_v38, %v998_v12  ;;  %v1372_v49 = vpop.f32.mrf.mxu0  ;;  %v1000_v42 = vadd.f32 %v999_v27, %v3018_v7  ;;  %v3024_v12 = vld [vmem:[#allocation19_spill] sm:$0xff] }
 0x182   : > { %v1523_v23 = vmul.f32 %v2735_v37, %v1447_v5  ;;  %v1001_v22 = vpop.f32.mrf.mxu1  ;;  %v1661_v6 = vmax.f32 %v1597_v53, 0.0 }
 0x183   : > { %1891 = vst [vmem:[%s2759_s19 + $0xc0] sm:$0xff] %v2262_v30  ;;  %v1662_v45 = vmax.f32 %v1598_v52, 0.0  ;;  %v1524_v32 = vmul.f32 %v2740_v29, %v1448_v56  ;;  %v1002_v54 = vadd.f32 %v1001_v22, %v3019_v0  ;;  %v1376_v9 = vpop.f32.mrf.mxu0  ;;  %v1449_v25 = vadd.f32 %v1370_v62, %v1000_v42  ;;  %v3025_v56 = vld [vmem:[#allocation20_spill] sm:$0xff]  ;;  %v3026_v0 = vld [vmem:[#allocation21_spill] sm:$0xff] }
 0x184   : > { %v1599_v44 = vadd.f32 %v2737_v31, %v1523_v23  ;;  %v1005_v14 = vpop.f32.mrf.mxu1 }
 0x185   : > { %v2263_v59 = vpack.c.bf16 %v1662_v45, %v1661_v6  ;;  %v1600_v58 = vadd.f32 %v2743_v21, %v1524_v32  ;;  %v1450_v39 = vadd.f32 %v1372_v49, %v1002_v54  ;;  %v1006_v24 = vadd.f32 %v1005_v14, %v3020_v34  ;;  %v1378_v46 = vpop.f32.mrf.mxu0 }
 0x186   : > { %v1663_v11 = vmax.f32 %v1599_v44, 0.0  ;;  %v1525_v8 = vmul.f32 %v2735_v37, %v1449_v25  ;;  %v1007_v2 = vpop.f32.mrf.mxu1 }
 0x187   : > { %1892 = vst [vmem:[%s2759_s19 + $0xc8] sm:$0xff] %v2263_v59  ;;  %v1664_v61 = vmax.f32 %v1600_v58, 0.0  ;;  %v1526_v19 = vmul.f32 %v2740_v29, %v1450_v39  ;;  %v1451_v16 = vadd.f32 %v1376_v9, %v1006_v24  ;;  %v1008_v41 = vadd.f32 %v1007_v2, %v3021_v13  ;;  %v1380_v47 = vpop.f32.mrf.mxu0  ;;  %v3027_v39 = vld [vmem:[#allocation22_spill] sm:$0xff] }
 0x188   : > { %v1601_v36 = vadd.f32 %v2737_v31, %v1525_v8  ;;  %v1009_v48 = vpop.f32.mrf.mxu1 }
 0x189   : > { %v2264_v55 = vpack.c.bf16 %v1664_v61, %v1663_v11  ;;  %v1602_v17 = vadd.f32 %v2743_v21, %v1526_v19  ;;  %v1527_v10 = vmul.f32 %v2735_v37, %v1451_v16  ;;  %v1452_v63 = vadd.f32 %v1378_v46, %v1008_v41  ;;  %v1382_v26 = vpop.f32.mrf.mxu0 }
 0x18a   : > { %v1665_v15 = vmax.f32 %v1601_v36, 0.0  ;;  %v1010_v4 = vadd.f32 %v1009_v48, %v3022_v60  ;;  %v1011_v18 = vpop.f32.mrf.mxu1 }
 0x18b   : > { %1893 = vst [vmem:[%s2759_s19 + $0xd0] sm:$0xff] %v2264_v55  ;;  %v1666_v50 = vmax.f32 %v1602_v17, 0.0  ;;  %v1603_v1 = vadd.f32 %v2737_v31, %v1527_v10  ;;  %v1528_v33 = vmul.f32 %v2740_v29, %v1452_v63  ;;  %v1012_v38 = vadd.f32 %v1011_v18, %v3023_v51  ;;  %v1386_v28 = vpop.f32.mrf.mxu0 }
 0x18c   : > { %v1453_v43 = vadd.f32 %v1380_v47, %v1010_v4  ;;  %v1015_v57 = vpop.f32.mrf.mxu1 }
 0x18d   : > { %v2265_v35 = vpack.c.bf16 %v1666_v50, %v1665_v15  ;;  %v1604_v3 = vadd.f32 %v2743_v21, %v1528_v33  ;;  %v1454_v53 = vadd.f32 %v1382_v26, %v1012_v38  ;;  %v1388_v20 = vpop.f32.mrf.mxu0  ;;  %v1016_v62 = vadd.f32 %v1015_v57, %v3024_v12 }
 0x18e   : > { %v1529_v40 = vmul.f32 %v2735_v37, %v1453_v43  ;;  %v1017_v5 = vpop.f32.mrf.mxu1  ;;  %v1667_v27 = vmax.f32 %v1603_v1, 0.0 }
 0x18f   : > { %1894 = vst [vmem:[%s2759_s19 + $0xd8] sm:$0xff] %v2265_v35  ;;  %v1668_v30 = vmax.f32 %v1604_v3, 0.0  ;;  %v1530_v52 = vmul.f32 %v2740_v29, %v1454_v53  ;;  %v1018_v49 = vadd.f32 %v1017_v5, %v3025_v56  ;;  %v1455_v7 = vadd.f32 %v1386_v28, %v1016_v62  ;;  %v1390_v22 = vpop.f32.mrf.mxu0 }
 0x190   : > { %v1605_v23 = vadd.f32 %v2737_v31, %v1529_v40  ;;  %v1019_v42 = vpop.f32.mrf.mxu1 }
 0x191   : > { %v2266_v6 = vpack.c.bf16 %v1668_v30, %v1667_v27  ;;  %v1606_v45 = vadd.f32 %v2743_v21, %v1530_v52  ;;  %v1456_v32 = vadd.f32 %v1388_v20, %v1018_v49  ;;  %v1020_v54 = vadd.f32 %v1019_v42, %v3026_v0  ;;  %v1392_v46 = vpop.f32.mrf.mxu0 }
 0x192   : > { %v1669_v9 = vmax.f32 %v1605_v23, 0.0  ;;  %v1531_v44 = vmul.f32 %v2735_v37, %v1455_v7  ;;  %v1021_v25 = vpop.f32.mrf.mxu1 }
 0x193   : > { %1895 = vst [vmem:[%s2759_s19 + $0xe0] sm:$0xff] %v2266_v6  ;;  %v1670_v14 = vmax.f32 %v1606_v45, 0.0  ;;  %v1532_v59 = vmul.f32 %v2740_v29, %v1456_v32  ;;  %v1457_v58 = vadd.f32 %v1390_v22, %v1020_v54  ;;  %v1022_v34 = vadd.f32 %v1021_v25, %v3027_v39 }
 0x194   : > { %v1607_v24 = vadd.f32 %v2737_v31, %v1531_v44 }
 0x195   : > { %v2267_v11 = vpack.c.bf16 %v1670_v14, %v1669_v9  ;;  %v1608_v8 = vadd.f32 %v2743_v21, %v1532_v59  ;;  %v1533_v2 = vmul.f32 %v2735_v37, %v1457_v58  ;;  %v1458_v61 = vadd.f32 %v1392_v46, %v1022_v34 }
 0x196   : > { %v1671_v19 = vmax.f32 %v1607_v24, 0.0 }
 0x197   : > { %1896 = vst [vmem:[%s2759_s19 + $0xe8] sm:$0xff] %v2267_v11  ;;  %v1672_v16 = vmax.f32 %v1608_v8, 0.0  ;;  %v1609_v13 = vadd.f32 %v2737_v31, %v1533_v2  ;;  %v1534_v41 = vmul.f32 %v2740_v29, %v1458_v61 }
 0x199   : > { %v2268_v47 = vpack.c.bf16 %v1672_v16, %v1671_v19  ;;  %v1610_v36 = vadd.f32 %v2743_v21, %v1534_v41  ;;  %v1673_v48 = vmax.f32 %v1609_v13, 0.0 }
 0x19b   : > { %1897 = vst [vmem:[%s2759_s19 + $0xf0] sm:$0xff] %v2268_v47  ;;  %v1674_v55 = vmax.f32 %v1610_v36, 0.0 }
 0x19d   : > { %v2269_v17 = vpack.c.bf16 %v1674_v55, %v1673_v48 }
 0x19f   : > { %1898 = vst [vmem:[%s2759_s19 + $0xf8] sm:$0xff] %v2269_v17 }
 0x1a0 PF: > { %s14_s17 = sadd.s32 1, %s2377_s17   ;;  %s3028_s15 = smov %s2373_s16 }
 0x1a1   : > { %p11_p5 = scmp.ge.s32.totalorder %s14_s17, 4   ;;  %s3029_s16 = smov %s3031_s18 }
 0x1a3   :  { %13 = sbr.rel (!%p11_p5) target bundleno = 2 (0x2), region = 79 }

// kernel: double_conv.3
= control target key start
LH: loop header
LB: loop body
LE: loop exit
PB: predicated region body
PF: predicated region fallthrough
CT: control target
= control target key end

     0   :  { %9 = vsyncpa [#allocation3], 0  ;;  %s10434_s0 = inlined_call_operand.vmem [shape: bf16[2,18,16,768], index: 0, kind: input, shape index: {}]   ;;  %s10435_s1 = inlined_call_operand.vmem [shape: bf16[3,768,256], index: 1, kind: input, shape index: {}]   ;;  %s10436_s2 = inlined_call_operand.vmem [shape: f32[1,256], index: 2, kind: input, shape index: {}]   ;;  %s10437_s3 = inlined_call_operand.vmem [shape: f32[1,256], index: 3, kind: input, shape index: {}]   ;;  %s10438_s4 = inlined_call_operand.hbm [shape: f32[2,16,16,256], index: 4, kind: output, shape index: {}]  }
   0x1   :  { %11 = vsyncpa [#allocation3 + $0x1], 0  ;;  %s7939_s15 = smov 0   ;;  %s7941_s16 = smov 0  }
   0x2   :  { %s7943_s17 = smov 0   ;;  %s7945_s18 = smov 0  }
   0x3   :  { %s7947_s19 = smov 0   ;;  %s7949_s20 = smov 0  }
   0x4 LB: > { %s5940_s21 = sadd.s32 4294967295, %s7909_s20   ;;  %s5941_s22 = sadd.s32 4294967294, %s7909_s20   ;;  %s7909_s20 = sphi %s7949_s20, %s17_s20   ;;  %s7905_s19 = sphi %s7947_s19, %s10748_s19   ;;  %s7901_s18 = sphi %s7945_s18, %s10747_s18   ;;  %s7897_s17 = sphi %s7943_s17, %s10746_s17   ;;  %s7893_s16 = sphi %s7941_s16, %s10745_s16   ;;  %s7889_s15 = sphi %s7939_s15, %s10744_s15  }
   0x5   : > { %s29_s23 = sadd.s32 1, %s7905_s19  ;;  %s142_s24 = sadd.s32 1, %s7897_s17 }
   0x6   : > { %p31_p0 = scmp.ge.s32.totalorder %s29_s23, 2  ;;  %p152_p1 = scmp.ne.s32.totalorder %s7897_s17, %s7893_s16 }
   0x7   : > { %p153_p2 = scmp.eq.s32.totalorder %s5940_s21, 1  ;;  %p158_p3 = scmp.ne.s32.totalorder %s7893_s16, %s7889_s15 }
   0x8   : > { %s10750_s23 = smov (%p31_p0, %s29_s23), 0  ;;  %p159_p5 = scmp.eq.s32.totalorder %s5941_s22, 1 }
   0x9   : > { %p7979_p4 = por %p153_p2, %p152_p1  ;;  %s137_s26 = ssub.s32 %s7905_s19, %s10750_s23 }
   0xa   : > { %p5947_p6 = scmp.ge.s32.totalorder %s7909_s20, 1  ;;  %p140_p7 = scmp.eq.s32.totalorder %s137_s26, 0 }
   0xb   : > { %p7986_p8 = por %p159_p5, %p158_p3  ;;  %p210_p9 = scmp.lt.s32.totalorder %s7909_s20, 3 }
   0xc   : > { %s7992_s28 = scalar_select %p140_p7, %s7897_s17, %s142_s24  }
   0xd   : > { %p211_p10 = pnand %p5947_p6, %p210_p9 }
   0xf   : > { %214 = sbr.rel (%p211_p10) target bundleno = 878 (0x36e), region = 36 }
  0x14   : > { %v7006_v0 = vld [vmem:[%s10435_s1 + $0x374] ss:$8 sps:$4 sm:$0xff]   ;;  %v7008_v1 = vld [vmem:[%s10435_s1 + $0x370] ss:$8 sps:$4 sm:$0xff]   ;;  %v7009_v2 = vld [vmem:[%s10435_s1 + $0x364] ss:$8 sps:$4 sm:$0xff]  }
  0x15   : > { %1617 = vmatprep.subr.bf16.mxu0 %v7006_v0  ;;  %6916 = vmatprep.subr.bf16.mxu1 %v7006_v0  ;;  %v7011_v3 = vld [vmem:[%s10435_s1 + $0x360] ss:$8 sps:$4 sm:$0xff]   ;;  %v7012_v4 = vld [vmem:[%s10435_s1 + $0x354] ss:$8 sps:$4 sm:$0xff]   ;;  %v7014_v5 = vld [vmem:[%s10435_s1 + $0x350] ss:$8 sps:$4 sm:$0xff]  }
  0x16   : > { %1618 = vmatpush1.bf16.msra.mxu0 %v7008_v1  ;;  %6932 = vmatpush1.bf16.msra.mxu1 %v7008_v1  ;;  %p249_p11 = scmp.lt.s32.totalorder %s7901_s18, 1  ;;  %v7015_v6 = vld [vmem:[%s10435_s1 + $0x344] ss:$8 sps:$4 sm:$0xff]   ;;  %v7017_v7 = vld [vmem:[%s10435_s1 + $0x340] ss:$8 sps:$4 sm:$0xff]   ;;  %s246_s22 = sand.u32 1, %s7893_s16  }
  0x17   : > { %1619 = vmatprep.subr.bf16.mxu0 %v7009_v2  ;;  %6917 = vmatprep.subr.bf16.mxu1 %v7009_v2  ;;  %v7018_v8 = vld [vmem:[%s10435_s1 + $0x334] ss:$8 sps:$4 sm:$0xff]   ;;  %v7020_v9 = vld [vmem:[%s10435_s1 + $0x330] ss:$8 sps:$4 sm:$0xff]   ;;  %v7021_v10 = vld [vmem:[%s10435_s1 + $0x324] ss:$8 sps:$4 sm:$0xff]  }
  0x18   : > { %s250_s29 = scalar_select %p249_p11, %s7901_s18, 1  ;;  %v7023_v11 = vld [vmem:[%s10435_s1 + $0x320] ss:$8 sps:$4 sm:$0xff]   ;;  %v7024_v12 = vld [vmem:[%s10435_s1 + $0x314] ss:$8 sps:$4 sm:$0xff]  }
  0x19   : > { %v7026_v14 = vld [vmem:[%s10435_s1 + $0x310] ss:$8 sps:$4 sm:$0xff]   ;;  %v7027_v16 = vld [vmem:[%s10435_s1 + $0x304] ss:$8 sps:$4 sm:$0xff]   ;;  %v7029_v17 = vld [vmem:[%s10435_s1 + $0x300] ss:$8 sps:$4 sm:$0xff]  }
  0x1a   : > { %1620 = vmatpush1.bf16.msra.mxu0 %v7011_v3  ;;  %6933 = vmatpush1.bf16.msra.mxu1 %v7011_v3  ;;  %s6948_s8 = smul.u32 864, %s250_s29  ;;  %v7030_v18 = vld [vmem:[%s10435_s1 + $0x3f4] ss:$8 sps:$4 sm:$0xff]   ;;  %v7032_v19 = vld [vmem:[%s10435_s1 + $0x3f0] ss:$8 sps:$4 sm:$0xff]   ;;  %s5948_s24 = sshll.u32 %s246_s22, 9 }
  0x1b   : > { %1621 = vmatprep.subr.bf16.mxu0 %v7012_v4  ;;  %6918 = vmatprep.subr.bf16.mxu1 %v7012_v4  ;;  %v7033_v20 = vld [vmem:[%s10435_s1 + $0x3e4] ss:$8 sps:$4 sm:$0xff]   ;;  %v7035_v21 = vld [vmem:[%s10435_s1 + $0x3e0] ss:$8 sps:$4 sm:$0xff]   ;;  %v7036_v22 = vld [vmem:[%s10435_s1 + $0x3d4] ss:$8 sps:$4 sm:$0xff]  }
  0x1c   : > { %s8035_s21 = scalar_lea.vmem %s10434_s0, %s6948_s8  ;;  %v7038_v23 = vld [vmem:[%s10435_s1 + $0x3d0] ss:$8 sps:$4 sm:$0xff]   ;;  %v7039_v24 = vld [vmem:[%s10435_s1 + $0x3c4] ss:$8 sps:$4 sm:$0xff]   ;;  %v7041_v25 = vld [vmem:[%s10435_s1 + $0x3c0] ss:$8 sps:$4 sm:$0xff]  }
  0x1d   : > { %v7056_v13 = vld [vmem:[%s8035_s21 + $0x34] ss:$24 sps:$4 sm:$0xff]   ;;  %v7044_v27 = vld [vmem:[%s10435_s1 + $0x3b0] ss:$8 sps:$4 sm:$0xff]   ;;  %v7047_v29 = vld [vmem:[%s10435_s1 + $0x3a0] ss:$8 sps:$4 sm:$0xff]  }
  0x1e   : > { %1622 = vmatpush1.bf16.msra.mxu0 %v7014_v5  ;;  %6934 = vmatpush1.bf16.msra.mxu1 %v7014_v5  ;;  %v7059_v15 = vld [vmem:[%s8035_s21 + $0x1b4] ss:$24 sps:$4 sm:$0xff]   ;;  %v7050_v31 = vld [vmem:[%s10435_s1 + $0x390] ss:$8 sps:$4 sm:$0xff]   ;;  %v7053_v33 = vld [vmem:[%s10435_s1 + $0x380] ss:$8 sps:$4 sm:$0xff]  }
  0x1f   : > { %1623 = vmatprep.subr.bf16.mxu0 %v7015_v6  ;;  %6919 = vmatprep.subr.bf16.mxu1 %v7015_v6  ;;  %v7042_v26 = vld [vmem:[%s10435_s1 + $0x3b4] ss:$8 sps:$4 sm:$0xff]   ;;  %v7045_v28 = vld [vmem:[%s10435_s1 + $0x3a4] ss:$8 sps:$4 sm:$0xff]   ;;  %v7054_v35 = vld [vmem:[%s8035_s21 + $0x30] ss:$24 sps:$4 sm:$0xff]  }
  0x20   : > { %1649 = vmatprep.mubr.bf16.mxu0 %v7056_v13  ;;  %1729 = vmatprep.mubr.bf16.mxu1 %v7059_v15  ;;  %v7048_v30 = vld [vmem:[%s10435_s1 + $0x394] ss:$8 sps:$4 sm:$0xff]   ;;  %v7051_v32 = vld [vmem:[%s10435_s1 + $0x384] ss:$8 sps:$4 sm:$0xff]   ;;  %v7057_v37 = vld [vmem:[%s8035_s21 + $0x1b0] ss:$24 sps:$4 sm:$0xff]  }
  0x21   : > { %v7062_v34 = vld [vmem:[%s10435_s1 + $0x474] ss:$8 sps:$4 sm:$0xff]   ;;  %v7060_v38 = vld [vmem:[%s10435_s1 + $0x470] ss:$8 sps:$4 sm:$0xff]   ;;  %v7068_v40 = vld [vmem:[%s10435_s1 + $0x464] ss:$8 sps:$4 sm:$0xff]  }
  0x22   : > { %1624 = vmatpush1.bf16.msra.mxu0 %v7017_v7  ;;  %6935 = vmatpush1.bf16.msra.mxu1 %v7017_v7  ;;  %v7065_v36 = vld [vmem:[%s10435_s1 + $0x574] ss:$8 sps:$4 sm:$0xff]   ;;  %v7063_v39 = vld [vmem:[%s10435_s1 + $0x570] ss:$8 sps:$4 sm:$0xff]   ;;  %v7071_v41 = vld [vmem:[%s10435_s1 + $0x564] ss:$8 sps:$4 sm:$0xff]  }
  0x23   : > { %1625 = vmatprep.subr.bf16.mxu0 %v7018_v8  ;;  %6920 = vmatprep.subr.bf16.mxu1 %v7018_v8  ;;  %v7072_v42 = vld [vmem:[%s8035_s21 + $0x64] ss:$24 sps:$4 sm:$0xff]   ;;  %v7066_v44 = vld [vmem:[%s10435_s1 + $0x460] ss:$8 sps:$4 sm:$0xff]   ;;  %v7078_v50 = vld [vmem:[%s10435_s1 + $0x450] ss:$8 sps:$4 sm:$0xff]  }
  0x24   : > { %v7074_v43 = vld [vmem:[%s8035_s21 + $0x1e4] ss:$24 sps:$4 sm:$0xff]   ;;  %v7069_v45 = vld [vmem:[%s10435_s1 + $0x560] ss:$8 sps:$4 sm:$0xff]   ;;  %v7081_v51 = vld [vmem:[%s10435_s1 + $0x550] ss:$8 sps:$4 sm:$0xff]  }
  0x25   : > { %v7080_v46 = vld [vmem:[%s10435_s1 + $0x454] ss:$8 sps:$4 sm:$0xff]   ;;  %v7076_v47 = vld [vmem:[%s8035_s21 + $0x60] ss:$24 sps:$4 sm:$0xff]   ;;  %v7086_v52 = vld [vmem:[%s10435_s1 + $0x444] ss:$8 sps:$4 sm:$0xff]  }
  0x26   : > { %1626 = vmatpush1.bf16.msra.mxu0 %v7020_v9  ;;  %6936 = vmatpush1.bf16.msra.mxu1 %v7020_v9  ;;  %v7083_v48 = vld [vmem:[%s10435_s1 + $0x554] ss:$8 sps:$4 sm:$0xff]   ;;  %v7077_v49 = vld [vmem:[%s8035_s21 + $0x1e0] ss:$24 sps:$4 sm:$0xff]   ;;  %v7089_v53 = vld [vmem:[%s10435_s1 + $0x544] ss:$8 sps:$4 sm:$0xff]  }
  0x27   : > { %1627 = vmatprep.subr.bf16.mxu0 %v7021_v10  ;;  %6921 = vmatprep.subr.bf16.mxu1 %v7021_v10  ;;  %v7090_v54 = vld [vmem:[%s8035_s21 + $0x94] ss:$24 sps:$4 sm:$0xff]   ;;  %v7084_v56 = vld [vmem:[%s10435_s1 + $0x440] ss:$8 sps:$4 sm:$0xff]   ;;  %v7096_v62 = vld [vmem:[%s10435_s1 + $0x430] ss:$8 sps:$4 sm:$0xff]  }
  0x28   : > { %v7092_v55 = vld [vmem:[%s8035_s21 + $0x214] ss:$24 sps:$4 sm:$0xff]   ;;  %v7087_v57 = vld [vmem:[%s10435_s1 + $0x540] ss:$8 sps:$4 sm:$0xff]   ;;  %v7099_v63 = vld [vmem:[%s10435_s1 + $0x530] ss:$8 sps:$4 sm:$0xff]  }
  0x29   : > { %v7098_v58 = vld [vmem:[%s10435_s1 + $0x434] ss:$8 sps:$4 sm:$0xff]   ;;  %v7094_v59 = vld [vmem:[%s8035_s21 + $0x90] ss:$24 sps:$4 sm:$0xff]   ;;  %v7104_v0 = vld [vmem:[%s10435_s1 + $0x424] ss:$8 sps:$4 sm:$0xff]  }
  0x2a   : > { %1628 = vmatpush1.bf16.msra.mxu0 %v7023_v11  ;;  %6937 = vmatpush1.bf16.msra.mxu1 %v7023_v11  ;;  %v7101_v60 = vld [vmem:[%s10435_s1 + $0x534] ss:$8 sps:$4 sm:$0xff]   ;;  %v7095_v61 = vld [vmem:[%s8035_s21 + $0x210] ss:$24 sps:$4 sm:$0xff]   ;;  %v7107_v1 = vld [vmem:[%s10435_s1 + $0x524] ss:$8 sps:$4 sm:$0xff]  }
  0x2b   : > { %1629 = vmatprep.subr.bf16.mxu0 %v7024_v12  ;;  %6922 = vmatprep.subr.bf16.mxu1 %v7024_v12  ;;  %v7108_v2 = vld [vmem:[%s8035_s21 + $0xc4] ss:$24 sps:$4 sm:$0xff]   ;;  %v7102_v4 = vld [vmem:[%s10435_s1 + $0x420] ss:$8 sps:$4 sm:$0xff]   ;;  %v7114_v10 = vld [vmem:[%s10435_s1 + $0x410] ss:$8 sps:$4 sm:$0xff]  }
  0x2c   : > { %v7110_v3 = vld [vmem:[%s8035_s21 + $0x244] ss:$24 sps:$4 sm:$0xff]   ;;  %v7105_v5 = vld [vmem:[%s10435_s1 + $0x520] ss:$8 sps:$4 sm:$0xff]   ;;  %v7117_v11 = vld [vmem:[%s10435_s1 + $0x510] ss:$8 sps:$4 sm:$0xff]  }
  0x2d   : > { %v7116_v6 = vld [vmem:[%s10435_s1 + $0x414] ss:$8 sps:$4 sm:$0xff]   ;;  %v7112_v7 = vld [vmem:[%s8035_s21 + $0xc0] ss:$24 sps:$4 sm:$0xff]   ;;  %v7122_v12 = vld [vmem:[%s10435_s1 + $0x404] ss:$8 sps:$4 sm:$0xff]  }
  0x2e   : > { %1630 = vmatpush1.bf16.msra.mxu0 %v7026_v14  ;;  %6938 = vmatpush1.bf16.msra.mxu1 %v7026_v14  ;;  %v7119_v8 = vld [vmem:[%s10435_s1 + $0x514] ss:$8 sps:$4 sm:$0xff]   ;;  %v7113_v9 = vld [vmem:[%s8035_s21 + $0x240] ss:$24 sps:$4 sm:$0xff]   ;;  %v7125_v13 = vld [vmem:[%s10435_s1 + $0x504] ss:$8 sps:$4 sm:$0xff]  }
  0x2f   : > { %1631 = vmatprep.subr.bf16.mxu0 %v7027_v16  ;;  %6923 = vmatprep.subr.bf16.mxu1 %v7027_v16  ;;  %v7126_v14 = vld [vmem:[%s8035_s21 + $0xf4] ss:$24 sps:$4 sm:$0xff]   ;;  %v7120_v16 = vld [vmem:[%s10435_s1 + $0x400] ss:$8 sps:$4 sm:$0xff]   ;;  %s10071_s26 = scalar_lea.vmem [#allocation2], %s5948_s24  ;;  %s6915_s29 = sshll.u32 %s7901_s18, 13 }
  0x30   : > { %v7128_v15 = vld [vmem:[%s8035_s21 + $0x274] ss:$24 sps:$4 sm:$0xff]   ;;  %s5828_s30 = sshll.u32 %s10071_s26, 4  ;;  %s10381_s7 = scalar_lea.hbm %s10438_s4, %s6915_s29  ;;  %s10383_s30 = int_to_ptr.vmem [resolvable:$true] %s5828_s30 }
  0x31   : > { %s10389_s18 = scalar_lea.sflag [#allocation3], %s246_s22  ;;  %s7833_s8 = scalar_lea.vmem %s10383_s30, 8192 }
  0x32   : > { %1632 = vmatpush1.bf16.msra.mxu0 %v7029_v17  ;;  %6939 = vmatpush1.bf16.msra.mxu1 %v7029_v17  ;;  %v7123_v17 = vld [vmem:[%s10435_s1 + $0x500] ss:$8 sps:$4 sm:$0xff]   ;;  %p7834_p12 = scmp.ne.s32.totalorder %s10383_s30, %s7833_s8  ;;  %s7911_s9 = smov [#allocation2]  }
  0x33   : > { %1633 = vmatprep.subr.bf16.mxu0 %v7030_v18  ;;  %6924 = vmatprep.subr.bf16.mxu1 %v7030_v18  ;;  %v7130_v18 = vld [vmem:[%s8035_s21 + $0xf0] ss:$24 sps:$4 sm:$0xff]   ;;  %s7837_s10 = sshll.u32 %s7911_s9, 4  ;;  %s7838_s10 = int_to_ptr.vmem [resolvable:$false] %s7837_s10 }
  0x34   : > { %p7835_p13 = pnand %p7834_p12, %p7979_p4  ;;  %s7839_s11 = scalar_lea.vmem %s7838_s10, 16384 }
  0x35   : > { %p7840_p1 = scmp.lt.s32.totalorder %s10383_s30, %s7838_s10  ;;  %p7841_p2 = scmp.lt.s32.totalorder %s7839_s11, %s7833_s8 }
  0x36   : > { %1634 = vmatpush2.bf16.msra.mxu0 %v7032_v19  ;;  %6940 = vmatpush2.bf16.msra.mxu1 %v7032_v19  ;;  %v7134_v19 = vld [vmem:[%s10435_s1 + $0x4f4] ss:$8 sps:$4 sm:$0xff]   ;;  %p7836_p0 = pneg %p7835_p13 }
  0x37   : > { %1635 = vmatprep.subr.bf16.mxu0 %v7033_v20  ;;  %6925 = vmatprep.subr.bf16.mxu1 %v7033_v20  ;;  %v7137_v20 = vld [vmem:[%s10435_s1 + $0x5f4] ss:$8 sps:$4 sm:$0xff]   ;;  %p7842_p3 = por %p7841_p2, %p7840_p1 }
  0x39   : > { %p7843_p5 = pnand %p7842_p3, %p7836_p0 }
  0x3a   : > { %1636 = vmatpush2.bf16.msra.mxu0 %v7035_v21  ;;  %6941 = vmatpush2.bf16.msra.mxu1 %v7035_v21  ;;  %v7131_v21 = vld [vmem:[%s8035_s21 + $0x270] ss:$24 sps:$4 sm:$0xff]  }
  0x3b   : > { %1637 = vmatprep.subr.bf16.mxu0 %v7036_v22  ;;  %6926 = vmatprep.subr.bf16.mxu1 %v7036_v22  ;;  %v7132_v22 = vld [vmem:[%s10435_s1 + $0x4f0] ss:$8 sps:$4 sm:$0xff]  }
  0x3e   : > { %1638 = vmatpush2.bf16.msra.mxu0 %v7038_v23  ;;  %6942 = vmatpush2.bf16.msra.mxu1 %v7038_v23  ;;  %v7135_v23 = vld [vmem:[%s10435_s1 + $0x5f0] ss:$8 sps:$4 sm:$0xff]  }
  0x3f   : > { %1639 = vmatprep.subr.bf16.mxu0 %v7039_v24  ;;  %6927 = vmatprep.subr.bf16.mxu1 %v7039_v24  ;;  %v7140_v24 = vld [vmem:[%s10435_s1 + $0x4e4] ss:$8 sps:$4 sm:$0xff]  }
  0x42   : > { %1640 = vmatpush2.bf16.msra.mxu0 %v7041_v25  ;;  %6943 = vmatpush2.bf16.msra.mxu1 %v7041_v25  ;;  %v7143_v25 = vld [vmem:[%s10435_s1 + $0x5e4] ss:$8 sps:$4 sm:$0xff]  }
  0x43   : > { %1641 = vmatprep.subr.bf16.mxu0 %v7042_v26  ;;  %6928 = vmatprep.subr.bf16.mxu1 %v7042_v26  ;;  %v7144_v26 = vld [vmem:[%s8035_s21 + $0x124] ss:$24 sps:$4 sm:$0xff]  }
  0x46   : > { %1642 = vmatpush2.bf16.msra.mxu0 %v7044_v27  ;;  %6944 = vmatpush2.bf16.msra.mxu1 %v7044_v27  ;;  %v7146_v27 = vld [vmem:[%s8035_s21 + $0x2a4] ss:$24 sps:$4 sm:$0xff]  }
  0x47   : > { %1643 = vmatprep.subr.bf16.mxu0 %v7045_v28  ;;  %6929 = vmatprep.subr.bf16.mxu1 %v7045_v28  ;;  %v7138_v28 = vld [vmem:[%s10435_s1 + $0x4e0] ss:$8 sps:$4 sm:$0xff]  }
  0x4a   : > { %1644 = vmatpush2.bf16.msra.mxu0 %v7047_v29  ;;  %6945 = vmatpush2.bf16.msra.mxu1 %v7047_v29  ;;  %v7141_v29 = vld [vmem:[%s10435_s1 + $0x5e0] ss:$8 sps:$4 sm:$0xff]  }
  0x4b   : > { %1645 = vmatprep.subr.bf16.mxu0 %v7048_v30  ;;  %6930 = vmatprep.subr.bf16.mxu1 %v7048_v30  ;;  %v7152_v30 = vld [vmem:[%s10435_s1 + $0x4d4] ss:$8 sps:$4 sm:$0xff]  }
  0x4e   : > { %1646 = vmatpush2.bf16.msra.mxu0 %v7050_v31  ;;  %6946 = vmatpush2.bf16.msra.mxu1 %v7050_v31  ;;  %v7148_v31 = vld [vmem:[%s8035_s21 + $0x120] ss:$24 sps:$4 sm:$0xff]  }
  0x4f   : > { %1647 = vmatprep.subr.bf16.mxu0 %v7051_v32  ;;  %6931 = vmatprep.subr.bf16.mxu1 %v7051_v32  ;;  %v7155_v32 = vld [vmem:[%s10435_s1 + $0x5d4] ss:$8 sps:$4 sm:$0xff]  }
  0x52   : > { %1648 = vmatpush2.bf16.msra.mxu0 %v7053_v33  ;;  %6947 = vmatpush2.bf16.msra.mxu1 %v7053_v33  ;;  %v7149_v33 = vld [vmem:[%s8035_s21 + $0x2a0] ss:$24 sps:$4 sm:$0xff]  }
  0x53   : > { %1810 = vmatprep.subr.bf16.mxu1 %v7062_v34  ;;  %2003 = vmatprep.subr.bf16.mxu0 %v7065_v36  ;;  %v7150_v34 = vld [vmem:[%s10435_s1 + $0x4d0] ss:$8 sps:$4 sm:$0xff]   ;;  %v7158_v36 = vld [vmem:[%s10435_s1 + $0x4c4] ss:$8 sps:$4 sm:$0xff]  }
  0x55   : > { %1650 = vmatmul.mubr.bf16.vlgmr.msra.gmra.mxu0 %v7054_v35  ;;  %1730 = vmatmul.mubr.bf16.vlgmr.msra.gmra.mxu1 %v7057_v37  ;;  %v7153_v35 = vld [vmem:[%s10435_s1 + $0x5d0] ss:$8 sps:$4 sm:$0xff]   ;;  %v7161_v37 = vld [vmem:[%s10435_s1 + $0x5c4] ss:$8 sps:$4 sm:$0xff]  }
  0x56   : > { %1811 = vmatpush1.bf16.msra.mxu1 %v7060_v38  ;;  %2004 = vmatpush1.bf16.msra.mxu0 %v7063_v39  ;;  %v7162_v38 = vld [vmem:[%s8035_s21 + $0x154] ss:$24 sps:$4 sm:$0xff]  }
  0x57   : > { %1812 = vmatprep.subr.bf16.mxu1 %v7068_v40  ;;  %2005 = vmatprep.subr.bf16.mxu0 %v7071_v41  ;;  %v7164_v39 = vld [vmem:[%s8035_s21 + $0x2d4] ss:$24 sps:$4 sm:$0xff]   ;;  %v7156_v40 = vld [vmem:[%s10435_s1 + $0x4c0] ss:$8 sps:$4 sm:$0xff]  }
  0x58   : > { %1659 = vmatprep.mubr.bf16.mxu0 %v7072_v42  ;;  %1739 = vmatprep.mubr.bf16.mxu1 %v7074_v43  ;;  %v7159_v41 = vld [vmem:[%s10435_s1 + $0x5c0] ss:$8 sps:$4 sm:$0xff]   ;;  %v7170_v43 = vld [vmem:[%s10435_s1 + $0x4b4] ss:$8 sps:$4 sm:$0xff]  }
  0x59   : > { %v7166_v42 = vld [vmem:[%s8035_s21 + $0x150] ss:$24 sps:$4 sm:$0xff]  }
  0x5a   : > { %1813 = vmatpush1.bf16.msra.mxu1 %v7066_v44  ;;  %2006 = vmatpush1.bf16.msra.mxu0 %v7069_v45  ;;  %v7173_v44 = vld [vmem:[%s10435_s1 + $0x5b4] ss:$8 sps:$4 sm:$0xff]   ;;  %v7167_v45 = vld [vmem:[%s8035_s21 + $0x2d0] ss:$24 sps:$4 sm:$0xff]  }
  0x5b   : > { %1814 = vmatprep.subr.bf16.mxu1 %v7080_v46  ;;  %2007 = vmatprep.subr.bf16.mxu0 %v7083_v48  ;;  %v7168_v46 = vld [vmem:[%s10435_s1 + $0x4b0] ss:$8 sps:$4 sm:$0xff]   ;;  %v7176_v48 = vld [vmem:[%s10435_s1 + $0x4a4] ss:$8 sps:$4 sm:$0xff]  }
  0x5d   : > { %1660 = vmatmul.mubr.bf16.gmra.mxu0 %v7076_v47  ;;  %1740 = vmatmul.mubr.bf16.gmra.mxu1 %v7077_v49  ;;  %v7171_v47 = vld [vmem:[%s10435_s1 + $0x5b0] ss:$8 sps:$4 sm:$0xff]   ;;  %v7179_v49 = vld [vmem:[%s10435_s1 + $0x5a4] ss:$8 sps:$4 sm:$0xff]  }
  0x5e   : > { %1815 = vmatpush1.bf16.msra.mxu1 %v7078_v50  ;;  %2008 = vmatpush1.bf16.msra.mxu0 %v7081_v51  ;;  %v7180_v50 = vld [vmem:[%s8035_s21 + $0x184] ss:$24 sps:$4 sm:$0xff]  }
  0x5f   : > { %1816 = vmatprep.subr.bf16.mxu1 %v7086_v52  ;;  %2009 = vmatprep.subr.bf16.mxu0 %v7089_v53  ;;  %v7182_v51 = vld [vmem:[%s8035_s21 + $0x304] ss:$24 sps:$4 sm:$0xff]   ;;  %v7174_v52 = vld [vmem:[%s10435_s1 + $0x4a0] ss:$8 sps:$4 sm:$0xff]  }
  0x60   : > { %1669 = vmatprep.mubr.bf16.mxu0 %v7090_v54  ;;  %1749 = vmatprep.mubr.bf16.mxu1 %v7092_v55  ;;  %v7177_v53 = vld [vmem:[%s10435_s1 + $0x5a0] ss:$8 sps:$4 sm:$0xff]   ;;  %v7188_v54 = vld [vmem:[%s10435_s1 + $0x494] ss:$8 sps:$4 sm:$0xff]  }
  0x61   : > { %v7184_v55 = vld [vmem:[%s8035_s21 + $0x180] ss:$24 sps:$4 sm:$0xff]  }
  0x62   : > { %1817 = vmatpush1.bf16.msra.mxu1 %v7084_v56  ;;  %2010 = vmatpush1.bf16.msra.mxu0 %v7087_v57  ;;  %v7191_v56 = vld [vmem:[%s10435_s1 + $0x594] ss:$8 sps:$4 sm:$0xff]   ;;  %v7185_v57 = vld [vmem:[%s8035_s21 + $0x300] ss:$24 sps:$4 sm:$0xff]  }
  0x63   : > { %1818 = vmatprep.subr.bf16.mxu1 %v7098_v58  ;;  %2011 = vmatprep.subr.bf16.mxu0 %v7101_v60  ;;  %v7186_v58 = vld [vmem:[%s10435_s1 + $0x490] ss:$8 sps:$4 sm:$0xff]   ;;  %v7194_v60 = vld [vmem:[%s10435_s1 + $0x484] ss:$8 sps:$4 sm:$0xff]  }
  0x65   : > { %1670 = vmatmul.mubr.bf16.gmra.mxu0 %v7094_v59  ;;  %1750 = vmatmul.mubr.bf16.gmra.mxu1 %v7095_v61  ;;  %v7189_v59 = vld [vmem:[%s10435_s1 + $0x590] ss:$8 sps:$4 sm:$0xff]   ;;  %v7197_v61 = vld [vmem:[%s10435_s1 + $0x584] ss:$8 sps:$4 sm:$0xff]  }
  0x66   : > { %1819 = vmatpush1.bf16.msra.mxu1 %v7096_v62  ;;  %2012 = vmatpush1.bf16.msra.mxu0 %v7099_v63  ;;  %v7200_v62 = vld [vmem:[%s8035_s21 + $0x3c] ss:$24 sps:$4 sm:$0xff]  }
  0x67   : > { %1820 = vmatprep.subr.bf16.mxu1 %v7104_v0  ;;  %2013 = vmatprep.subr.bf16.mxu0 %v7107_v1  ;;  %v7203_v63 = vld [vmem:[%s8035_s21 + $0x44] ss:$24 sps:$4 sm:$0xff]   ;;  %v7192_v0 = vld [vmem:[%s10435_s1 + $0x480] ss:$8 sps:$4 sm:$0xff]  }
  0x68   : > { %1679 = vmatprep.mubr.bf16.mxu0 %v7108_v2  ;;  %1759 = vmatprep.mubr.bf16.mxu1 %v7110_v3  ;;  %v7195_v1 = vld [vmem:[%s10435_s1 + $0x580] ss:$8 sps:$4 sm:$0xff]   ;;  %v7198_v2 = vld [vmem:[%s8035_s21 + $0x38] ss:$24 sps:$4 sm:$0xff]   ;;  %v7206_v3 = vld [vmem:[%s10435_s1 + $0x74] ss:$8 sps:$4 sm:$0xff]  }
  0x6a   : > { %1821 = vmatpush1.bf16.msra.mxu1 %v7102_v4  ;;  %2014 = vmatpush1.bf16.msra.mxu0 %v7105_v5  ;;  %v7209_v4 = vld [vmem:[%s10435_s1 + $0x174] ss:$8 sps:$4 sm:$0xff]   ;;  %v7201_v5 = vld [vmem:[%s8035_s21 + $0x40] ss:$24 sps:$4 sm:$0xff]  }
  0x6b   : > { %1822 = vmatprep.subr.bf16.mxu1 %v7116_v6  ;;  %2015 = vmatprep.subr.bf16.mxu0 %v7119_v8  ;;  %v7204_v6 = vld [vmem:[%s10435_s1 + $0x70] ss:$8 sps:$4 sm:$0xff]   ;;  %v7210_v8 = vld [vmem:[%s8035_s21 + $0x6c] ss:$24 sps:$4 sm:$0xff]  }
  0x6d   : > { %1680 = vmatmul.mubr.bf16.gmra.mxu0 %v7112_v7  ;;  %1760 = vmatmul.mubr.bf16.gmra.mxu1 %v7113_v9  ;;  %v7207_v7 = vld [vmem:[%s10435_s1 + $0x170] ss:$8 sps:$4 sm:$0xff]   ;;  %v7212_v9 = vld [vmem:[%s8035_s21 + $0x74] ss:$24 sps:$4 sm:$0xff]  }
  0x6e   : > { %1823 = vmatpush1.bf16.msra.mxu1 %v7114_v10  ;;  %2016 = vmatpush1.bf16.msra.mxu0 %v7117_v11  ;;  %v7218_v10 = vld [vmem:[%s10435_s1 + $0x64] ss:$8 sps:$4 sm:$0xff]  }
  0x6f   : > { %1824 = vmatprep.subr.bf16.mxu1 %v7122_v12  ;;  %2017 = vmatprep.subr.bf16.mxu0 %v7125_v13  ;;  %v7221_v11 = vld [vmem:[%s10435_s1 + $0x164] ss:$8 sps:$4 sm:$0xff]   ;;  %v7216_v12 = vld [vmem:[%s10435_s1 + $0x60] ss:$8 sps:$4 sm:$0xff]  }
  0x70   : > { %1689 = vmatprep.mubr.bf16.mxu0 %v7126_v14  ;;  %1769 = vmatprep.mubr.bf16.mxu1 %v7128_v15  ;;  %v7219_v13 = vld [vmem:[%s10435_s1 + $0x160] ss:$8 sps:$4 sm:$0xff]   ;;  %v7230_v14 = vld [vmem:[%s10435_s1 + $0x54] ss:$8 sps:$4 sm:$0xff]  }
  0x71   : > { %v7214_v15 = vld [vmem:[%s8035_s21 + $0x68] ss:$24 sps:$4 sm:$0xff]  }
  0x72   : > { %1825 = vmatpush1.bf16.msra.mxu1 %v7120_v16  ;;  %2018 = vmatpush1.bf16.msra.mxu0 %v7123_v17  ;;  %v7233_v16 = vld [vmem:[%s10435_s1 + $0x154] ss:$8 sps:$4 sm:$0xff]   ;;  %v7215_v17 = vld [vmem:[%s8035_s21 + $0x70] ss:$24 sps:$4 sm:$0xff]  }
  0x73   : > { %1826 = vmatprep.subr.bf16.mxu1 %v7134_v19  ;;  %2019 = vmatprep.subr.bf16.mxu0 %v7137_v20  ;;  %v7224_v19 = vld [vmem:[%s8035_s21 + $0xa4] ss:$24 sps:$4 sm:$0xff]   ;;  %v7228_v20 = vld [vmem:[%s10435_s1 + $0x50] ss:$8 sps:$4 sm:$0xff]  }
  0x75   : > { %1690 = vmatmul.mubr.bf16.gmra.mxu0 %v7130_v18  ;;  %1770 = vmatmul.mubr.bf16.gmra.mxu1 %v7131_v21  ;;  %v7222_v18 = vld [vmem:[%s8035_s21 + $0x9c] ss:$24 sps:$4 sm:$0xff]   ;;  %v7231_v21 = vld [vmem:[%s10435_s1 + $0x150] ss:$8 sps:$4 sm:$0xff]  }
  0x76   : > { %1827 = vmatpush2.bf16.msra.mxu1 %v7132_v22  ;;  %2020 = vmatpush2.bf16.msra.mxu0 %v7135_v23  ;;  %v7242_v22 = vld [vmem:[%s10435_s1 + $0x44] ss:$8 sps:$4 sm:$0xff]  }
  0x77   : > { %1828 = vmatprep.subr.bf16.mxu1 %v7140_v24  ;;  %2021 = vmatprep.subr.bf16.mxu0 %v7143_v25  ;;  %v7245_v23 = vld [vmem:[%s10435_s1 + $0x144] ss:$8 sps:$4 sm:$0xff]   ;;  %v7240_v24 = vld [vmem:[%s10435_s1 + $0x40] ss:$8 sps:$4 sm:$0xff]   ;;  %v7226_v25 = vld [vmem:[%s8035_s21 + $0x98] ss:$24 sps:$4 sm:$0xff]  }
  0x78   : > { %1699 = vmatprep.mubr.bf16.mxu0 %v7144_v26  ;;  %1779 = vmatprep.mubr.bf16.mxu1 %v7146_v27  ;;  %v7227_v26 = vld [vmem:[%s8035_s21 + $0xa0] ss:$24 sps:$4 sm:$0xff]  }
  0x79   : > { %v7243_v27 = vld [vmem:[%s10435_s1 + $0x140] ss:$8 sps:$4 sm:$0xff]  }
  0x7a   : > { %1829 = vmatpush2.bf16.msra.mxu1 %v7138_v28  ;;  %2022 = vmatpush2.bf16.msra.mxu0 %v7141_v29  ;;  %v7254_v28 = vld [vmem:[%s10435_s1 + $0x34] ss:$8 sps:$4 sm:$0xff]  }
  0x7b   : > { %1830 = vmatprep.subr.bf16.mxu1 %v7152_v30  ;;  %2023 = vmatprep.subr.bf16.mxu0 %v7155_v32  ;;  %v7257_v29 = vld [vmem:[%s10435_s1 + $0x134] ss:$8 sps:$4 sm:$0xff]   ;;  %v7234_v30 = vld [vmem:[%s8035_s21 + $0xcc] ss:$24 sps:$4 sm:$0xff]   ;;  %v7252_v32 = vld [vmem:[%s10435_s1 + $0x30] ss:$8 sps:$4 sm:$0xff]  }
  0x7d   : > { %1700 = vmatmul.mubr.bf16.gmra.mxu0 %v7148_v31  ;;  %1780 = vmatmul.mubr.bf16.gmra.mxu1 %v7149_v33  ;;  %v7236_v31 = vld [vmem:[%s8035_s21 + $0xd4] ss:$24 sps:$4 sm:$0xff]   ;;  %v7255_v33 = vld [vmem:[%s10435_s1 + $0x130] ss:$8 sps:$4 sm:$0xff]  }
  0x7e   : > { %1831 = vmatpush2.bf16.msra.mxu1 %v7150_v34  ;;  %2024 = vmatpush2.bf16.msra.mxu0 %v7153_v35  ;;  %v7266_v34 = vld [vmem:[%s10435_s1 + $0x24] ss:$8 sps:$4 sm:$0xff]  }
  0x7f   : > { %1832 = vmatprep.subr.bf16.mxu1 %v7158_v36  ;;  %2025 = vmatprep.subr.bf16.mxu0 %v7161_v37  ;;  %v7269_v35 = vld [vmem:[%s10435_s1 + $0x124] ss:$8 sps:$4 sm:$0xff]   ;;  %v7264_v36 = vld [vmem:[%s10435_s1 + $0x20] ss:$8 sps:$4 sm:$0xff]  }
  0x80   : > { %1709 = vmatprep.mubr.bf16.mxu0 %v7162_v38  ;;  %1789 = vmatprep.mubr.bf16.mxu1 %v7164_v39  ;;  %v7267_v37 = vld [vmem:[%s10435_s1 + $0x120] ss:$8 sps:$4 sm:$0xff]  }
  0x81   : > { %v7238_v38 = vld [vmem:[%s8035_s21 + $0xc8] ss:$24 sps:$4 sm:$0xff]  }
  0x82   : > { %1833 = vmatpush2.bf16.msra.mxu1 %v7156_v40  ;;  %2026 = vmatpush2.bf16.msra.mxu0 %v7159_v41  ;;  %v7239_v39 = vld [vmem:[%s8035_s21 + $0xd0] ss:$24 sps:$4 sm:$0xff]   ;;  %v7278_v40 = vld [vmem:[%s10435_s1 + $0x14] ss:$8 sps:$4 sm:$0xff]  }
  0x83   : > { %1834 = vmatprep.subr.bf16.mxu1 %v7170_v43  ;;  %2027 = vmatprep.subr.bf16.mxu0 %v7173_v44  ;;  %v7281_v41 = vld [vmem:[%s10435_s1 + $0x114] ss:$8 sps:$4 sm:$0xff]   ;;  %v7276_v44 = vld [vmem:[%s10435_s1 + $0x10] ss:$8 sps:$4 sm:$0xff]  }
  0x84   : > { %v7248_v43 = vld [vmem:[%s8035_s21 + $0x104] ss:$24 sps:$4 sm:$0xff]  }
  0x85   : > { %1710 = vmatmul.mubr.bf16.gmra.mxu0 %v7166_v42  ;;  %1790 = vmatmul.mubr.bf16.gmra.mxu1 %v7167_v45  ;;  %v7246_v42 = vld [vmem:[%s8035_s21 + $0xfc] ss:$24 sps:$4 sm:$0xff]   ;;  %v7279_v45 = vld [vmem:[%s10435_s1 + $0x110] ss:$8 sps:$4 sm:$0xff]  }
  0x86   : > { %1835 = vmatpush2.bf16.msra.mxu1 %v7168_v46  ;;  %2028 = vmatpush2.bf16.msra.mxu0 %v7171_v47  ;;  %v7290_v46 = vld [vmem:[%s10435_s1 + $0x4] ss:$8 sps:$4 sm:$0xff]  }
  0x87   : > { %1836 = vmatprep.subr.bf16.mxu1 %v7176_v48  ;;  %2029 = vmatprep.subr.bf16.mxu0 %v7179_v49  ;;  %v7293_v47 = vld [vmem:[%s10435_s1 + $0x104] ss:$8 sps:$4 sm:$0xff]   ;;  %v7288_v48 = vld [vmem:[%s10435_s1] ss:$8 sps:$4 sm:$0xff]   ;;  %v7250_v49 = vld [vmem:[%s8035_s21 + $0xf8] ss:$24 sps:$4 sm:$0xff]  }
  0x88   : > { %1719 = vmatprep.mubr.bf16.mxu0 %v7180_v50  ;;  %1799 = vmatprep.mubr.bf16.mxu1 %v7182_v51  ;;  %v7251_v50 = vld [vmem:[%s8035_s21 + $0x100] ss:$24 sps:$4 sm:$0xff]  }
  0x89   : > { %v7291_v51 = vld [vmem:[%s10435_s1 + $0x100] ss:$8 sps:$4 sm:$0xff]  }
  0x8a   : > { %1837 = vmatpush2.bf16.msra.mxu1 %v7174_v52  ;;  %2030 = vmatpush2.bf16.msra.mxu0 %v7177_v53  ;;  %v7302_v52 = vld [vmem:[%s10435_s1 + $0xf4] ss:$8 sps:$4 sm:$0xff]  }
  0x8b   : > { %1838 = vmatprep.subr.bf16.mxu1 %v7188_v54  ;;  %2031 = vmatprep.subr.bf16.mxu0 %v7191_v56  ;;  %v7305_v53 = vld [vmem:[%s10435_s1 + $0x1f4] ss:$8 sps:$4 sm:$0xff]   ;;  %v7258_v54 = vld [vmem:[%s8035_s21 + $0x12c] ss:$24 sps:$4 sm:$0xff]   ;;  %v7300_v56 = vld [vmem:[%s10435_s1 + $0xf0] ss:$8 sps:$4 sm:$0xff]  }
  0x8d   : > { %1720 = vmatmul.mubr.bf16.gmra.mxu0 %v7184_v55  ;;  %1800 = vmatmul.mubr.bf16.gmra.mxu1 %v7185_v57  ;;  %v7260_v55 = vld [vmem:[%s8035_s21 + $0x134] ss:$24 sps:$4 sm:$0xff]   ;;  %v7303_v57 = vld [vmem:[%s10435_s1 + $0x1f0] ss:$8 sps:$4 sm:$0xff]  }
  0x8e   : > { %1839 = vmatpush2.bf16.msra.mxu1 %v7186_v58  ;;  %2032 = vmatpush2.bf16.msra.mxu0 %v7189_v59  ;;  %v7314_v58 = vld [vmem:[%s10435_s1 + $0xe4] ss:$8 sps:$4 sm:$0xff]  }
  0x8f   : > { %1840 = vmatprep.subr.bf16.mxu1 %v7194_v60  ;;  %2033 = vmatprep.subr.bf16.mxu0 %v7197_v61  ;;  %v7317_v59 = vld [vmem:[%s10435_s1 + $0x1e4] ss:$8 sps:$4 sm:$0xff]   ;;  %v7312_v60 = vld [vmem:[%s10435_s1 + $0xe0] ss:$8 sps:$4 sm:$0xff]  }
  0x90   : > { %1842 = vmatprep.mubr.bf16.mxu1 %v7200_v62  ;;  %2035 = vmatprep.mubr.bf16.mxu0 %v7203_v63  ;;  %v7315_v61 = vld [vmem:[%s10435_s1 + $0x1e0] ss:$8 sps:$4 sm:$0xff]  }
  0x91   : > { %v7262_v62 = vld [vmem:[%s8035_s21 + $0x128] ss:$24 sps:$4 sm:$0xff]  }
  0x92   : > { %1841 = vmatpush2.bf16.msra.mxu1 %v7192_v0  ;;  %2034 = vmatpush2.bf16.msra.mxu0 %v7195_v1  ;;  %v7263_v63 = vld [vmem:[%s8035_s21 + $0x130] ss:$24 sps:$4 sm:$0xff]   ;;  %v7326_v0 = vld [vmem:[%s10435_s1 + $0xd4] ss:$8 sps:$4 sm:$0xff]  }
  0x93   : > { %3156 = vmatprep.subr.bf16.mxu1 %v7206_v3  ;;  %3349 = vmatprep.subr.bf16.mxu0 %v7209_v4  ;;  %v7329_v1 = vld [vmem:[%s10435_s1 + $0x1d4] ss:$8 sps:$4 sm:$0xff]   ;;  %v7324_v4 = vld [vmem:[%s10435_s1 + $0xd0] ss:$8 sps:$4 sm:$0xff]  }
  0x94   : > { %v7272_v3 = vld [vmem:[%s8035_s21 + $0x164] ss:$24 sps:$4 sm:$0xff]  }
  0x95   : > { %1843 = vmatmul.mubr.bf16.vlgmr.msra.gmra.mxu1 %v7198_v2  ;;  %2036 = vmatmul.mubr.bf16.vlgmr.msra.gmra.mxu0 %v7201_v5  ;;  %v7270_v2 = vld [vmem:[%s8035_s21 + $0x15c] ss:$24 sps:$4 sm:$0xff]   ;;  %v7327_v5 = vld [vmem:[%s10435_s1 + $0x1d0] ss:$8 sps:$4 sm:$0xff]  }
  0x96   : > { %3157 = vmatpush1.bf16.msra.mxu1 %v7204_v6  ;;  %3350 = vmatpush1.bf16.msra.mxu0 %v7207_v7  ;;  %v7338_v6 = vld [vmem:[%s10435_s1 + $0xc4] ss:$8 sps:$4 sm:$0xff]  }
  0x97   : > { %1852 = vmatprep.mubr.bf16.mxu1 %v7210_v8  ;;  %2045 = vmatprep.mubr.bf16.mxu0 %v7212_v9  ;;  %v7341_v7 = vld [vmem:[%s10435_s1 + $0x1c4] ss:$8 sps:$4 sm:$0xff]   ;;  %v7336_v8 = vld [vmem:[%s10435_s1 + $0xc0] ss:$8 sps:$4 sm:$0xff]  }
  0x98   : > { %3158 = vmatprep.subr.bf16.mxu1 %v7218_v10  ;;  %3351 = vmatprep.subr.bf16.mxu0 %v7221_v11  ;;  %v7339_v9 = vld [vmem:[%s10435_s1 + $0x1c0] ss:$8 sps:$4 sm:$0xff]   ;;  %v7274_v10 = vld [vmem:[%s8035_s21 + $0x158] ss:$24 sps:$4 sm:$0xff]  }
  0x99   : > { %v7275_v11 = vld [vmem:[%s8035_s21 + $0x160] ss:$24 sps:$4 sm:$0xff]  }
  0x9a   : > { %3159 = vmatpush1.bf16.msra.mxu1 %v7216_v12  ;;  %3352 = vmatpush1.bf16.msra.mxu0 %v7219_v13  ;;  %v7350_v12 = vld [vmem:[%s10435_s1 + $0xb4] ss:$8 sps:$4 sm:$0xff]  }
  0x9b   : > { %3160 = vmatprep.subr.bf16.mxu1 %v7230_v14  ;;  %3353 = vmatprep.subr.bf16.mxu0 %v7233_v16  ;;  %v7353_v13 = vld [vmem:[%s10435_s1 + $0x1b4] ss:$8 sps:$4 sm:$0xff]   ;;  %v7282_v14 = vld [vmem:[%s8035_s21 + $0x18c] ss:$24 sps:$4 sm:$0xff]   ;;  %v7348_v16 = vld [vmem:[%s10435_s1 + $0xb0] ss:$8 sps:$4 sm:$0xff]  }
  0x9d   : > { %1853 = vmatmul.mubr.bf16.gmra.mxu1 %v7214_v15  ;;  %2046 = vmatmul.mubr.bf16.gmra.mxu0 %v7215_v17  ;;  %v7284_v15 = vld [vmem:[%s8035_s21 + $0x194] ss:$24 sps:$4 sm:$0xff]   ;;  %v7351_v17 = vld [vmem:[%s10435_s1 + $0x1b0] ss:$8 sps:$4 sm:$0xff]  }
  0x9e   : > { %1862 = vmatprep.mubr.bf16.mxu1 %v7222_v18  ;;  %2055 = vmatprep.mubr.bf16.mxu0 %v7224_v19  ;;  %v7362_v18 = vld [vmem:[%s10435_s1 + $0xa4] ss:$8 sps:$4 sm:$0xff]  }
  0x9f   : > { %3161 = vmatpush1.bf16.msra.mxu1 %v7228_v20  ;;  %3354 = vmatpush1.bf16.msra.mxu0 %v7231_v21  ;;  %v7365_v19 = vld [vmem:[%s10435_s1 + $0x1a4] ss:$8 sps:$4 sm:$0xff]   ;;  %v7360_v20 = vld [vmem:[%s10435_s1 + $0xa0] ss:$8 sps:$4 sm:$0xff]  }
  0xa0   : > { %3162 = vmatprep.subr.bf16.mxu1 %v7242_v22  ;;  %3355 = vmatprep.subr.bf16.mxu0 %v7245_v23  ;;  %v7363_v21 = vld [vmem:[%s10435_s1 + $0x1a0] ss:$8 sps:$4 sm:$0xff]  }
  0xa1   : > { %v7286_v22 = vld [vmem:[%s8035_s21 + $0x188] ss:$24 sps:$4 sm:$0xff]  }
  0xa2   : > { %v7287_v23 = vld [vmem:[%s8035_s21 + $0x190] ss:$24 sps:$4 sm:$0xff]  }
  0xa3   : > { %3163 = vmatpush1.bf16.msra.mxu1 %v7240_v24  ;;  %3356 = vmatpush1.bf16.msra.mxu0 %v7243_v27  ;;  %v7374_v24 = vld [vmem:[%s10435_s1 + $0x94] ss:$8 sps:$4 sm:$0xff]  }
  0xa4   : > { %3164 = vmatprep.subr.bf16.mxu1 %v7254_v28  ;;  %3357 = vmatprep.subr.bf16.mxu0 %v7257_v29  ;;  %v7296_v27 = vld [vmem:[%s8035_s21 + $0x1c4] ss:$24 sps:$4 sm:$0xff]   ;;  %v7372_v28 = vld [vmem:[%s10435_s1 + $0x90] ss:$8 sps:$4 sm:$0xff]  }
  0xa5   : > { %1863 = vmatmul.mubr.bf16.gmra.mxu1 %v7226_v25  ;;  %2056 = vmatmul.mubr.bf16.gmra.mxu0 %v7227_v26  ;;  %v7377_v25 = vld [vmem:[%s10435_s1 + $0x194] ss:$8 sps:$4 sm:$0xff]   ;;  %v7375_v29 = vld [vmem:[%s10435_s1 + $0x190] ss:$8 sps:$4 sm:$0xff]  }
  0xa6   : > { %1872 = vmatprep.mubr.bf16.mxu1 %v7234_v30  ;;  %2065 = vmatprep.mubr.bf16.mxu0 %v7236_v31  ;;  %v7294_v26 = vld [vmem:[%s8035_s21 + $0x1bc] ss:$24 sps:$4 sm:$0xff]   ;;  %v7386_v30 = vld [vmem:[%s10435_s1 + $0x84] ss:$8 sps:$4 sm:$0xff]  }
  0xa7   : > { %3165 = vmatpush1.bf16.msra.mxu1 %v7252_v32  ;;  %3358 = vmatpush1.bf16.msra.mxu0 %v7255_v33  ;;  %v7389_v31 = vld [vmem:[%s10435_s1 + $0x184] ss:$8 sps:$4 sm:$0xff]   ;;  %v7384_v32 = vld [vmem:[%s10435_s1 + $0x80] ss:$8 sps:$4 sm:$0xff]  }
  0xa8   : > { %3166 = vmatprep.subr.bf16.mxu1 %v7266_v34  ;;  %3359 = vmatprep.subr.bf16.mxu0 %v7269_v35  ;;  %v7387_v33 = vld [vmem:[%s10435_s1 + $0x180] ss:$8 sps:$4 sm:$0xff]   ;;  %v7398_v34 = vld [vmem:[%s10435_s1 + $0x274] ss:$8 sps:$4 sm:$0xff]  }
  0xa9   : > { %v7401_v35 = vld [vmem:[%s10435_s1 + $0x674] ss:$8 sps:$4 sm:$0xff]  }
  0xab   : > { %3167 = vmatpush1.bf16.msra.mxu1 %v7264_v36  ;;  %3360 = vmatpush1.bf16.msra.mxu0 %v7267_v37  ;;  %v7298_v36 = vld [vmem:[%s8035_s21 + $0x1b8] ss:$24 sps:$4 sm:$0xff]  }
  0xac   : > { %3168 = vmatprep.subr.bf16.mxu1 %v7278_v40  ;;  %3361 = vmatprep.subr.bf16.mxu0 %v7281_v41  ;;  %v7299_v37 = vld [vmem:[%s8035_s21 + $0x1c0] ss:$24 sps:$4 sm:$0xff]   ;;  %v7311_v41 = vld [vmem:[%s8035_s21 + $0x1f0] ss:$24 sps:$4 sm:$0xff]  }
  0xad   : > { %1873 = vmatmul.mubr.bf16.gmra.mxu1 %v7238_v38  ;;  %2066 = vmatmul.mubr.bf16.gmra.mxu0 %v7239_v39  ;;  %v7306_v38 = vld [vmem:[%s8035_s21 + $0x1ec] ss:$24 sps:$4 sm:$0xff]   ;;  %v7310_v40 = vld [vmem:[%s8035_s21 + $0x1e8] ss:$24 sps:$4 sm:$0xff]  }
  0xae   : > { %1882 = vmatprep.mubr.bf16.mxu1 %v7246_v42  ;;  %2075 = vmatprep.mubr.bf16.mxu0 %v7248_v43  ;;  %v7308_v39 = vld [vmem:[%s8035_s21 + $0x1f4] ss:$24 sps:$4 sm:$0xff]   ;;  %v7320_v43 = vld [vmem:[%s8035_s21 + $0x224] ss:$24 sps:$4 sm:$0xff]  }
  0xaf   : > { %3169 = vmatpush1.bf16.msra.mxu1 %v7276_v44  ;;  %3362 = vmatpush1.bf16.msra.mxu0 %v7279_v45  ;;  %v7318_v42 = vld [vmem:[%s8035_s21 + $0x21c] ss:$24 sps:$4 sm:$0xff]   ;;  %v7322_v44 = vld [vmem:[%s8035_s21 + $0x218] ss:$24 sps:$4 sm:$0xff]  }
  0xb0   : > { %3170 = vmatprep.subr.bf16.mxu1 %v7290_v46  ;;  %3363 = vmatprep.subr.bf16.mxu0 %v7293_v47  ;;  %v7323_v45 = vld [vmem:[%s8035_s21 + $0x220] ss:$24 sps:$4 sm:$0xff]   ;;  %v7330_v46 = vld [vmem:[%s8035_s21 + $0x24c] ss:$24 sps:$4 sm:$0xff]  }
  0xb1   : > { %v7332_v47 = vld [vmem:[%s8035_s21 + $0x254] ss:$24 sps:$4 sm:$0xff]  }
  0xb3   : > { %3171 = vmatpush1.bf16.msra.mxu1 %v7288_v48  ;;  %3364 = vmatpush1.bf16.msra.mxu0 %v7291_v51  ;;  %v7334_v48 = vld [vmem:[%s8035_s21 + $0x248] ss:$24 sps:$4 sm:$0xff]   ;;  %v7344_v51 = vld [vmem:[%s8035_s21 + $0x284] ss:$24 sps:$4 sm:$0xff]  }
  0xb4   : > { %3172 = vmatprep.subr.bf16.mxu1 %v7302_v52  ;;  %3365 = vmatprep.subr.bf16.mxu0 %v7305_v53  ;;  %v7346_v52 = vld [vmem:[%s8035_s21 + $0x278] ss:$24 sps:$4 sm:$0xff]  }
  0xb5   : > { %1883 = vmatmul.mubr.bf16.gmra.mxu1 %v7250_v49  ;;  %2076 = vmatmul.mubr.bf16.gmra.mxu0 %v7251_v50  ;;  %v7335_v49 = vld [vmem:[%s8035_s21 + $0x250] ss:$24 sps:$4 sm:$0xff]   ;;  %v7342_v50 = vld [vmem:[%s8035_s21 + $0x27c] ss:$24 sps:$4 sm:$0xff]   ;;  %v7347_v53 = vld [vmem:[%s8035_s21 + $0x280] ss:$24 sps:$4 sm:$0xff]  }
  0xb6   : > { %1892 = vmatprep.mubr.bf16.mxu1 %v7258_v54  ;;  %2085 = vmatprep.mubr.bf16.mxu0 %v7260_v55  ;;  %v7354_v54 = vld [vmem:[%s8035_s21 + $0x2ac] ss:$24 sps:$4 sm:$0xff]  }
  0xb7   : > { %3173 = vmatpush2.bf16.msra.mxu1 %v7300_v56  ;;  %3366 = vmatpush2.bf16.msra.mxu0 %v7303_v57  ;;  %v7356_v55 = vld [vmem:[%s8035_s21 + $0x2b4] ss:$24 sps:$4 sm:$0xff]   ;;  %v7358_v56 = vld [vmem:[%s8035_s21 + $0x2a8] ss:$24 sps:$4 sm:$0xff]  }
  0xb8   : > { %3174 = vmatprep.subr.bf16.mxu1 %v7314_v58  ;;  %3367 = vmatprep.subr.bf16.mxu0 %v7317_v59  ;;  %v7359_v57 = vld [vmem:[%s8035_s21 + $0x2b0] ss:$24 sps:$4 sm:$0xff]   ;;  %v7366_v58 = vld [vmem:[%s8035_s21 + $0x2dc] ss:$24 sps:$4 sm:$0xff]  }
  0xb9   : > { %v7368_v59 = vld [vmem:[%s8035_s21 + $0x2e4] ss:$24 sps:$4 sm:$0xff]  }
  0xbb   : > { %3175 = vmatpush2.bf16.msra.mxu1 %v7312_v60  ;;  %3368 = vmatpush2.bf16.msra.mxu0 %v7315_v61  ;;  %v7370_v60 = vld [vmem:[%s8035_s21 + $0x2d8] ss:$24 sps:$4 sm:$0xff]  }
  0xbc   : > { %3176 = vmatprep.subr.bf16.mxu1 %v7326_v0  ;;  %3369 = vmatprep.subr.bf16.mxu0 %v7329_v1  ;;  %v7371_v61 = vld [vmem:[%s8035_s21 + $0x2e0] ss:$24 sps:$4 sm:$0xff]   ;;  %v7383_v1 = vld [vmem:[%s8035_s21 + $0x310] ss:$24 sps:$4 sm:$0xff]  }
  0xbd   : > { %1893 = vmatmul.mubr.bf16.gmra.mxu1 %v7262_v62  ;;  %2086 = vmatmul.mubr.bf16.gmra.mxu0 %v7263_v63  ;;  %v7378_v62 = vld [vmem:[%s8035_s21 + $0x30c] ss:$24 sps:$4 sm:$0xff]   ;;  %v7382_v0 = vld [vmem:[%s8035_s21 + $0x308] ss:$24 sps:$4 sm:$0xff]  }
  0xbe   : > { %1902 = vmatprep.mubr.bf16.mxu1 %v7270_v2  ;;  %2095 = vmatprep.mubr.bf16.mxu0 %v7272_v3  ;;  %v7380_v63 = vld [vmem:[%s8035_s21 + $0x314] ss:$24 sps:$4 sm:$0xff]   ;;  %v7392_v2 = vld [vmem:[%s8035_s21 + $0x4] ss:$24 sps:$4 sm:$0xff]  }
  0xbf   : > { %3177 = vmatpush2.bf16.msra.mxu1 %v7324_v4  ;;  %3370 = vmatpush2.bf16.msra.mxu0 %v7327_v5  ;;  %v7395_v3 = vld [vmem:[%s8035_s21 + $0xc] ss:$24 sps:$4 sm:$0xff]   ;;  %v7390_v4 = vld [vmem:[%s8035_s21] ss:$24 sps:$4 sm:$0xff]  }
  0xc0   : > { %3178 = vmatprep.subr.bf16.mxu1 %v7338_v6  ;;  %3371 = vmatprep.subr.bf16.mxu0 %v7341_v7  ;;  %v7393_v5 = vld [vmem:[%s8035_s21 + $0x8] ss:$24 sps:$4 sm:$0xff]   ;;  %v7396_v6 = vld [vmem:[%s10435_s1 + $0x270] ss:$8 sps:$4 sm:$0xff]  }
  0xc1   : > { %v7399_v7 = vld [vmem:[%s10435_s1 + $0x670] ss:$8 sps:$4 sm:$0xff]  }
  0xc3   : > { %3179 = vmatpush2.bf16.msra.mxu1 %v7336_v8  ;;  %3372 = vmatpush2.bf16.msra.mxu0 %v7339_v9  ;;  %v7402_v8 = vld [vmem:[%s8035_s21 + $0x34] ss:$24 sps:$4 sm:$0xff]  }
  0xc4   : > { %3180 = vmatprep.subr.bf16.mxu1 %v7350_v12  ;;  %3373 = vmatprep.subr.bf16.mxu0 %v7353_v13  ;;  %v7407_v9 = vld [vmem:[%s10435_s1 + $0x264] ss:$8 sps:$4 sm:$0xff]   ;;  %v7408_v12 = vld [vmem:[%s10435_s1 + $0x660] ss:$8 sps:$4 sm:$0xff]  }
  0xc5   : > { %1903 = vmatmul.mubr.bf16.gmra.mxu1 %v7274_v10  ;;  %2096 = vmatmul.mubr.bf16.gmra.mxu0 %v7275_v11  ;;  %v7410_v10 = vld [vmem:[%s10435_s1 + $0x664] ss:$8 sps:$4 sm:$0xff]   ;;  %v7405_v11 = vld [vmem:[%s10435_s1 + $0x260] ss:$8 sps:$4 sm:$0xff]  }
  0xc6   : > { %1912 = vmatprep.mubr.bf16.mxu1 %v7282_v14  ;;  %2105 = vmatprep.mubr.bf16.mxu0 %v7284_v15  ;;  %v7416_v15 = vld [vmem:[%s10435_s1 + $0x254] ss:$8 sps:$4 sm:$0xff]  }
  0xc7   : > { %3181 = vmatpush2.bf16.msra.mxu1 %v7348_v16  ;;  %3374 = vmatpush2.bf16.msra.mxu0 %v7351_v17  ;;  %v7419_v16 = vld [vmem:[%s10435_s1 + $0x654] ss:$8 sps:$4 sm:$0xff]  }
  0xc8   : > { %3182 = vmatprep.subr.bf16.mxu1 %v7362_v18  ;;  %3375 = vmatprep.subr.bf16.mxu0 %v7365_v19  ;;  %v7813_v19 = vld [vmem:[%s8035_s21 + $0x3c] ss:$24 sps:$4 sm:$0xff]  }
  0xcb   : > { %3183 = vmatpush2.bf16.msra.mxu1 %v7360_v20  ;;  %3376 = vmatpush2.bf16.msra.mxu0 %v7363_v21  ;;  %v7404_v20 = vld [vmem:[%s8035_s21 + $0x30] ss:$24 sps:$4 sm:$0xff]  }
  0xcc   : > { %3184 = vmatprep.subr.bf16.mxu1 %v7374_v24  ;;  %3377 = vmatprep.subr.bf16.mxu0 %v7377_v25  ;;  %v7414_v24 = vld [vmem:[%s10435_s1 + $0x250] ss:$8 sps:$4 sm:$0xff]  }
  0xcd   : > { %1913 = vmatmul.mubr.bf16.gmra.mxu1 %v7286_v22  ;;  %2106 = vmatmul.mubr.bf16.gmra.mxu0 %v7287_v23  ;;  %v7411_v23 = vld [vmem:[%s8035_s21 + $0x64] ss:$24 sps:$4 sm:$0xff]  }
  0xce   : > { %1922 = vmatprep.mubr.bf16.mxu1 %v7294_v26  ;;  %2115 = vmatprep.mubr.bf16.mxu0 %v7296_v27  ;;  %v7417_v27 = vld [vmem:[%s10435_s1 + $0x650] ss:$8 sps:$4 sm:$0xff]  }
  0xcf   : > { %3185 = vmatpush2.bf16.msra.mxu1 %v7372_v28  ;;  %3378 = vmatpush2.bf16.msra.mxu0 %v7375_v29  ;;  %v7425_v28 = vld [vmem:[%s10435_s1 + $0x244] ss:$8 sps:$4 sm:$0xff]  }
  0xd0   : > { %3186 = vmatprep.subr.bf16.mxu1 %v7386_v30  ;;  %3379 = vmatprep.subr.bf16.mxu0 %v7389_v31  ;;  %v7428_v29 = vld [vmem:[%s10435_s1 + $0x644] ss:$8 sps:$4 sm:$0xff]  }
  0xd3   : > { %3187 = vmatpush2.bf16.msra.mxu1 %v7384_v32  ;;  %3380 = vmatpush2.bf16.msra.mxu0 %v7387_v33  ;;  %v7814_v32 = vld [vmem:[%s8035_s21 + $0x38] ss:$24 sps:$4 sm:$0xff]   ;;  %v7423_v33 = vld [vmem:[%s10435_s1 + $0x240] ss:$8 sps:$4 sm:$0xff]  }
  0xd4   : > { %3542 = vmatprep.subr.bf16.mxu1 %v7398_v34  ;;  %4889 = vmatprep.subr.bf16.mxu0 %v7401_v35  ;;  %v7426_v34 = vld [vmem:[%s10435_s1 + $0x640] ss:$8 sps:$4 sm:$0xff]   ;;  %v7815_v35 = vld [vmem:[%s8035_s21 + $0x6c] ss:$24 sps:$4 sm:$0xff]  }
  0xd5   : > { %1923 = vmatmul.mubr.bf16.gmra.mxu1 %v7298_v36  ;;  %2116 = vmatmul.mubr.bf16.gmra.mxu0 %v7299_v37 }
  0xd6   : > { %1932 = vmatprep.mubr.bf16.mxu1 %v7306_v38  ;;  %2125 = vmatprep.mubr.bf16.mxu0 %v7308_v39  ;;  %v7413_v38 = vld [vmem:[%s8035_s21 + $0x60] ss:$24 sps:$4 sm:$0xff]   ;;  %v7434_v39 = vld [vmem:[%s10435_s1 + $0x234] ss:$8 sps:$4 sm:$0xff]  }
  0xdd   : > { %1933 = vmatmul.mubr.bf16.gmra.mxu1 %v7310_v40  ;;  %2126 = vmatmul.mubr.bf16.gmra.mxu0 %v7311_v41  ;;  %v7437_v40 = vld [vmem:[%s10435_s1 + $0x634] ss:$8 sps:$4 sm:$0xff]  }
  0xde   : > { %1942 = vmatprep.mubr.bf16.mxu1 %v7318_v42  ;;  %2135 = vmatprep.mubr.bf16.mxu0 %v7320_v43  ;;  %v7420_v43 = vld [vmem:[%s8035_s21 + $0x94] ss:$24 sps:$4 sm:$0xff]  }
  0xe5   : > { %1943 = vmatmul.mubr.bf16.gmra.mxu1 %v7322_v44  ;;  %2136 = vmatmul.mubr.bf16.gmra.mxu0 %v7323_v45  ;;  %v7432_v44 = vld [vmem:[%s10435_s1 + $0x230] ss:$8 sps:$4 sm:$0xff]  }
  0xe6   : > { %1952 = vmatprep.mubr.bf16.mxu1 %v7330_v46  ;;  %2145 = vmatprep.mubr.bf16.mxu0 %v7332_v47  ;;  %v7435_v47 = vld [vmem:[%s10435_s1 + $0x630] ss:$8 sps:$4 sm:$0xff]  }
  0xed   : > { %1953 = vmatmul.mubr.bf16.gmra.mxu1 %v7334_v48  ;;  %2146 = vmatmul.mubr.bf16.gmra.mxu0 %v7335_v49  ;;  %v7443_v48 = vld [vmem:[%s10435_s1 + $0x224] ss:$8 sps:$4 sm:$0xff]  }
  0xee   : > { %1962 = vmatprep.mubr.bf16.mxu1 %v7342_v50  ;;  %2155 = vmatprep.mubr.bf16.mxu0 %v7344_v51  ;;  %v7446_v49 = vld [vmem:[%s10435_s1 + $0x624] ss:$8 sps:$4 sm:$0xff]  }
  0xf5   : > { %1963 = vmatmul.mubr.bf16.gmra.mxu1 %v7346_v52  ;;  %2156 = vmatmul.mubr.bf16.gmra.mxu0 %v7347_v53  ;;  %v7816_v52 = vld [vmem:[%s8035_s21 + $0x68] ss:$24 sps:$4 sm:$0xff]  }
  0xf6   : > { %1972 = vmatprep.mubr.bf16.mxu1 %v7354_v54  ;;  %2165 = vmatprep.mubr.bf16.mxu0 %v7356_v55  ;;  %v7441_v53 = vld [vmem:[%s10435_s1 + $0x220] ss:$8 sps:$4 sm:$0xff]   ;;  %v7817_v55 = vld [vmem:[%s8035_s21 + $0x9c] ss:$24 sps:$4 sm:$0xff]  }
  0xf7   : > { %v7444_v54 = vld [vmem:[%s10435_s1 + $0x620] ss:$8 sps:$4 sm:$0xff]  }
  0xfd   : > { %1973 = vmatmul.mubr.bf16.gmra.mxu1 %v7358_v56  ;;  %2166 = vmatmul.mubr.bf16.gmra.mxu0 %v7359_v57 }
  0xfe   : > { %1982 = vmatprep.mubr.bf16.mxu1 %v7366_v58  ;;  %2175 = vmatprep.mubr.bf16.mxu0 %v7368_v59  ;;  %v7422_v58 = vld [vmem:[%s8035_s21 + $0x90] ss:$24 sps:$4 sm:$0xff]   ;;  %v7452_v59 = vld [vmem:[%s10435_s1 + $0x214] ss:$8 sps:$4 sm:$0xff]  }
 0x105   : > { %1983 = vmatmul.mubr.bf16.gmra.mxu1 %v7370_v60  ;;  %2176 = vmatmul.mubr.bf16.gmra.mxu0 %v7371_v61  ;;  %v7455_v60 = vld [vmem:[%s10435_s1 + $0x614] ss:$8 sps:$4 sm:$0xff]  }
 0x106   : > { %1992 = vmatprep.mubr.bf16.mxu1 %v7378_v62  ;;  %2185 = vmatprep.mubr.bf16.mxu0 %v7380_v63  ;;  %v7431_v63 = vld [vmem:[%s8035_s21 + $0xc4] ss:$24 sps:$4 sm:$0xff]  }
 0x10d   : > { %1993 = vmatmul.mubr.bf16.gmra.mxu1 %v7382_v0  ;;  %2186 = vmatmul.mubr.bf16.gmra.mxu0 %v7383_v1  ;;  %v7450_v0 = vld [vmem:[%s10435_s1 + $0x210] ss:$8 sps:$4 sm:$0xff]  }
 0x10e   : > { %3188 = vmatprep.mubr.bf16.mxu1 %v7392_v2  ;;  %3381 = vmatprep.mubr.bf16.mxu0 %v7395_v3  ;;  %v7453_v3 = vld [vmem:[%s10435_s1 + $0x610] ss:$8 sps:$4 sm:$0xff]  }
 0x115   : > { %v8606_v13 = vpop.f32.mrf.mxu0  ;;  %v8608_v14 = vpop.f32.mrf.mxu1  ;;  %3189 = vmatmul.mubr.bf16.vlgmr.msra.gmra.mxu1 %v7390_v4  ;;  %3382 = vmatmul.mubr.bf16.vlgmr.msra.gmra.mxu0 %v7393_v5  ;;  %v7461_v4 = vld [vmem:[%s10435_s1 + $0x204] ss:$8 sps:$4 sm:$0xff]  }
 0x116   : > { %3543 = vmatpush1.bf16.msra.mxu1 %v7396_v6  ;;  %4890 = vmatpush1.bf16.msra.mxu0 %v7399_v7  ;;  %v7464_v5 = vld [vmem:[%s10435_s1 + $0x604] ss:$8 sps:$4 sm:$0xff]  }
 0x117   : > { %v8616_v17 = vpop.f32.mrf.mxu0  ;;  %v8618_v18 = vpop.f32.mrf.mxu1  ;;  %3198 = vmatprep.mubr.bf16.mxu1 %v7402_v8  ;;  %3391 = vmatprep.mubr.bf16.mxu0 %v7813_v19  ;;  %v7818_v8 = vld [vmem:[%s8035_s21 + $0x98] ss:$24 sps:$4 sm:$0xff]   ;;  %v7470_v19 = vld [vmem:[%s10435_s1 + $0x2f4] ss:$8 sps:$4 sm:$0xff]  }
 0x118   : > { %3544 = vmatprep.subr.bf16.mxu1 %v7407_v9  ;;  %4891 = vmatprep.subr.bf16.mxu0 %v7410_v10  ;;  %v7459_v9 = vld [vmem:[%s10435_s1 + $0x200] ss:$8 sps:$4 sm:$0xff]  }
 0x119   : > { %v8622_v21 = vpop.f32.mrf.mxu0  ;;  %v8624_v22 = vpop.f32.mrf.mxu1  ;;  %v7462_v10 = vld [vmem:[%s10435_s1 + $0x600] ss:$8 sps:$4 sm:$0xff]  }
 0x11a   : > { %3545 = vmatpush1.bf16.msra.mxu1 %v7405_v11  ;;  %4892 = vmatpush1.bf16.msra.mxu0 %v7408_v12  ;;  %v7819_v11 = vld [vmem:[%s8035_s21 + $0xcc] ss:$24 sps:$4 sm:$0xff]  }
 0x11b   : > { %v8630_v25 = vpop.f32.mrf.mxu0  ;;  %v8632_v26 = vpop.f32.mrf.mxu1  ;;  %3546 = vmatprep.subr.bf16.mxu1 %v7416_v15  ;;  %4893 = vmatprep.subr.bf16.mxu0 %v7419_v16  ;;  %v7429_v16 = vld [vmem:[%s8035_s21 + $0xc0] ss:$24 sps:$4 sm:$0xff]  }
 0x11d   : > { %v8643_v30 = vpop.f32.mrf.mxu0  ;;  %v8645_v31 = vpop.f32.mrf.mxu1  ;;  %3199 = vmatmul.mubr.bf16.gmra.mxu1 %v7404_v20  ;;  %3392 = vmatmul.mubr.bf16.gmra.mxu0 %v7814_v32  ;;  %v7473_v20 = vld [vmem:[%s10435_s1 + $0x6f4] ss:$8 sps:$4 sm:$0xff]  }
 0x11e   : > { %3208 = vmatprep.mubr.bf16.mxu1 %v7411_v23  ;;  %3401 = vmatprep.mubr.bf16.mxu0 %v7815_v35  ;;  %v7482_v35 = vld [vmem:[%s10435_s1 + $0x6e4] ss:$8 sps:$4 sm:$0xff]  }
 0x11f   : > { %v8655_v36 = vpop.f32.mrf.mxu0  ;;  %v8657_v37 = vpop.f32.mrf.mxu1  ;;  %3547 = vmatpush1.bf16.msra.mxu1 %v7414_v24  ;;  %4894 = vmatpush1.bf16.msra.mxu0 %v7417_v27  ;;  %v7440_v27 = vld [vmem:[%s8035_s21 + $0xf4] ss:$24 sps:$4 sm:$0xff]  }
 0x120   : > { %3548 = vmatprep.subr.bf16.mxu1 %v7425_v28  ;;  %4895 = vmatprep.subr.bf16.mxu0 %v7428_v29  ;;  %v7468_v28 = vld [vmem:[%s10435_s1 + $0x2f0] ss:$8 sps:$4 sm:$0xff]  }
 0x121   : > { %v8666_v41 = vpop.f32.mrf.mxu0  ;;  %v8668_v42 = vpop.f32.mrf.mxu1 }
 0x123   : > { %v8674_v45 = vpop.f32.mrf.mxu0  ;;  %v8676_v46 = vpop.f32.mrf.mxu1  ;;  %3549 = vmatpush1.bf16.msra.mxu1 %v7423_v33  ;;  %4896 = vmatpush1.bf16.msra.mxu0 %v7426_v34  ;;  %v7471_v33 = vld [vmem:[%s10435_s1 + $0x6f0] ss:$8 sps:$4 sm:$0xff]   ;;  %v7479_v34 = vld [vmem:[%s10435_s1 + $0x2e4] ss:$8 sps:$4 sm:$0xff]  }
 0x124   : > { %3550 = vmatprep.subr.bf16.mxu1 %v7434_v39  ;;  %4897 = vmatprep.subr.bf16.mxu0 %v7437_v40  ;;  %v7820_v40 = vld [vmem:[%s8035_s21 + $0xc8] ss:$24 sps:$4 sm:$0xff]  }
 0x125   : > { %v8687_v50 = vpop.f32.mrf.mxu0  ;;  %v8689_v51 = vpop.f32.mrf.mxu1  ;;  %3209 = vmatmul.mubr.bf16.gmra.mxu1 %v7413_v38  ;;  %3402 = vmatmul.mubr.bf16.gmra.mxu0 %v7816_v52  ;;  %v7438_v52 = vld [vmem:[%s8035_s21 + $0xf0] ss:$24 sps:$4 sm:$0xff]  }
 0x126   : > { %3218 = vmatprep.mubr.bf16.mxu1 %v7420_v43  ;;  %3411 = vmatprep.mubr.bf16.mxu0 %v7817_v55  ;;  %v7477_v43 = vld [vmem:[%s10435_s1 + $0x2e0] ss:$8 sps:$4 sm:$0xff]  }
 0x127   : > { %v8699_v56 = vpop.f32.mrf.mxu0  ;;  %v8701_v57 = vpop.f32.mrf.mxu1  ;;  %3551 = vmatpush1.bf16.msra.mxu1 %v7432_v44  ;;  %4898 = vmatpush1.bf16.msra.mxu0 %v7435_v47  ;;  %v7480_v44 = vld [vmem:[%s10435_s1 + $0x6e0] ss:$8 sps:$4 sm:$0xff]   ;;  %v7821_v47 = vld [vmem:[%s8035_s21 + $0xfc] ss:$24 sps:$4 sm:$0xff]  }
 0x128   : > { %3552 = vmatprep.subr.bf16.mxu1 %v7443_v48  ;;  %4899 = vmatprep.subr.bf16.mxu0 %v7446_v49 }
 0x129   : > { %v8710_v61 = vpop.f32.mrf.mxu0  ;;  %v8712_v62 = vpop.f32.mrf.mxu1 }
 0x12b   : > { %v8718_v1 = vpop.f32.mrf.mxu0  ;;  %v8720_v2 = vpop.f32.mrf.mxu1  ;;  %3553 = vmatpush1.bf16.msra.mxu1 %v7441_v53  ;;  %4900 = vmatpush1.bf16.msra.mxu0 %v7444_v54  ;;  %v7488_v53 = vld [vmem:[%s10435_s1 + $0x2d4] ss:$8 sps:$4 sm:$0xff]  }
 0x12c   : > { %3554 = vmatprep.subr.bf16.mxu1 %v7452_v59  ;;  %4901 = vmatprep.subr.bf16.mxu0 %v7455_v60  ;;  %v7491_v54 = vld [vmem:[%s10435_s1 + $0x6d4] ss:$8 sps:$4 sm:$0xff]   ;;  %v7486_v60 = vld [vmem:[%s10435_s1 + $0x2d0] ss:$8 sps:$4 sm:$0xff]  }
 0x12d   : > { %v8731_v6 = vpop.f32.mrf.mxu0  ;;  %v8733_v7 = vpop.f32.mrf.mxu1  ;;  %3219 = vmatmul.mubr.bf16.gmra.mxu1 %v7422_v58  ;;  %3412 = vmatmul.mubr.bf16.gmra.mxu0 %v7818_v8  ;;  %v7449_v59 = vld [vmem:[%s8035_s21 + $0x124] ss:$24 sps:$4 sm:$0xff]  }
 0x12e   : > { %3228 = vmatprep.mubr.bf16.mxu1 %v7431_v63  ;;  %3421 = vmatprep.mubr.bf16.mxu0 %v7819_v11  ;;  %v7498_v11 = vld [vmem:[%s10435_s1 + $0x2c0] ss:$8 sps:$4 sm:$0xff]  }
 0x12f   : > { %v8743_v12 = vpop.f32.mrf.mxu0  ;;  %v8745_v15 = vpop.f32.mrf.mxu1  ;;  %3555 = vmatpush1.bf16.msra.mxu1 %v7450_v0  ;;  %4902 = vmatpush1.bf16.msra.mxu0 %v7453_v3  ;;  %v7489_v3 = vld [vmem:[%s10435_s1 + $0x6d0] ss:$8 sps:$4 sm:$0xff]  }
 0x130   : > { %3556 = vmatprep.subr.bf16.mxu1 %v7461_v4  ;;  %4903 = vmatprep.subr.bf16.mxu0 %v7464_v5  ;;  %v7500_v4 = vld [vmem:[%s10435_s1 + $0x2c4] ss:$8 sps:$4 sm:$0xff]  }
 0x131   : > { %v8754_v23 = vpop.f32.mrf.mxu0  ;;  %v8756_v24 = vpop.f32.mrf.mxu1  ;;  %v7503_v5 = vld [vmem:[%s10435_s1 + $0x6c4] ss:$8 sps:$4 sm:$0xff]  }
 0x133   : > { %v8762_v29 = vpop.f32.mrf.mxu0  ;;  %v8764_v32 = vpop.f32.mrf.mxu1  ;;  %3557 = vmatpush1.bf16.msra.mxu1 %v7459_v9  ;;  %4904 = vmatpush1.bf16.msra.mxu0 %v7462_v10  ;;  %v7822_v10 = vld [vmem:[%s8035_s21 + $0xf8] ss:$24 sps:$4 sm:$0xff]  }
 0x134   : > { %3558 = vmatprep.subr.bf16.mxu1 %v7470_v19  ;;  %4905 = vmatprep.subr.bf16.mxu0 %v7473_v20  ;;  %v7823_v19 = vld [vmem:[%s8035_s21 + $0x12c] ss:$24 sps:$4 sm:$0xff]  }
 0x135   : > { %v8775_v38 = vpop.f32.mrf.mxu0  ;;  %v8777_v39 = vpop.f32.mrf.mxu1  ;;  %3229 = vmatmul.mubr.bf16.gmra.mxu1 %v7429_v16  ;;  %3422 = vmatmul.mubr.bf16.gmra.mxu0 %v7820_v40  ;;  %v7501_v16 = vld [vmem:[%s10435_s1 + $0x6c0] ss:$8 sps:$4 sm:$0xff]  }
 0x136   : > { %10444 = vst [vmem:[#allocation5_spill] sm:$0xff] %v8777_v39  ;;  %3238 = vmatprep.mubr.bf16.mxu1 %v7440_v27  ;;  %3431 = vmatprep.mubr.bf16.mxu0 %v7821_v47 }
 0x137   : > { %v8787_v48 = vpop.f32.mrf.mxu0  ;;  %v8789_v49 = vpop.f32.mrf.mxu1  ;;  %3559 = vmatpush2.bf16.msra.mxu1 %v7468_v28  ;;  %4906 = vmatpush2.bf16.msra.mxu0 %v7471_v33  ;;  %v7447_v28 = vld [vmem:[%s8035_s21 + $0x120] ss:$24 sps:$4 sm:$0xff]   ;;  %v7512_v33 = vld [vmem:[%s10435_s1 + $0x2b4] ss:$8 sps:$4 sm:$0xff]  }
 0x138   : > { %10445 = vst [vmem:[#allocation6_spill] sm:$0xff] %v8789_v49  ;;  %3560 = vmatprep.subr.bf16.mxu1 %v7479_v34  ;;  %4907 = vmatprep.subr.bf16.mxu0 %v7482_v35  ;;  %v7515_v34 = vld [vmem:[%s10435_s1 + $0x6b4] ss:$8 sps:$4 sm:$0xff]  }
 0x139   : > { %v8798_v55 = vpop.f32.mrf.mxu0  ;;  %v8800_v58 = vpop.f32.mrf.mxu1  ;;  %v7485_v49 = vld [vmem:[%s8035_s21 + $0x1e4] ss:$24 sps:$4 sm:$0xff]  }
 0x13a   : > { %10446 = vst [vmem:[#allocation7_spill] sm:$0xff] %v8800_v58 }
 0x13b   : > { %v8806_v63 = vpop.f32.mrf.mxu0  ;;  %v8808_v0 = vpop.f32.mrf.mxu1  ;;  %3561 = vmatpush2.bf16.msra.mxu1 %v7477_v43  ;;  %4908 = vmatpush2.bf16.msra.mxu0 %v7480_v44  ;;  %v7458_v43 = vld [vmem:[%s8035_s21 + $0x154] ss:$24 sps:$4 sm:$0xff]   ;;  %v7510_v44 = vld [vmem:[%s10435_s1 + $0x2b0] ss:$8 sps:$4 sm:$0xff]  }
 0x13c   : > { %10447 = vst [vmem:[#allocation8_spill] sm:$0xff] %v8808_v0  ;;  %3562 = vmatprep.subr.bf16.mxu1 %v7488_v53  ;;  %4909 = vmatprep.subr.bf16.mxu0 %v7491_v54  ;;  %v7513_v53 = vld [vmem:[%s10435_s1 + $0x6b0] ss:$8 sps:$4 sm:$0xff]   ;;  %v7524_v54 = vld [vmem:[%s10435_s1 + $0x2a4] ss:$8 sps:$4 sm:$0xff]  }
 0x13d   : > { %v8819_v8 = vpop.f32.mrf.mxu0  ;;  %v8821_v9 = vpop.f32.mrf.mxu1  ;;  %3239 = vmatmul.mubr.bf16.gmra.mxu1 %v7438_v52  ;;  %3432 = vmatmul.mubr.bf16.gmra.mxu0 %v7822_v10  ;;  %v7525_v10 = vld [vmem:[%s10435_s1 + $0x6a0] ss:$8 sps:$4 sm:$0xff]  }
 0x13e   : > { %10448 = vst [vmem:[#allocation9_spill] sm:$0xff] %v8821_v9  ;;  %3248 = vmatprep.mubr.bf16.mxu1 %v7449_v59  ;;  %3441 = vmatprep.mubr.bf16.mxu0 %v7823_v19  ;;  %v7527_v59 = vld [vmem:[%s10435_s1 + $0x6a4] ss:$8 sps:$4 sm:$0xff]  }
 0x13f   : > { %v8831_v20 = vpop.f32.mrf.mxu0  ;;  %v8833_v27 = vpop.f32.mrf.mxu1  ;;  %3563 = vmatpush2.bf16.msra.mxu1 %v7486_v60  ;;  %4910 = vmatpush2.bf16.msra.mxu0 %v7489_v3 }
 0x140   : > { %10449 = vst [vmem:[#allocation10_spill] sm:$0xff] %v8833_v27  ;;  %3564 = vmatprep.subr.bf16.mxu1 %v7500_v4  ;;  %4911 = vmatprep.subr.bf16.mxu0 %v7503_v5  ;;  %v7824_v4 = vld [vmem:[%s8035_s21 + $0x128] ss:$24 sps:$4 sm:$0xff]  }
 0x141   : > { %v8842_v35 = vpop.f32.mrf.mxu0  ;;  %v8844_v40 = vpop.f32.mrf.mxu1  ;;  %v7522_v5 = vld [vmem:[%s10435_s1 + $0x2a0] ss:$8 sps:$4 sm:$0xff]  }
 0x142   : > { %10450 = vst [vmem:[#allocation11_spill] sm:$0xff] %v8844_v40  ;;  %v7827_v40 = vld [vmem:[%s8035_s21 + $0x18c] ss:$24 sps:$4 sm:$0xff]  }
 0x143   : > { %v8850_v47 = vpop.f32.mrf.mxu0  ;;  %v8852_v52 = vpop.f32.mrf.mxu1  ;;  %3565 = vmatpush2.bf16.msra.mxu1 %v7498_v11  ;;  %4912 = vmatpush2.bf16.msra.mxu0 %v7501_v16  ;;  %v7825_v11 = vld [vmem:[%s8035_s21 + $0x15c] ss:$24 sps:$4 sm:$0xff]  }
 0x144   : > { %10451 = vst [vmem:[#allocation12_spill] sm:$0xff] %v8852_v52  ;;  %3566 = vmatprep.subr.bf16.mxu1 %v7512_v33  ;;  %4913 = vmatprep.subr.bf16.mxu0 %v7515_v34  ;;  %v7456_v33 = vld [vmem:[%s8035_s21 + $0x150] ss:$24 sps:$4 sm:$0xff]   ;;  %v7539_v34 = vld [vmem:[%s10435_s1 + $0x694] ss:$8 sps:$4 sm:$0xff]  }
 0x145   : > { %v8863_v60 = vpop.f32.mrf.mxu0  ;;  %v8865_v3 = vpop.f32.mrf.mxu1  ;;  %3249 = vmatmul.mubr.bf16.gmra.mxu1 %v7447_v28  ;;  %3442 = vmatmul.mubr.bf16.gmra.mxu0 %v7824_v4  ;;  %v7536_v28 = vld [vmem:[%s10435_s1 + $0x294] ss:$8 sps:$4 sm:$0xff]   ;;  %v7549_v52 = vld [vmem:[%s10435_s1 + $0x680] ss:$8 sps:$4 sm:$0xff]  }
 0x146   : > { %10452 = vst [vmem:[#allocation13_spill] sm:$0xff] %v8865_v3  ;;  %3258 = vmatprep.mubr.bf16.mxu1 %v7458_v43  ;;  %3451 = vmatprep.mubr.bf16.mxu0 %v7825_v11  ;;  %v7467_v11 = vld [vmem:[%s8035_s21 + $0x184] ss:$24 sps:$4 sm:$0xff]  }
 0x147   : > { %v8875_v16 = vpop.f32.mrf.mxu0  ;;  %v8877_v19 = vpop.f32.mrf.mxu1  ;;  %3567 = vmatpush2.bf16.msra.mxu1 %v7510_v44  ;;  %4914 = vmatpush2.bf16.msra.mxu0 %v7513_v53  ;;  %v7534_v44 = vld [vmem:[%s10435_s1 + $0x290] ss:$8 sps:$4 sm:$0xff]  }
 0x148   : > { %10453 = vst [vmem:[#allocation14_spill] sm:$0xff] %v8877_v19  ;;  %3568 = vmatprep.subr.bf16.mxu1 %v7524_v54  ;;  %4915 = vmatprep.subr.bf16.mxu0 %v7527_v59  ;;  %v7537_v59 = vld [vmem:[%s10435_s1 + $0x690] ss:$8 sps:$4 sm:$0xff]   ;;  %v7551_v19 = vld [vmem:[%s10435_s1 + $0x684] ss:$8 sps:$4 sm:$0xff]  }
 0x149   : > { %v8886_v43 = vpop.f32.mrf.mxu0  ;;  %v8888_v4 = vpop.f32.mrf.mxu1 }
 0x14a   : > { %10454 = vst [vmem:[#allocation15_spill] sm:$0xff] %v8888_v4  ;;  %v7548_v4 = vld [vmem:[%s10435_s1 + $0x284] ss:$8 sps:$4 sm:$0xff]  }
 0x14b   : > { %v8894_v53 = vpop.f32.mrf.mxu0  ;;  %v8896_v54 = vpop.f32.mrf.mxu1  ;;  %3569 = vmatpush2.bf16.msra.mxu1 %v7522_v5  ;;  %4916 = vmatpush2.bf16.msra.mxu0 %v7525_v10  ;;  %v7826_v5 = vld [vmem:[%s8035_s21 + $0x158] ss:$24 sps:$4 sm:$0xff]   ;;  %v7546_v10 = vld [vmem:[%s10435_s1 + $0x280] ss:$8 sps:$4 sm:$0xff]  }
 0x14c   : > { %10455 = vst [vmem:[#allocation16_spill] sm:$0xff] %v8896_v54  ;;  %3570 = vmatprep.subr.bf16.mxu1 %v7536_v28  ;;  %4917 = vmatprep.subr.bf16.mxu0 %v7539_v34 }
 0x14d   : > { %v8907_v3 = vpop.f32.mrf.mxu0  ;;  %v8909_v54 = vpop.f32.mrf.mxu1  ;;  %3259 = vmatmul.mubr.bf16.gmra.mxu1 %v7456_v33  ;;  %3452 = vmatmul.mubr.bf16.gmra.mxu0 %v7826_v5  ;;  %v7560_v33 = vld [vmem:[%s10435_s1 + $0x774] ss:$8 sps:$4 sm:$0xff]  }
 0x14e   : > { %10456 = vst [vmem:[#allocation17_spill] sm:$0xff] %v8909_v54  ;;  %3268 = vmatprep.mubr.bf16.mxu1 %v7467_v11  ;;  %3461 = vmatprep.mubr.bf16.mxu0 %v7827_v40  ;;  %v7465_v54 = vld [vmem:[%s8035_s21 + $0x180] ss:$24 sps:$4 sm:$0xff]   ;;  %v7563_v11 = vld [vmem:[%s10435_s1 + $0x874] ss:$8 sps:$4 sm:$0xff]  }
 0x14f   : > { %v8919_v28 = vpop.f32.mrf.mxu0  ;;  %v8921_v34 = vpop.f32.mrf.mxu1  ;;  %3571 = vmatpush2.bf16.msra.mxu1 %v7534_v44  ;;  %4918 = vmatpush2.bf16.msra.mxu0 %v7537_v59  ;;  %v7828_v59 = vld [vmem:[%s8035_s21 + $0x188] ss:$24 sps:$4 sm:$0xff]  }
 0x150   : > { %10457 = vst [vmem:[#allocation18_spill] sm:$0xff] %v8921_v34  ;;  %3572 = vmatprep.subr.bf16.mxu1 %v7548_v4  ;;  %4919 = vmatprep.subr.bf16.mxu0 %v7551_v19  ;;  %v7476_v34 = vld [vmem:[%s8035_s21 + $0x1b4] ss:$24 sps:$4 sm:$0xff]  }
 0x151   : > { %v8930_v5 = vpop.f32.mrf.mxu0  ;;  %v8932_v40 = vpop.f32.mrf.mxu1 }
 0x152   : > { %10458 = vst [vmem:[#allocation19_spill] sm:$0xff] %v8932_v40  ;;  %v7829_v40 = vld [vmem:[%s8035_s21 + $0x1bc] ss:$24 sps:$4 sm:$0xff]  }
 0x153   : > { %v8935_v27 = vpop.f32.mrf.mxu0  ;;  %v8937_v44 = vpop.f32.mrf.mxu1  ;;  %3573 = vmatpush2.bf16.msra.mxu1 %v7546_v10  ;;  %4920 = vmatpush2.bf16.msra.mxu0 %v7549_v52 }
 0x154   : > { %10459 = vst [vmem:[#allocation20_spill] sm:$0xff] %v8937_v44  ;;  %5082 = vmatprep.subr.bf16.mxu1 %v7560_v33  ;;  %5275 = vmatprep.subr.bf16.mxu0 %v7563_v11  ;;  %v7474_v11 = vld [vmem:[%s8035_s21 + $0x1b0] ss:$24 sps:$4 sm:$0xff]  }
 0x155   : > { %v1844_v19 = vpop.f32.mrf.mxu1  ;;  %v2037_v4 = vpop.f32.mrf.mxu0  ;;  %3269 = vmatmul.mubr.bf16.gmra.mxu1 %v7465_v54  ;;  %3462 = vmatmul.mubr.bf16.gmra.mxu0 %v7828_v59 }
 0x156   : > { %v1845_v9 = vadd.f32 %v1844_v19, %v8606_v13  ;;  %3278 = vmatprep.mubr.bf16.mxu1 %v7476_v34  ;;  %3471 = vmatprep.mubr.bf16.mxu0 %v7829_v40 }
 0x157   : > { %v1846_v0 = vpop.f32.mrf.mxu1  ;;  %v2039_v58 = vpop.f32.mrf.mxu0 }
 0x158   : > { %v8942_v44 = vadd.f32 %v2037_v4, %v1845_v9  ;;  %v1847_v52 = vadd.f32 %v1846_v0, %v8616_v17  ;;  %v7830_v17 = vld [vmem:[%s8035_s21 + $0x1b8] ss:$24 sps:$4 sm:$0xff]  }
 0x159   : > { %v1848_v10 = vpop.f32.mrf.mxu1  ;;  %v2041_v33 = vpop.f32.mrf.mxu0 }
 0x15a   : > { %v8946_v54 = vadd.f32 %v2039_v58, %v1847_v52  ;;  %v1849_v59 = vadd.f32 %v1848_v10, %v8622_v21  ;;  %v7831_v21 = vld [vmem:[%s8035_s21 + $0x1ec] ss:$24 sps:$4 sm:$0xff]  }
 0x15b   : > { %v1850_v13 = vpop.f32.mrf.mxu1  ;;  %v2043_v34 = vpop.f32.mrf.mxu0 }
 0x15c   : > { %v8950_v19 = vadd.f32 %v2041_v33, %v1849_v59  ;;  %v1851_v40 = vadd.f32 %v1850_v13, %v8630_v25  ;;  %v7483_v59 = vld [vmem:[%s8035_s21 + $0x1e0] ss:$24 sps:$4 sm:$0xff]  }
 0x15d   : > { %v1854_v39 = vpop.f32.mrf.mxu1  ;;  %v2047_v9 = vpop.f32.mrf.mxu0  ;;  %3279 = vmatmul.mubr.bf16.gmra.mxu1 %v7474_v11  ;;  %3472 = vmatmul.mubr.bf16.gmra.mxu0 %v7830_v17  ;;  %v7497_v17 = vld [vmem:[%s8035_s21 + $0x21c] ss:$24 sps:$4 sm:$0xff]  }
 0x15e   : > { %v8954_v0 = vadd.f32 %v2043_v34, %v1851_v40  ;;  %v1855_v58 = vadd.f32 %v1854_v39, %v8643_v30  ;;  %3288 = vmatprep.mubr.bf16.mxu1 %v7485_v49  ;;  %3481 = vmatprep.mubr.bf16.mxu0 %v7831_v21  ;;  %v7494_v40 = vld [vmem:[%s8035_s21 + $0x214] ss:$24 sps:$4 sm:$0xff]  }
 0x15f   : > { %v1856_v4 = vpop.f32.mrf.mxu1  ;;  %v2049_v52 = vpop.f32.mrf.mxu0 }
 0x160   : > { %v8958_v10 = vadd.f32 %v2047_v9, %v1855_v58  ;;  %v1857_v25 = vadd.f32 %v1856_v4, %v8655_v36  ;;  %v7832_v36 = vld [vmem:[%s8035_s21 + $0x1e8] ss:$24 sps:$4 sm:$0xff]  }
 0x161   : > { %v1858_v33 = vpop.f32.mrf.mxu1  ;;  %v2051_v11 = vpop.f32.mrf.mxu0 }
 0x162   : > { %v8962_v13 = vadd.f32 %v2049_v52, %v1857_v25  ;;  %v1859_v34 = vadd.f32 %v1858_v33, %v8666_v41 }
 0x163   : > { %v1860_v30 = vpop.f32.mrf.mxu1  ;;  %v2053_v39 = vpop.f32.mrf.mxu0 }
 0x164   : > { %v8967_v49 = vadd.f32 %v2051_v11, %v1859_v34  ;;  %v1861_v21 = vadd.f32 %v1860_v30, %v8674_v45  ;;  %v7492_v30 = vld [vmem:[%s8035_s21 + $0x210] ss:$24 sps:$4 sm:$0xff]  }
 0x165   : > { %v1864_v9 = vpop.f32.mrf.mxu1  ;;  %v2057_v58 = vpop.f32.mrf.mxu0  ;;  %3289 = vmatmul.mubr.bf16.gmra.mxu1 %v7483_v59  ;;  %3482 = vmatmul.mubr.bf16.gmra.mxu0 %v7832_v36  ;;  %v7495_v59 = vld [vmem:[%s8035_s21 + $0x218] ss:$24 sps:$4 sm:$0xff]  }
 0x166   : > { %10460 = vst [vmem:[#allocation21_spill] sm:$0xff] %v8967_v49  ;;  %v8971_v4 = vadd.f32 %v2053_v39, %v1861_v21  ;;  %v1865_v41 = vadd.f32 %v1864_v9, %v8687_v50  ;;  %3298 = vmatprep.mubr.bf16.mxu1 %v7494_v40  ;;  %3491 = vmatprep.mubr.bf16.mxu0 %v7497_v17  ;;  %v7506_v39 = vld [vmem:[%s8035_s21 + $0x244] ss:$24 sps:$4 sm:$0xff]  }
 0x167   : > { %v1866_v52 = vpop.f32.mrf.mxu1  ;;  %v2059_v25 = vpop.f32.mrf.mxu0  ;;  %v7509_v21 = vld [vmem:[%s8035_s21 + $0x24c] ss:$24 sps:$4 sm:$0xff]  }
 0x168   : > { %10461 = vst [vmem:[#allocation22_spill] sm:$0xff] %v8971_v4  ;;  %v8974_v33 = vadd.f32 %v2057_v58, %v1865_v41  ;;  %v1867_v45 = vadd.f32 %v1866_v52, %v8699_v56 }
 0x169   : > { %v1868_v11 = vpop.f32.mrf.mxu1  ;;  %v2061_v34 = vpop.f32.mrf.mxu0 }
 0x16a   : > { %v8979_v49 = vadd.f32 %v2059_v25, %v1867_v45  ;;  %v1869_v36 = vadd.f32 %v1868_v11, %v8710_v61  ;;  %v7504_v11 = vld [vmem:[%s8035_s21 + $0x240] ss:$24 sps:$4 sm:$0xff]  }
 0x16b   : > { %v1870_v4 = vpop.f32.mrf.mxu1  ;;  %v2063_v50 = vpop.f32.mrf.mxu0 }
 0x16c   : > { %v8984_v40 = vadd.f32 %v2061_v34, %v1869_v36  ;;  %v1871_v17 = vadd.f32 %v1870_v4, %v8718_v1  ;;  %v7507_v34 = vld [vmem:[%s8035_s21 + $0x248] ss:$24 sps:$4 sm:$0xff]   ;;  %v7518_v36 = vld [vmem:[%s8035_s21 + $0x274] ss:$24 sps:$4 sm:$0xff]  }
 0x16d   : > { %v1874_v9 = vpop.f32.mrf.mxu1  ;;  %v2067_v56 = vpop.f32.mrf.mxu0  ;;  %3299 = vmatmul.mubr.bf16.gmra.mxu1 %v7492_v30  ;;  %3492 = vmatmul.mubr.bf16.gmra.mxu0 %v7495_v59 }
 0x16e   : > { %v8987_v58 = vadd.f32 %v2063_v50, %v1871_v17  ;;  %v1875_v61 = vadd.f32 %v1874_v9, %v8731_v6  ;;  %3308 = vmatprep.mubr.bf16.mxu1 %v7506_v39  ;;  %3501 = vmatprep.mubr.bf16.mxu0 %v7509_v21  ;;  %v7521_v50 = vld [vmem:[%s8035_s21 + $0x27c] ss:$24 sps:$4 sm:$0xff]  }
 0x16f   : > { %v1876_v41 = vpop.f32.mrf.mxu1  ;;  %v2069_v52 = vpop.f32.mrf.mxu0 }
 0x170   : > { %v8990_v25 = vadd.f32 %v2067_v56, %v1875_v61  ;;  %v1877_v45 = vadd.f32 %v1876_v41, %v8743_v12 }
 0x171   : > { %v1878_v1 = vpop.f32.mrf.mxu1  ;;  %v2071_v4 = vpop.f32.mrf.mxu0 }
 0x172   : > { %v8995_v30 = vadd.f32 %v2069_v52, %v1877_v45  ;;  %v1879_v59 = vadd.f32 %v1878_v1, %v8754_v23 }
 0x173   : > { %v1880_v17 = vpop.f32.mrf.mxu1  ;;  %v2073_v6 = vpop.f32.mrf.mxu0 }
 0x174   : > { %v9000_v39 = vadd.f32 %v2071_v4, %v1879_v59  ;;  %v1881_v21 = vadd.f32 %v1880_v17, %v8762_v29  ;;  %v7516_v4 = vld [vmem:[%s8035_s21 + $0x270] ss:$24 sps:$4 sm:$0xff]   ;;  %v7530_v17 = vld [vmem:[%s8035_s21 + $0x2a4] ss:$24 sps:$4 sm:$0xff]  }
 0x175   : > { %v1884_v9 = vpop.f32.mrf.mxu1  ;;  %v2077_v12 = vpop.f32.mrf.mxu0  ;;  %3309 = vmatmul.mubr.bf16.gmra.mxu1 %v7504_v11  ;;  %3502 = vmatmul.mubr.bf16.gmra.mxu0 %v7507_v34  ;;  %v7519_v59 = vld [vmem:[%s8035_s21 + $0x278] ss:$24 sps:$4 sm:$0xff]  }
 0x176   : > { %v9003_v56 = vadd.f32 %v2073_v6, %v1881_v21  ;;  %v1885_v23 = vadd.f32 %v1884_v9, %v8775_v38  ;;  %3318 = vmatprep.mubr.bf16.mxu1 %v7518_v36  ;;  %3511 = vmatprep.mubr.bf16.mxu0 %v7521_v50  ;;  %v7533_v6 = vld [vmem:[%s8035_s21 + $0x2ac] ss:$24 sps:$4 sm:$0xff]  }
 0x177   : > { %v1886_v61 = vpop.f32.mrf.mxu1  ;;  %v2079_v41 = vpop.f32.mrf.mxu0 }
 0x178   : > { %v9006_v52 = vadd.f32 %v2077_v12, %v1885_v23  ;;  %v1887_v45 = vadd.f32 %v1886_v61, %v8787_v48 }
 0x179   : > { %v1888_v29 = vpop.f32.mrf.mxu1  ;;  %v2081_v1 = vpop.f32.mrf.mxu0 }
 0x17a   : > { %v9011_v11 = vadd.f32 %v2079_v41, %v1887_v45  ;;  %v1889_v34 = vadd.f32 %v1888_v29, %v8798_v55 }
 0x17b   : > { %v1890_v21 = vpop.f32.mrf.mxu1  ;;  %v2083_v38 = vpop.f32.mrf.mxu0 }
 0x17c   : > { %v9016_v36 = vadd.f32 %v2081_v1, %v1889_v34  ;;  %v1891_v50 = vadd.f32 %v1890_v21, %v8806_v63  ;;  %v7528_v1 = vld [vmem:[%s8035_s21 + $0x2a0] ss:$24 sps:$4 sm:$0xff]   ;;  %v7542_v21 = vld [vmem:[%s8035_s21 + $0x2d4] ss:$24 sps:$4 sm:$0xff]  }
 0x17d   : > { %v1894_v9 = vpop.f32.mrf.mxu1  ;;  %v2087_v48 = vpop.f32.mrf.mxu0  ;;  %3319 = vmatmul.mubr.bf16.gmra.mxu1 %v7516_v4  ;;  %3512 = vmatmul.mubr.bf16.gmra.mxu0 %v7519_v59  ;;  %v7531_v34 = vld [vmem:[%s8035_s21 + $0x2a8] ss:$24 sps:$4 sm:$0xff]  }
 0x17e   : > { %v9019_v12 = vadd.f32 %v2083_v38, %v1891_v50  ;;  %v1895_v55 = vadd.f32 %v1894_v9, %v8819_v8  ;;  %3328 = vmatprep.mubr.bf16.mxu1 %v7530_v17  ;;  %3521 = vmatprep.mubr.bf16.mxu0 %v7533_v6  ;;  %v7545_v38 = vld [vmem:[%s8035_s21 + $0x2dc] ss:$24 sps:$4 sm:$0xff]  }
 0x17f   : > { %v1896_v23 = vpop.f32.mrf.mxu1  ;;  %v2089_v61 = vpop.f32.mrf.mxu0 }
 0x180   : > { %v9022_v41 = vadd.f32 %v2087_v48, %v1895_v55  ;;  %v1897_v45 = vadd.f32 %v1896_v23, %v8831_v20 }
 0x181   : > { %v1898_v63 = vpop.f32.mrf.mxu1  ;;  %v2091_v29 = vpop.f32.mrf.mxu0 }
 0x182   : > { %v9027_v4 = vadd.f32 %v2089_v61, %v1897_v45  ;;  %v1899_v59 = vadd.f32 %v1898_v63, %v8842_v35 }
 0x183   : > { %v1900_v50 = vpop.f32.mrf.mxu1  ;;  %v2093_v8 = vpop.f32.mrf.mxu0 }
 0x184   : > { %v9032_v17 = vadd.f32 %v2091_v29, %v1899_v59  ;;  %v1901_v6 = vadd.f32 %v1900_v50, %v8850_v47  ;;  %v7540_v29 = vld [vmem:[%s8035_s21 + $0x2d0] ss:$24 sps:$4 sm:$0xff]   ;;  %v7554_v50 = vld [vmem:[%s8035_s21 + $0x14] ss:$24 sps:$4 sm:$0xff]  }
 0x185   : > { %v1904_v9 = vpop.f32.mrf.mxu1  ;;  %v2097_v20 = vpop.f32.mrf.mxu0  ;;  %3329 = vmatmul.mubr.bf16.gmra.mxu1 %v7528_v1  ;;  %3522 = vmatmul.mubr.bf16.gmra.mxu0 %v7531_v34  ;;  %v7543_v59 = vld [vmem:[%s8035_s21 + $0x2d8] ss:$24 sps:$4 sm:$0xff]  }
 0x186   : > { %v9035_v48 = vadd.f32 %v2093_v8, %v1901_v6  ;;  %v1905_v35 = vadd.f32 %v1904_v9, %v8863_v60  ;;  %3338 = vmatprep.mubr.bf16.mxu1 %v7542_v21  ;;  %3531 = vmatprep.mubr.bf16.mxu0 %v7545_v38  ;;  %v7557_v8 = vld [vmem:[%s8035_s21 + $0x64] ss:$24 sps:$4 sm:$0xff]  }
 0x187   : > { %v1906_v55 = vpop.f32.mrf.mxu1  ;;  %v2099_v23 = vpop.f32.mrf.mxu0 }
 0x188   : > { %v9038_v61 = vadd.f32 %v2097_v20, %v1905_v35  ;;  %v1907_v45 = vadd.f32 %v1906_v55, %v8875_v16 }
 0x189   : > { %v1908_v47 = vpop.f32.mrf.mxu1  ;;  %v2101_v63 = vpop.f32.mrf.mxu0 }
 0x18a   : > { %v9043_v1 = vadd.f32 %v2099_v23, %v1907_v45  ;;  %v1909_v34 = vadd.f32 %v1908_v47, %v8886_v43 }
 0x18b   : > { %v1910_v6 = vpop.f32.mrf.mxu1  ;;  %v2103_v60 = vpop.f32.mrf.mxu0 }
 0x18c   : > { %v9048_v21 = vadd.f32 %v2101_v63, %v1909_v34  ;;  %v1911_v38 = vadd.f32 %v1910_v6, %v8894_v53  ;;  %v7552_v63 = vld [vmem:[%s8035_s21 + $0x10] ss:$24 sps:$4 sm:$0xff]   ;;  %v7555_v34 = vld [vmem:[%s8035_s21 + $0x60] ss:$24 sps:$4 sm:$0xff]  }
 0x18d   : > { %v1914_v9 = vpop.f32.mrf.mxu1  ;;  %v2107_v16 = vpop.f32.mrf.mxu0  ;;  %3339 = vmatmul.mubr.bf16.gmra.mxu1 %v7540_v29  ;;  %3532 = vmatmul.mubr.bf16.gmra.mxu0 %v7543_v59 }
 0x18e   : > { %v9051_v20 = vadd.f32 %v2103_v60, %v1911_v38  ;;  %v1915_v35 = vadd.f32 %v1914_v9, %v8907_v3  ;;  %3574 = vmatprep.mubr.bf16.mxu1 %v7554_v50  ;;  %4921 = vmatprep.mubr.bf16.mxu0 %v7557_v8  ;;  %v7558_v3 = vld [vmem:[%s10435_s1 + $0x770] ss:$8 sps:$4 sm:$0xff]   ;;  %v7566_v60 = vld [vmem:[%s8035_s21 + $0x44] ss:$24 sps:$4 sm:$0xff]  }
 0x18f   : > { %v1916_v43 = vpop.f32.mrf.mxu1  ;;  %v2109_v55 = vpop.f32.mrf.mxu0  ;;  %v7561_v50 = vld [vmem:[%s10435_s1 + $0x870] ss:$8 sps:$4 sm:$0xff]  }
 0x190   : > { %v9054_v23 = vadd.f32 %v2107_v16, %v1915_v35  ;;  %v1917_v45 = vadd.f32 %v1916_v43, %v8919_v28  ;;  %v7569_v28 = vld [vmem:[%s8035_s21 + $0x94] ss:$24 sps:$4 sm:$0xff]  }
 0x191   : > { %v1918_v53 = vpop.f32.mrf.mxu1  ;;  %v2111_v47 = vpop.f32.mrf.mxu0  ;;  %v7575_v16 = vld [vmem:[%s10435_s1 + $0x864] ss:$8 sps:$4 sm:$0xff]  }
 0x192   : > { %v9059_v29 = vadd.f32 %v2109_v55, %v1917_v45  ;;  %v1919_v59 = vadd.f32 %v1918_v53, %v8930_v5  ;;  %v7572_v5 = vld [vmem:[%s10435_s1 + $0x764] ss:$8 sps:$4 sm:$0xff]   ;;  %v7573_v53 = vld [vmem:[%s10435_s1 + $0x860] ss:$8 sps:$4 sm:$0xff]  }
 0x193   : > { %v1920_v8 = vpop.f32.mrf.mxu1  ;;  %v2113_v6 = vpop.f32.mrf.mxu0 }
 0x194   : > { %10462 = vst [vmem:[#allocation23_spill] sm:$0xff] %v9059_v29  ;;  %v9070_v38 = vadd.f32 %v2111_v47, %v1919_v59  ;;  %v1921_v9 = vadd.f32 %v1920_v8, %v8935_v27  ;;  %v7570_v27 = vld [vmem:[%s10435_s1 + $0x760] ss:$8 sps:$4 sm:$0xff]  }
 0x195   : > { %v1924_v35 = vpop.f32.mrf.mxu1  ;;  %v2117_v43 = vpop.f32.mrf.mxu0  ;;  %3575 = vmatmul.mubr.bf16.vlgmr.msra.gmra.mxu1 %v7552_v63  ;;  %4922 = vmatmul.mubr.bf16.vlgmr.msra.gmra.mxu0 %v7555_v34  ;;  %v7587_v63 = vld [vmem:[%s10435_s1 + $0x854] ss:$8 sps:$4 sm:$0xff]  }
 0x196   : > { %10463 = vst [vmem:[#allocation24_spill] sm:$0xff] %v9070_v38  ;;  %v9079_v55 = vadd.f32 %v2113_v6, %v1921_v9  ;;  %v1925_v45 = vadd.f32 %v1924_v35, %v8608_v14  ;;  %5083 = vmatpush1.bf16.msra.mxu1 %v7558_v3  ;;  %5276 = vmatpush1.bf16.msra.mxu0 %v7561_v50  ;;  %v7584_v14 = vld [vmem:[%s10435_s1 + $0x754] ss:$8 sps:$4 sm:$0xff]   ;;  %v7564_v6 = vld [vmem:[%s8035_s21 + $0x40] ss:$24 sps:$4 sm:$0xff]  }
 0x197   : > { %v1926_v47 = vpop.f32.mrf.mxu1  ;;  %v2119_v59 = vpop.f32.mrf.mxu0  ;;  %3584 = vmatprep.mubr.bf16.mxu1 %v7566_v60  ;;  %4931 = vmatprep.mubr.bf16.mxu0 %v7569_v28  ;;  %v7567_v60 = vld [vmem:[%s8035_s21 + $0x90] ss:$24 sps:$4 sm:$0xff]   ;;  %v7578_v35 = vld [vmem:[%s8035_s21 + $0x74] ss:$24 sps:$4 sm:$0xff]  }
 0x198   : > { %10464 = vst [vmem:[#allocation25_spill] sm:$0xff] %v9079_v55  ;;  %v9094_v34 = vadd.f32 %v2117_v43, %v1925_v45  ;;  %v1927_v3 = vadd.f32 %v1926_v47, %v8618_v18  ;;  %5084 = vmatprep.subr.bf16.mxu1 %v7572_v5  ;;  %5277 = vmatprep.subr.bf16.mxu0 %v7575_v16  ;;  %v7581_v55 = vld [vmem:[%s8035_s21 + $0xc4] ss:$24 sps:$4 sm:$0xff]   ;;  %v7582_v18 = vld [vmem:[%s10435_s1 + $0x750] ss:$8 sps:$4 sm:$0xff]  }
 0x199   : > { %v1928_v50 = vpop.f32.mrf.mxu1  ;;  %v2121_v8 = vpop.f32.mrf.mxu0  ;;  %v7585_v5 = vld [vmem:[%s10435_s1 + $0x850] ss:$8 sps:$4 sm:$0xff]   ;;  %v7596_v43 = vld [vmem:[%s10435_s1 + $0x744] ss:$8 sps:$4 sm:$0xff]  }
 0x19a   : > { %v9099_v28 = vadd.f32 %v2119_v59, %v1927_v3  ;;  %v1929_v9 = vadd.f32 %v1928_v50, %v8624_v22  ;;  %5085 = vmatpush1.bf16.msra.mxu1 %v7570_v27  ;;  %5278 = vmatpush1.bf16.msra.mxu0 %v7573_v53  ;;  %v7599_v45 = vld [vmem:[%s10435_s1 + $0x844] ss:$8 sps:$4 sm:$0xff]   ;;  %v7611_v3 = vld [vmem:[%s10435_s1 + $0x834] ss:$8 sps:$4 sm:$0xff]  }
 0x19b   : > { %v1930_v38 = vpop.f32.mrf.mxu1  ;;  %v2123_v29 = vpop.f32.mrf.mxu0  ;;  %5086 = vmatprep.subr.bf16.mxu1 %v7584_v14  ;;  %5279 = vmatprep.subr.bf16.mxu0 %v7587_v63  ;;  %v7594_v14 = vld [vmem:[%s10435_s1 + $0x740] ss:$8 sps:$4 sm:$0xff]  }
 0x19c   : > { %v9110_v16 = vadd.f32 %v2121_v8, %v1929_v9  ;;  %v1931_v22 = vadd.f32 %v1930_v38, %v8632_v26 }
 0x19d   : > { %v1934_v27 = vpop.f32.mrf.mxu1  ;;  %v2127_v53 = vpop.f32.mrf.mxu0  ;;  %3585 = vmatmul.mubr.bf16.gmra.mxu1 %v7564_v6  ;;  %4932 = vmatmul.mubr.bf16.gmra.mxu0 %v7567_v60  ;;  %v7576_v6 = vld [vmem:[%s8035_s21 + $0x70] ss:$24 sps:$4 sm:$0xff]   ;;  %v7579_v60 = vld [vmem:[%s8035_s21 + $0xc0] ss:$24 sps:$4 sm:$0xff]  }
 0x19e   : > { %v9119_v47 = vadd.f32 %v2123_v29, %v1931_v22  ;;  %v1935_v59 = vadd.f32 %v1934_v27, %v8645_v31  ;;  %3594 = vmatprep.mubr.bf16.mxu1 %v7578_v35  ;;  %4941 = vmatprep.mubr.bf16.mxu0 %v7581_v55  ;;  %v7597_v29 = vld [vmem:[%s10435_s1 + $0x840] ss:$8 sps:$4 sm:$0xff]   ;;  %v7608_v55 = vld [vmem:[%s10435_s1 + $0x734] ss:$8 sps:$4 sm:$0xff]  }
 0x19f   : > { %v1936_v26 = vpop.f32.mrf.mxu1  ;;  %v2129_v38 = vpop.f32.mrf.mxu0  ;;  %5087 = vmatpush1.bf16.msra.mxu1 %v7582_v18  ;;  %5280 = vmatpush1.bf16.msra.mxu0 %v7585_v5  ;;  %v7590_v18 = vld [vmem:[%s8035_s21 + $0xa4] ss:$24 sps:$4 sm:$0xff]  }
 0x1a0   : > { %v9128_v63 = vadd.f32 %v2127_v53, %v1935_v59  ;;  %v1937_v31 = vadd.f32 %v1936_v26, %v8657_v37  ;;  %5088 = vmatprep.subr.bf16.mxu1 %v7596_v43  ;;  %5281 = vmatprep.subr.bf16.mxu0 %v7599_v45  ;;  %v7593_v37 = vld [vmem:[%s8035_s21 + $0xf4] ss:$24 sps:$4 sm:$0xff]   ;;  %v7606_v43 = vld [vmem:[%s10435_s1 + $0x730] ss:$8 sps:$4 sm:$0xff]  }
 0x1a1   : > { %v1938_v50 = vpop.f32.mrf.mxu1  ;;  %v2131_v8 = vpop.f32.mrf.mxu0  ;;  %v7609_v45 = vld [vmem:[%s10435_s1 + $0x830] ss:$8 sps:$4 sm:$0xff]   ;;  %v7623_v59 = vld [vmem:[%s10435_s1 + $0x824] ss:$8 sps:$4 sm:$0xff]  }
 0x1a2   : > { %v9139_v9 = vadd.f32 %v2129_v38, %v1937_v31  ;;  %v1939_v35 = vadd.f32 %v1938_v50, %v8668_v42  ;;  %v7620_v42 = vld [vmem:[%s10435_s1 + $0x724] ss:$8 sps:$4 sm:$0xff]  }
 0x1a3   : > { %v1940_v5 = vpop.f32.mrf.mxu1  ;;  %v2133_v22 = vpop.f32.mrf.mxu0  ;;  %5089 = vmatpush1.bf16.msra.mxu1 %v7594_v14  ;;  %5282 = vmatpush1.bf16.msra.mxu0 %v7597_v29 }
 0x1a4   : > { %v9150_v27 = vadd.f32 %v2131_v8, %v1939_v35  ;;  %v1941_v53 = vadd.f32 %v1940_v5, %v8676_v46  ;;  %5090 = vmatprep.subr.bf16.mxu1 %v7608_v55  ;;  %5283 = vmatprep.subr.bf16.mxu0 %v7611_v3  ;;  %v7618_v55 = vld [vmem:[%s10435_s1 + $0x720] ss:$8 sps:$4 sm:$0xff]   ;;  %v7632_v8 = vld [vmem:[%s10435_s1 + $0x714] ss:$8 sps:$4 sm:$0xff]  }
 0x1a5   : > { %v1944_v26 = vpop.f32.mrf.mxu1  ;;  %v2137_v38 = vpop.f32.mrf.mxu0  ;;  %3595 = vmatmul.mubr.bf16.gmra.mxu1 %v7576_v6  ;;  %4942 = vmatmul.mubr.bf16.gmra.mxu0 %v7579_v60  ;;  %v7621_v3 = vld [vmem:[%s10435_s1 + $0x820] ss:$8 sps:$4 sm:$0xff]   ;;  %v7635_v6 = vld [vmem:[%s10435_s1 + $0x814] ss:$8 sps:$4 sm:$0xff]  }
 0x1a6   : > { %v9159_v14 = vadd.f32 %v2133_v22, %v1941_v53  ;;  %v1945_v29 = vadd.f32 %v1944_v26, %v8689_v51  ;;  %3604 = vmatprep.mubr.bf16.mxu1 %v7590_v18  ;;  %4951 = vmatprep.mubr.bf16.mxu0 %v7593_v37  ;;  %v7588_v18 = vld [vmem:[%s8035_s21 + $0xa0] ss:$24 sps:$4 sm:$0xff]   ;;  %v7591_v37 = vld [vmem:[%s8035_s21 + $0xf0] ss:$24 sps:$4 sm:$0xff]  }
 0x1a7   : > { %v1946_v46 = vpop.f32.mrf.mxu1  ;;  %v2139_v31 = vpop.f32.mrf.mxu0  ;;  %5091 = vmatpush1.bf16.msra.mxu1 %v7606_v43  ;;  %5284 = vmatpush1.bf16.msra.mxu0 %v7609_v45  ;;  %v7602_v43 = vld [vmem:[%s8035_s21 + $0xd4] ss:$24 sps:$4 sm:$0xff]  }
 0x1a8   : > { %v9168_v50 = vadd.f32 %v2137_v38, %v1945_v29  ;;  %v1947_v51 = vadd.f32 %v1946_v46, %v8701_v57  ;;  %5092 = vmatprep.subr.bf16.mxu1 %v7620_v42  ;;  %5285 = vmatprep.subr.bf16.mxu0 %v7623_v59  ;;  %v7605_v57 = vld [vmem:[%s8035_s21 + $0x124] ss:$24 sps:$4 sm:$0xff]   ;;  %v7630_v42 = vld [vmem:[%s10435_s1 + $0x710] ss:$8 sps:$4 sm:$0xff]  }
 0x1a9   : > { %v1948_v60 = vpop.f32.mrf.mxu1  ;;  %v2141_v35 = vpop.f32.mrf.mxu0  ;;  %v7633_v59 = vld [vmem:[%s10435_s1 + $0x810] ss:$8 sps:$4 sm:$0xff]   ;;  %v7647_v29 = vld [vmem:[%s10435_s1 + $0x804] ss:$8 sps:$4 sm:$0xff]  }
 0x1aa   : > { %v9179_v5 = vadd.f32 %v2139_v31, %v1947_v51  ;;  %v1949_v22 = vadd.f32 %v1948_v60, %v8712_v62  ;;  %v7644_v62 = vld [vmem:[%s10435_s1 + $0x704] ss:$8 sps:$4 sm:$0xff]  }
 0x1ab   : > { %v1950_v45 = vpop.f32.mrf.mxu1  ;;  %v2143_v53 = vpop.f32.mrf.mxu0  ;;  %5093 = vmatpush1.bf16.msra.mxu1 %v7618_v55  ;;  %5286 = vmatpush1.bf16.msra.mxu0 %v7621_v3 }
 0x1ac   : > { %v9190_v26 = vadd.f32 %v2141_v35, %v1949_v22  ;;  %v1951_v38 = vadd.f32 %v1950_v45, %v8720_v2  ;;  %5094 = vmatprep.subr.bf16.mxu1 %v7632_v8  ;;  %5287 = vmatprep.subr.bf16.mxu0 %v7635_v6  ;;  %v7642_v8 = vld [vmem:[%s10435_s1 + $0x700] ss:$8 sps:$4 sm:$0xff]   ;;  %v7656_v35 = vld [vmem:[%s10435_s1 + $0x7f4] ss:$8 sps:$4 sm:$0xff]  }
 0x1ad   : > { %v1954_v46 = vpop.f32.mrf.mxu1  ;;  %v2147_v31 = vpop.f32.mrf.mxu0  ;;  %3605 = vmatmul.mubr.bf16.gmra.mxu1 %v7588_v18  ;;  %4952 = vmatmul.mubr.bf16.gmra.mxu0 %v7591_v37  ;;  %v7645_v6 = vld [vmem:[%s10435_s1 + $0x800] ss:$8 sps:$4 sm:$0xff]   ;;  %v7659_v18 = vld [vmem:[%s10435_s1 + $0x8f4] ss:$8 sps:$4 sm:$0xff]  }
 0x1ae   : > { %v9199_v55 = vadd.f32 %v2143_v53, %v1951_v38  ;;  %v1955_v3 = vadd.f32 %v1954_v46, %v8733_v7  ;;  %3614 = vmatprep.mubr.bf16.mxu1 %v7602_v43  ;;  %4961 = vmatprep.mubr.bf16.mxu0 %v7605_v57  ;;  %v7600_v43 = vld [vmem:[%s8035_s21 + $0xd0] ss:$24 sps:$4 sm:$0xff]   ;;  %v7603_v57 = vld [vmem:[%s8035_s21 + $0x120] ss:$24 sps:$4 sm:$0xff]  }
 0x1af   : > { %v1956_v2 = vpop.f32.mrf.mxu1  ;;  %v2149_v51 = vpop.f32.mrf.mxu0  ;;  %5095 = vmatpush1.bf16.msra.mxu1 %v7630_v42  ;;  %5288 = vmatpush1.bf16.msra.mxu0 %v7633_v59  ;;  %v7614_v42 = vld [vmem:[%s8035_s21 + $0x104] ss:$24 sps:$4 sm:$0xff]  }
 0x1b0   : > { %v9208_v60 = vadd.f32 %v2147_v31, %v1955_v3  ;;  %v1957_v7 = vadd.f32 %v1956_v2, %v8745_v15  ;;  %5096 = vmatprep.subr.bf16.mxu1 %v7644_v62  ;;  %5289 = vmatprep.subr.bf16.mxu0 %v7647_v29  ;;  %v7617_v15 = vld [vmem:[%s8035_s21 + $0x154] ss:$24 sps:$4 sm:$0xff]   ;;  %v7654_v62 = vld [vmem:[%s10435_s1 + $0x7f0] ss:$8 sps:$4 sm:$0xff]  }
 0x1b1   : > { %v1958_v37 = vpop.f32.mrf.mxu1  ;;  %v2151_v22 = vpop.f32.mrf.mxu0  ;;  %v7657_v29 = vld [vmem:[%s10435_s1 + $0x8f0] ss:$8 sps:$4 sm:$0xff]   ;;  %v7671_v3 = vld [vmem:[%s10435_s1 + $0x8e4] ss:$8 sps:$4 sm:$0xff]  }
 0x1b2   : > { %v9219_v45 = vadd.f32 %v2149_v51, %v1957_v7  ;;  %v1959_v53 = vadd.f32 %v1958_v37, %v8756_v24  ;;  %v7668_v24 = vld [vmem:[%s10435_s1 + $0x7e4] ss:$8 sps:$4 sm:$0xff]   ;;  %v7669_v37 = vld [vmem:[%s10435_s1 + $0x8e0] ss:$8 sps:$4 sm:$0xff]  }
 0x1b3   : > { %v1960_v59 = vpop.f32.mrf.mxu1  ;;  %v2153_v38 = vpop.f32.mrf.mxu0  ;;  %5097 = vmatpush1.bf16.msra.mxu1 %v7642_v8  ;;  %5290 = vmatpush1.bf16.msra.mxu0 %v7645_v6  ;;  %v10466_v6 = vld [vmem:[#allocation5_spill] sm:$0xff] }
 0x1b4   : > { %v9230_v46 = vadd.f32 %v2151_v22, %v1959_v53  ;;  %v1961_v31 = vadd.f32 %v1960_v59, %v8764_v32  ;;  %5098 = vmatprep.subr.bf16.mxu1 %v7656_v35  ;;  %5291 = vmatprep.subr.bf16.mxu0 %v7659_v18  ;;  %v7666_v18 = vld [vmem:[%s10435_s1 + $0x7e0] ss:$8 sps:$4 sm:$0xff]   ;;  %v7680_v53 = vld [vmem:[%s10435_s1 + $0x7d4] ss:$8 sps:$4 sm:$0xff]  }
 0x1b5   : > { %v1964_v2 = vpop.f32.mrf.mxu1  ;;  %v2157_v51 = vpop.f32.mrf.mxu0  ;;  %3615 = vmatmul.mubr.bf16.gmra.mxu1 %v7600_v43  ;;  %4962 = vmatmul.mubr.bf16.gmra.mxu0 %v7603_v57  ;;  %v10468_v43 = vld [vmem:[#allocation6_spill] sm:$0xff] }
 0x1b6   : > { %v9239_v8 = vadd.f32 %v2153_v38, %v1961_v31  ;;  %v1965_v7 = vadd.f32 %v1964_v2, %v10466_v6  ;;  %3624 = vmatprep.mubr.bf16.mxu1 %v7614_v42  ;;  %4971 = vmatprep.mubr.bf16.mxu0 %v7617_v15  ;;  %v7683_v42 = vld [vmem:[%s10435_s1 + $0x8d4] ss:$8 sps:$4 sm:$0xff]   ;;  %v7612_v38 = vld [vmem:[%s8035_s21 + $0x100] ss:$24 sps:$4 sm:$0xff]  }
 0x1b7   : > { %v1966_v32 = vpop.f32.mrf.mxu1  ;;  %v2159_v35 = vpop.f32.mrf.mxu0  ;;  %5099 = vmatpush2.bf16.msra.mxu1 %v7654_v62  ;;  %5292 = vmatpush2.bf16.msra.mxu0 %v7657_v29  ;;  %v7615_v62 = vld [vmem:[%s8035_s21 + $0x150] ss:$24 sps:$4 sm:$0xff]   ;;  %v7629_v6 = vld [vmem:[%s8035_s21 + $0x184] ss:$24 sps:$4 sm:$0xff]  }
 0x1b8   : > { %10465 = vst [vmem:[#allocation26_spill] sm:$0xff] %v9239_v8  ;;  %v9248_v22 = vadd.f32 %v2157_v51, %v1965_v7  ;;  %v1967_v57 = vadd.f32 %v1966_v32, %v10468_v43  ;;  %5100 = vmatprep.subr.bf16.mxu1 %v7668_v24  ;;  %5293 = vmatprep.subr.bf16.mxu0 %v7671_v3  ;;  %v10470_v31 = vld [vmem:[#allocation7_spill] sm:$0xff] }
 0x1b9   : > { %v1968_v15 = vpop.f32.mrf.mxu1  ;;  %v2161_v59 = vpop.f32.mrf.mxu0  ;;  %v7626_v51 = vld [vmem:[%s8035_s21 + $0x134] ss:$24 sps:$4 sm:$0xff]   ;;  %v7678_v7 = vld [vmem:[%s10435_s1 + $0x7d0] ss:$8 sps:$4 sm:$0xff]  }
 0x1ba   : > { %10467 = vst [vmem:[#allocation5_spill] sm:$0xff] %v9248_v22  ;;  %v9259_v29 = vadd.f32 %v2159_v35, %v1967_v57  ;;  %v1969_v2 = vadd.f32 %v1968_v15, %v10470_v31  ;;  %v7681_v32 = vld [vmem:[%s10435_s1 + $0x8d0] ss:$8 sps:$4 sm:$0xff]   ;;  %v7692_v15 = vld [vmem:[%s10435_s1 + $0x7c4] ss:$8 sps:$4 sm:$0xff]  }
 0x1bb   : > { %v1970_v24 = vpop.f32.mrf.mxu1  ;;  %v2163_v3 = vpop.f32.mrf.mxu0  ;;  %5101 = vmatpush2.bf16.msra.mxu1 %v7666_v18  ;;  %5294 = vmatpush2.bf16.msra.mxu0 %v7669_v37  ;;  %v10472_v35 = vld [vmem:[#allocation8_spill] sm:$0xff]  ;;  %v7695_v18 = vld [vmem:[%s10435_s1 + $0x8c4] ss:$8 sps:$4 sm:$0xff]  }
 0x1bc   : > { %10469 = vst [vmem:[#allocation6_spill] sm:$0xff] %v9259_v29  ;;  %v9270_v43 = vadd.f32 %v2161_v59, %v1969_v2  ;;  %v1971_v57 = vadd.f32 %v1970_v24, %v10472_v35  ;;  %5102 = vmatprep.subr.bf16.mxu1 %v7680_v53  ;;  %5295 = vmatprep.subr.bf16.mxu0 %v7683_v42  ;;  %v10474_v59 = vld [vmem:[#allocation9_spill] sm:$0xff] }
 0x1bd   : > { %v1974_v37 = vpop.f32.mrf.mxu1  ;;  %v2167_v31 = vpop.f32.mrf.mxu0  ;;  %3625 = vmatmul.mubr.bf16.gmra.mxu1 %v7612_v38  ;;  %4972 = vmatmul.mubr.bf16.gmra.mxu0 %v7615_v62  ;;  %v7690_v24 = vld [vmem:[%s10435_s1 + $0x7c0] ss:$8 sps:$4 sm:$0xff]  }
 0x1be   : > { %10471 = vst [vmem:[#allocation7_spill] sm:$0xff] %v9270_v43  ;;  %v9279_v29 = vadd.f32 %v2163_v3, %v1971_v57  ;;  %v1975_v2 = vadd.f32 %v1974_v37, %v10474_v59  ;;  %3634 = vmatprep.mubr.bf16.mxu1 %v7626_v51  ;;  %4981 = vmatprep.mubr.bf16.mxu0 %v7629_v6  ;;  %v7693_v38 = vld [vmem:[%s10435_s1 + $0x8c0] ss:$8 sps:$4 sm:$0xff]   ;;  %v7704_v6 = vld [vmem:[%s10435_s1 + $0x7b4] ss:$8 sps:$4 sm:$0xff]  }
 0x1bf   : > { %v1976_v53 = vpop.f32.mrf.mxu1  ;;  %v2169_v42 = vpop.f32.mrf.mxu0  ;;  %5103 = vmatpush2.bf16.msra.mxu1 %v7678_v7  ;;  %5296 = vmatpush2.bf16.msra.mxu0 %v7681_v32  ;;  %v10476_v51 = vld [vmem:[#allocation10_spill] sm:$0xff]  ;;  %v7707_v7 = vld [vmem:[%s10435_s1 + $0x8b4] ss:$8 sps:$4 sm:$0xff]   ;;  %v7627_v37 = vld [vmem:[%s8035_s21 + $0x180] ss:$24 sps:$4 sm:$0xff]  }
 0x1c0   : > { %10473 = vst [vmem:[#allocation8_spill] sm:$0xff] %v9279_v29  ;;  %v9288_v62 = vadd.f32 %v2167_v31, %v1975_v2  ;;  %v1977_v3 = vadd.f32 %v1976_v53, %v10476_v51  ;;  %5104 = vmatprep.subr.bf16.mxu1 %v7692_v15  ;;  %5297 = vmatprep.subr.bf16.mxu0 %v7695_v18  ;;  %v7624_v57 = vld [vmem:[%s8035_s21 + $0x130] ss:$24 sps:$4 sm:$0xff]   ;;  %v7641_v15 = vld [vmem:[%s8035_s21 + $0x1b4] ss:$24 sps:$4 sm:$0xff]  }
 0x1c1   : > { %v1978_v32 = vpop.f32.mrf.mxu1  ;;  %v2171_v35 = vpop.f32.mrf.mxu0  ;;  %v10478_v31 = vld [vmem:[#allocation11_spill] sm:$0xff] }
 0x1c2   : > { %10475 = vst [vmem:[#allocation9_spill] sm:$0xff] %v9288_v62  ;;  %v9299_v59 = vadd.f32 %v2169_v42, %v1977_v3  ;;  %v1979_v2 = vadd.f32 %v1978_v32, %v10478_v31  ;;  %v9303_v62 = vld [vmem:[%s8035_s21 + $0x164] ss:$24 sps:$4 sm:$0xff]   ;;  %v7702_v51 = vld [vmem:[%s10435_s1 + $0x7b0] ss:$8 sps:$4 sm:$0xff]  }
 0x1c3   : > { %10479 = vst [vmem:[#allocation11_spill] sm:$0xff] %v9303_v62  ;;  %v1980_v18 = vpop.f32.mrf.mxu1  ;;  %v2173_v53 = vpop.f32.mrf.mxu0  ;;  %5105 = vmatpush2.bf16.msra.mxu1 %v7690_v24  ;;  %5298 = vmatpush2.bf16.msra.mxu0 %v7693_v38  ;;  %v7705_v29 = vld [vmem:[%s10435_s1 + $0x8b0] ss:$8 sps:$4 sm:$0xff]   ;;  %v7716_v32 = vld [vmem:[%s10435_s1 + $0x7a4] ss:$8 sps:$4 sm:$0xff]  }
 0x1c4   : > { %10477 = vst [vmem:[#allocation10_spill] sm:$0xff] %v9299_v59  ;;  %v9312_v43 = vadd.f32 %v2171_v35, %v1979_v2  ;;  %v10481_v42 = vld [vmem:[#allocation12_spill] sm:$0xff]  ;;  %5106 = vmatprep.subr.bf16.mxu1 %v7704_v6  ;;  %5299 = vmatprep.subr.bf16.mxu0 %v7707_v7  ;;  %v7719_v24 = vld [vmem:[%s10435_s1 + $0x8a4] ss:$8 sps:$4 sm:$0xff]  }
 0x1c5   : > { %v1981_v3 = vadd.f32 %v1980_v18, %v10481_v42  ;;  %v1984_v38 = vpop.f32.mrf.mxu1  ;;  %v2177_v31 = vpop.f32.mrf.mxu0  ;;  %3635 = vmatmul.mubr.bf16.gmra.mxu1 %v7624_v57  ;;  %4982 = vmatmul.mubr.bf16.gmra.mxu0 %v7627_v37  ;;  %v10483_v35 = vld [vmem:[#allocation13_spill] sm:$0xff] }
 0x1c6   : > { %10480 = vst [vmem:[#allocation27_spill] sm:$0xff] %v9312_v43  ;;  %v1985_v2 = vadd.f32 %v1984_v38, %v10483_v35  ;;  %3644 = vmatprep.mubr.bf16.mxu1 %v9303_v62  ;;  %4991 = vmatprep.mubr.bf16.mxu0 %v7641_v15  ;;  %v7714_v57 = vld [vmem:[%s10435_s1 + $0x7a0] ss:$8 sps:$4 sm:$0xff]   ;;  %v7728_v15 = vld [vmem:[%s10435_s1 + $0x794] ss:$8 sps:$4 sm:$0xff]  }
 0x1c7   : > { %v9321_v59 = vadd.f32 %v2173_v53, %v1981_v3  ;;  %v1986_v6 = vpop.f32.mrf.mxu1  ;;  %v2179_v7 = vpop.f32.mrf.mxu0  ;;  %5107 = vmatpush2.bf16.msra.mxu1 %v7702_v51  ;;  %5300 = vmatpush2.bf16.msra.mxu0 %v7705_v29  ;;  %v7717_v37 = vld [vmem:[%s10435_s1 + $0x8a0] ss:$8 sps:$4 sm:$0xff]   ;;  %v7731_v29 = vld [vmem:[%s10435_s1 + $0x894] ss:$8 sps:$4 sm:$0xff]   ;;  %v7729_v43 = vld [vmem:[%s10435_s1 + $0x890] ss:$8 sps:$4 sm:$0xff]  }
 0x1c8   : > { %v9331_v18 = vadd.f32 %v2177_v31, %v1985_v2  ;;  %v10485_v53 = vld [vmem:[#allocation14_spill] sm:$0xff]  ;;  %5108 = vmatprep.subr.bf16.mxu1 %v7716_v32  ;;  %5301 = vmatprep.subr.bf16.mxu0 %v7719_v24  ;;  %v9341_v38 = vld [vmem:[%s8035_s21 + $0x160] ss:$24 sps:$4 sm:$0xff]   ;;  %v10488_v31 = vld [vmem:[#allocation15_spill] sm:$0xff] }
 0x1c9   : > { %10482 = vst [vmem:[#allocation12_spill] sm:$0xff] %v9321_v59  ;;  %v1987_v42 = vadd.f32 %v1986_v6, %v10485_v53  ;;  %v1988_v51 = vpop.f32.mrf.mxu1  ;;  %v2181_v3 = vpop.f32.mrf.mxu0  ;;  %10486 = vst [vmem:[#allocation14_spill] sm:$0xff] %v9341_v38  ;;  %v7639_v35 = vld [vmem:[%s8035_s21 + $0x1b0] ss:$24 sps:$4 sm:$0xff]   ;;  %v9348_v6 = vld [vmem:[%s8035_s21 + $0x194] ss:$24 sps:$4 sm:$0xff]  }
 0x1ca   : > { %10484 = vst [vmem:[#allocation13_spill] sm:$0xff] %v9331_v18  ;;  %v1989_v2 = vadd.f32 %v1988_v51, %v10488_v31  ;;  %10489 = vst [vmem:[#allocation15_spill] sm:$0xff] %v9348_v6  ;;  %v7653_v32 = vld [vmem:[%s8035_s21 + $0x1e4] ss:$24 sps:$4 sm:$0xff]   ;;  %v7726_v18 = vld [vmem:[%s10435_s1 + $0x790] ss:$8 sps:$4 sm:$0xff]  }
 0x1cb   : > { %v9344_v59 = vadd.f32 %v2179_v7, %v1987_v42  ;;  %v1990_v24 = vpop.f32.mrf.mxu1  ;;  %v2183_v53 = vpop.f32.mrf.mxu0  ;;  %5109 = vmatpush2.bf16.msra.mxu1 %v7714_v57  ;;  %5302 = vmatpush2.bf16.msra.mxu0 %v7717_v37  ;;  %v10491_v7 = vld [vmem:[#allocation16_spill] sm:$0xff]  ;;  %v7740_v51 = vld [vmem:[%s10435_s1 + $0x784] ss:$8 sps:$4 sm:$0xff]  }
 0x1cc   : > { %v9357_v62 = vadd.f32 %v2181_v3, %v1989_v2  ;;  %v1991_v42 = vadd.f32 %v1990_v24, %v10491_v7  ;;  %5110 = vmatprep.subr.bf16.mxu1 %v7728_v15  ;;  %5303 = vmatprep.subr.bf16.mxu0 %v7731_v29  ;;  %v7743_v57 = vld [vmem:[%s10435_s1 + $0x884] ss:$8 sps:$4 sm:$0xff]   ;;  %v7738_v24 = vld [vmem:[%s10435_s1 + $0x780] ss:$8 sps:$4 sm:$0xff]  }
 0x1cd   : > { %10487 = vst [vmem:[#allocation28_spill] sm:$0xff] %v9344_v59  ;;  %v1994_v37 = vpop.f32.mrf.mxu1  ;;  %v2187_v31 = vpop.f32.mrf.mxu0  ;;  %3645 = vmatmul.mubr.bf16.gmra.mxu1 %v9341_v38  ;;  %4992 = vmatmul.mubr.bf16.gmra.mxu0 %v7639_v35  ;;  %v10493_v3 = vld [vmem:[#allocation17_spill] sm:$0xff]  ;;  %v10494_v7 = vld [vmem:[#allocation18_spill] sm:$0xff] }
 0x1ce   : > { %10490 = vst [vmem:[#allocation29_spill] sm:$0xff] %v9357_v62  ;;  %v9367_v59 = vadd.f32 %v2183_v53, %v1991_v42  ;;  %v1995_v2 = vadd.f32 %v1994_v37, %v10493_v3  ;;  %3654 = vmatprep.mubr.bf16.mxu1 %v9348_v6  ;;  %5001 = vmatprep.mubr.bf16.mxu0 %v7653_v32  ;;  %v7741_v35 = vld [vmem:[%s10435_s1 + $0x880] ss:$8 sps:$4 sm:$0xff]   ;;  %v9388_v6 = vld [vmem:[%s8035_s21 + $0x1c4] ss:$24 sps:$4 sm:$0xff]  }
 0x1cf   : > { %v1996_v15 = vpop.f32.mrf.mxu1  ;;  %v2189_v29 = vpop.f32.mrf.mxu0  ;;  %5111 = vmatpush2.bf16.msra.mxu1 %v7726_v18  ;;  %5304 = vmatpush2.bf16.msra.mxu0 %v7729_v43  ;;  %v9381_v3 = vld [vmem:[%s8035_s21 + $0x190] ss:$24 sps:$4 sm:$0xff]   ;;  %v7651_v18 = vld [vmem:[%s8035_s21 + $0x1e0] ss:$24 sps:$4 sm:$0xff]   ;;  %v7665_v38 = vld [vmem:[%s8035_s21 + $0x214] ss:$24 sps:$4 sm:$0xff]  }
 0x1d0   : > { %10492 = vst [vmem:[#allocation16_spill] sm:$0xff] %v9367_v59  ;;  %v9377_v53 = vadd.f32 %v2187_v31, %v1995_v2  ;;  %v1997_v42 = vadd.f32 %v1996_v15, %v10494_v7  ;;  %5112 = vmatprep.subr.bf16.mxu1 %v7740_v51  ;;  %5305 = vmatprep.subr.bf16.mxu0 %v7743_v57  ;;  %v10495_v59 = vld [vmem:[#allocation19_spill] sm:$0xff]  ;;  %v10496_v51 = vld [vmem:[#allocation20_spill] sm:$0xff] }
 0x1d1   : > { %v1998_v32 = vpop.f32.mrf.mxu1  ;;  %v2191_v37 = vpop.f32.mrf.mxu0 }
 0x1d2   : > { %v9384_v43 = vadd.f32 %v2189_v29, %v1997_v42  ;;  %v1999_v62 = vadd.f32 %v1998_v32, %v10495_v59  ;;  %v9403_v32 = vld [vmem:[%s8035_s21 + $0x1c0] ss:$24 sps:$4 sm:$0xff]  }
 0x1d3   : > { %v2000_v22 = vpop.f32.mrf.mxu1  ;;  %v2193_v8 = vpop.f32.mrf.mxu0  ;;  %5113 = vmatpush2.bf16.msra.mxu1 %v7738_v24  ;;  %5306 = vmatpush2.bf16.msra.mxu0 %v7741_v35 }
 0x1d4   : > { %v9391_v31 = vadd.f32 %v2191_v37, %v1999_v62  ;;  %v2001_v57 = vadd.f32 %v2000_v22, %v10496_v51  ;;  %v7663_v37 = vld [vmem:[%s8035_s21 + $0x210] ss:$24 sps:$4 sm:$0xff]   ;;  %v9410_v51 = vld [vmem:[%s8035_s21 + $0x1f4] ss:$24 sps:$4 sm:$0xff]  }
 0x1d5   : > { %v3190_v2 = vpop.f32.mrf.mxu1  ;;  %v3383_v15 = vpop.f32.mrf.mxu0  ;;  %3655 = vmatmul.mubr.bf16.gmra.mxu1 %v9381_v3  ;;  %5002 = vmatmul.mubr.bf16.gmra.mxu0 %v7651_v18 }
 0x1d6   : > { %v9395_v59 = vadd.f32 %v2193_v8, %v2001_v57  ;;  %v3191_v29 = vadd.f32 %v3190_v2, %v8942_v44  ;;  %3664 = vmatprep.mubr.bf16.mxu1 %v9388_v6  ;;  %5011 = vmatprep.mubr.bf16.mxu0 %v7665_v38  ;;  %v7677_v44 = vld [vmem:[%s8035_s21 + $0x244] ss:$24 sps:$4 sm:$0xff]  }
 0x1d7   : > { %v3192_v62 = vpop.f32.mrf.mxu1  ;;  %v3385_v24 = vpop.f32.mrf.mxu0 }
 0x1d8   : > { %v9399_v35 = vadd.f32 %v3383_v15, %v3191_v29  ;;  %v3193_v22 = vadd.f32 %v3192_v62, %v8946_v54 }
 0x1d9   : > { %v3194_v7 = vpop.f32.mrf.mxu1  ;;  %v3387_v42 = vpop.f32.mrf.mxu0 }
 0x1da   : > { %v9406_v18 = vadd.f32 %v3385_v24, %v3193_v22  ;;  %v3195_v8 = vadd.f32 %v3194_v7, %v8950_v19 }
 0x1db   : > { %v3196_v57 = vpop.f32.mrf.mxu1  ;;  %v3389_v38 = vpop.f32.mrf.mxu0 }
 0x1dc   : > { %10497 = vst [vmem:[#allocation17_spill] sm:$0xff] %v9406_v18  ;;  %v9413_v2 = vadd.f32 %v3387_v42, %v3195_v8  ;;  %v3197_v15 = vadd.f32 %v3196_v57, %v8954_v0  ;;  %v9425_v57 = vld [vmem:[%s8035_s21 + $0x1f0] ss:$24 sps:$4 sm:$0xff]  }
 0x1dd   : > { %v3200_v54 = vpop.f32.mrf.mxu1  ;;  %v3393_v29 = vpop.f32.mrf.mxu0  ;;  %3665 = vmatmul.mubr.bf16.gmra.mxu1 %v9403_v32  ;;  %5012 = vmatmul.mubr.bf16.gmra.mxu0 %v7663_v37 }
 0x1de   : > { %10498 = vst [vmem:[#allocation18_spill] sm:$0xff] %v9413_v2  ;;  %v9417_v62 = vadd.f32 %v3389_v38, %v3197_v15  ;;  %v3201_v19 = vadd.f32 %v3200_v54, %v8958_v10  ;;  %3674 = vmatprep.mubr.bf16.mxu1 %v9410_v51  ;;  %5021 = vmatprep.mubr.bf16.mxu0 %v7677_v44  ;;  %v7675_v2 = vld [vmem:[%s8035_s21 + $0x240] ss:$24 sps:$4 sm:$0xff]   ;;  %v7689_v10 = vld [vmem:[%s8035_s21 + $0x274] ss:$24 sps:$4 sm:$0xff]  }
 0x1df   : > { %v3202_v24 = vpop.f32.mrf.mxu1  ;;  %v3395_v22 = vpop.f32.mrf.mxu0  ;;  %v10501_v38 = vld [vmem:[#allocation21_spill] sm:$0xff] }
 0x1e0   : > { %10499 = vst [vmem:[#allocation19_spill] sm:$0xff] %v9417_v62  ;;  %v9421_v7 = vadd.f32 %v3393_v29, %v3201_v19  ;;  %v3203_v0 = vadd.f32 %v3202_v24, %v8962_v13  ;;  %v9432_v62 = vld [vmem:[%s8035_s21 + $0x224] ss:$24 sps:$4 sm:$0xff]   ;;  %v10503_v29 = vld [vmem:[#allocation22_spill] sm:$0xff] }
 0x1e1   : > { %v3204_v42 = vpop.f32.mrf.mxu1  ;;  %v3397_v8 = vpop.f32.mrf.mxu0 }
 0x1e2   : > { %v9428_v37 = vadd.f32 %v3395_v22, %v3203_v0  ;;  %v3205_v15 = vadd.f32 %v3204_v42, %v10501_v38 }
 0x1e3   : > { %v3206_v54 = vpop.f32.mrf.mxu1  ;;  %v3399_v44 = vpop.f32.mrf.mxu0 }
 0x1e4   : > { %10500 = vst [vmem:[#allocation20_spill] sm:$0xff] %v9428_v37  ;;  %v9435_v18 = vadd.f32 %v3397_v8, %v3205_v15  ;;  %v3207_v19 = vadd.f32 %v3206_v54, %v10503_v29  ;;  %v7687_v37 = vld [vmem:[%s8035_s21 + $0x270] ss:$24 sps:$4 sm:$0xff]  }
 0x1e5   : > { %v3210_v13 = vpop.f32.mrf.mxu1  ;;  %v3403_v24 = vpop.f32.mrf.mxu0  ;;  %3675 = vmatmul.mubr.bf16.gmra.mxu1 %v9425_v57  ;;  %5022 = vmatmul.mubr.bf16.gmra.mxu0 %v7675_v2 }
 0x1e6   : > { %10502 = vst [vmem:[#allocation21_spill] sm:$0xff] %v9435_v18  ;;  %v9439_v22 = vadd.f32 %v3399_v44, %v3207_v19  ;;  %v3211_v0 = vadd.f32 %v3210_v13, %v8974_v33  ;;  %3684 = vmatprep.mubr.bf16.mxu1 %v9432_v62  ;;  %5031 = vmatprep.mubr.bf16.mxu0 %v7689_v10  ;;  %v9447_v18 = vld [vmem:[%s8035_s21 + $0x220] ss:$24 sps:$4 sm:$0xff]   ;;  %v9454_v19 = vld [vmem:[%s8035_s21 + $0x254] ss:$24 sps:$4 sm:$0xff]  }
 0x1e7   : > { %v3212_v42 = vpop.f32.mrf.mxu1  ;;  %v3405_v8 = vpop.f32.mrf.mxu0  ;;  %v7701_v33 = vld [vmem:[%s8035_s21 + $0x2a4] ss:$24 sps:$4 sm:$0xff]  }
 0x1e8   : > { %10504 = vst [vmem:[#allocation22_spill] sm:$0xff] %v9439_v22  ;;  %v9443_v38 = vadd.f32 %v3403_v24, %v3211_v0  ;;  %v3213_v15 = vadd.f32 %v3212_v42, %v8979_v49 }
 0x1e9   : > { %v3214_v54 = vpop.f32.mrf.mxu1  ;;  %v3407_v29 = vpop.f32.mrf.mxu0 }
 0x1ea   : > { %v9450_v2 = vadd.f32 %v3405_v8, %v3213_v15  ;;  %v3215_v44 = vadd.f32 %v3214_v54, %v8984_v40 }
 0x1eb   : > { %v3216_v13 = vpop.f32.mrf.mxu1  ;;  %v3409_v10 = vpop.f32.mrf.mxu0 }
 0x1ec   : > { %v9457_v22 = vadd.f32 %v3407_v29, %v3215_v44  ;;  %v3217_v24 = vadd.f32 %v3216_v13, %v8987_v58  ;;  %v9469_v13 = vld [vmem:[%s8035_s21 + $0x250] ss:$24 sps:$4 sm:$0xff]  }
 0x1ed   : > { %v3220_v49 = vpop.f32.mrf.mxu1  ;;  %v3413_v0 = vpop.f32.mrf.mxu0  ;;  %3685 = vmatmul.mubr.bf16.gmra.mxu1 %v9447_v18  ;;  %5032 = vmatmul.mubr.bf16.gmra.mxu0 %v7687_v37 }
 0x1ee   : > { %10505 = vst [vmem:[#allocation30_spill] sm:$0xff] %v9457_v22  ;;  %v9461_v42 = vadd.f32 %v3409_v10, %v3217_v24  ;;  %v3221_v40 = vadd.f32 %v3220_v49, %v8990_v25  ;;  %3694 = vmatprep.mubr.bf16.mxu1 %v9454_v19  ;;  %5041 = vmatprep.mubr.bf16.mxu0 %v7701_v33  ;;  %v7699_v22 = vld [vmem:[%s8035_s21 + $0x2a0] ss:$24 sps:$4 sm:$0xff]   ;;  %v9476_v24 = vld [vmem:[%s8035_s21 + $0x284] ss:$24 sps:$4 sm:$0xff]  }
 0x1ef   : > { %v3222_v8 = vpop.f32.mrf.mxu1  ;;  %v3415_v15 = vpop.f32.mrf.mxu0  ;;  %v7713_v25 = vld [vmem:[%s8035_s21 + $0x2d4] ss:$24 sps:$4 sm:$0xff]  }
 0x1f0   : > { %10506 = vst [vmem:[#allocation31_spill] sm:$0xff] %v9461_v42  ;;  %v9465_v54 = vadd.f32 %v3413_v0, %v3221_v40  ;;  %v3223_v58 = vadd.f32 %v3222_v8, %v8995_v30 }
 0x1f1   : > { %v3224_v29 = vpop.f32.mrf.mxu1  ;;  %v3417_v44 = vpop.f32.mrf.mxu0 }
 0x1f2   : > { %v9472_v37 = vadd.f32 %v3415_v15, %v3223_v58  ;;  %v3225_v10 = vadd.f32 %v3224_v29, %v9000_v39 }
 0x1f3   : > { %v3226_v49 = vpop.f32.mrf.mxu1  ;;  %v3419_v33 = vpop.f32.mrf.mxu0 }
 0x1f4   : > { %v9479_v42 = vadd.f32 %v3417_v44, %v3225_v10  ;;  %v3227_v0 = vadd.f32 %v3226_v49, %v9003_v56  ;;  %v9491_v49 = vld [vmem:[%s8035_s21 + $0x280] ss:$24 sps:$4 sm:$0xff]  }
 0x1f5   : > { %v3230_v30 = vpop.f32.mrf.mxu1  ;;  %v3423_v40 = vpop.f32.mrf.mxu0  ;;  %3695 = vmatmul.mubr.bf16.gmra.mxu1 %v9469_v13  ;;  %5042 = vmatmul.mubr.bf16.gmra.mxu0 %v7699_v22 }
 0x1f6   : > { %10507 = vst [vmem:[#allocation32_spill] sm:$0xff] %v9479_v42  ;;  %v9483_v8 = vadd.f32 %v3419_v33, %v3227_v0  ;;  %v3231_v39 = vadd.f32 %v3230_v30, %v9006_v52  ;;  %3704 = vmatprep.mubr.bf16.mxu1 %v9476_v24  ;;  %5051 = vmatprep.mubr.bf16.mxu0 %v7713_v25  ;;  %v7711_v42 = vld [vmem:[%s8035_s21 + $0x2d0] ss:$24 sps:$4 sm:$0xff]   ;;  %v9498_v0 = vld [vmem:[%s8035_s21 + $0x2b4] ss:$24 sps:$4 sm:$0xff]  }
 0x1f7   : > { %v3232_v15 = vpop.f32.mrf.mxu1  ;;  %v3425_v58 = vpop.f32.mrf.mxu0  ;;  %v7725_v52 = vld [vmem:[%s8035_s21 + $0x304] ss:$24 sps:$4 sm:$0xff]  }
 0x1f8   : > { %10508 = vst [vmem:[#allocation33_spill] sm:$0xff] %v9483_v8  ;;  %v9487_v29 = vadd.f32 %v3423_v40, %v3231_v39  ;;  %v3233_v56 = vadd.f32 %v3232_v15, %v9011_v11 }
 0x1f9   : > { %v3234_v44 = vpop.f32.mrf.mxu1  ;;  %v3427_v10 = vpop.f32.mrf.mxu0 }
 0x1fa   : > { %v9494_v22 = vadd.f32 %v3425_v58, %v3233_v56  ;;  %v3235_v33 = vadd.f32 %v3234_v44, %v9016_v36 }
 0x1fb   : > { %v3236_v30 = vpop.f32.mrf.mxu1  ;;  %v3429_v25 = vpop.f32.mrf.mxu0 }
 0x1fc   : > { %v9501_v8 = vadd.f32 %v3427_v10, %v3235_v33  ;;  %v3237_v40 = vadd.f32 %v3236_v30, %v9019_v12  ;;  %v9513_v30 = vld [vmem:[%s8035_s21 + $0x2b0] ss:$24 sps:$4 sm:$0xff]  }
 0x1fd   : > { %v3240_v11 = vpop.f32.mrf.mxu1  ;;  %v3433_v39 = vpop.f32.mrf.mxu0  ;;  %3705 = vmatmul.mubr.bf16.gmra.mxu1 %v9491_v49  ;;  %5052 = vmatmul.mubr.bf16.gmra.mxu0 %v7711_v42 }
 0x1fe   : > { %10509 = vst [vmem:[#allocation34_spill] sm:$0xff] %v9501_v8  ;;  %v9505_v15 = vadd.f32 %v3429_v25, %v3237_v40  ;;  %v3241_v36 = vadd.f32 %v3240_v11, %v9022_v41  ;;  %3714 = vmatprep.mubr.bf16.mxu1 %v9498_v0  ;;  %5061 = vmatprep.mubr.bf16.mxu0 %v7725_v52  ;;  %v7723_v8 = vld [vmem:[%s8035_s21 + $0x300] ss:$24 sps:$4 sm:$0xff]   ;;  %v9520_v40 = vld [vmem:[%s8035_s21 + $0x2e4] ss:$24 sps:$4 sm:$0xff]  }
 0x1ff   : > { %v3242_v58 = vpop.f32.mrf.mxu1  ;;  %v3435_v56 = vpop.f32.mrf.mxu0  ;;  %v7737_v41 = vld [vmem:[%s8035_s21 + $0x334] ss:$24 sps:$4 sm:$0xff]  }
 0x200   : > { %10510 = vst [vmem:[#allocation35_spill] sm:$0xff] %v9505_v15  ;;  %v9509_v44 = vadd.f32 %v3433_v39, %v3241_v36  ;;  %v3243_v12 = vadd.f32 %v3242_v58, %v9027_v4 }
 0x201   : > { %v3244_v10 = vpop.f32.mrf.mxu1  ;;  %v3437_v33 = vpop.f32.mrf.mxu0 }
 0x202   : > { %v9516_v42 = vadd.f32 %v3435_v56, %v3243_v12  ;;  %v3245_v25 = vadd.f32 %v3244_v10, %v9032_v17 }
 0x203   : > { %v3246_v11 = vpop.f32.mrf.mxu1  ;;  %v3439_v52 = vpop.f32.mrf.mxu0 }
 0x204   : > { %10511 = vst [vmem:[#allocation36_spill] sm:$0xff] %v9516_v42  ;;  %v9523_v15 = vadd.f32 %v3437_v33, %v3245_v25  ;;  %v3247_v39 = vadd.f32 %v3246_v11, %v9035_v48  ;;  %v9535_v11 = vld [vmem:[%s8035_s21 + $0x2e0] ss:$24 sps:$4 sm:$0xff]  }
 0x205   : > { %v3250_v4 = vpop.f32.mrf.mxu1  ;;  %v3443_v36 = vpop.f32.mrf.mxu0  ;;  %3715 = vmatmul.mubr.bf16.gmra.mxu1 %v9513_v30  ;;  %5062 = vmatmul.mubr.bf16.gmra.mxu0 %v7723_v8 }
 0x206   : > { %10512 = vst [vmem:[#allocation37_spill] sm:$0xff] %v9523_v15  ;;  %v9527_v58 = vadd.f32 %v3439_v52, %v3247_v39  ;;  %v3251_v17 = vadd.f32 %v3250_v4, %v9038_v61  ;;  %3724 = vmatprep.mubr.bf16.mxu1 %v9520_v40  ;;  %5071 = vmatprep.mubr.bf16.mxu0 %v7737_v41  ;;  %v7735_v15 = vld [vmem:[%s8035_s21 + $0x330] ss:$24 sps:$4 sm:$0xff]   ;;  %v7746_v39 = vld [vmem:[%s8035_s21 + $0x6c] ss:$24 sps:$4 sm:$0xff]  }
 0x207   : > { %v3252_v56 = vpop.f32.mrf.mxu1  ;;  %v3445_v12 = vpop.f32.mrf.mxu0  ;;  %v7749_v61 = vld [vmem:[%s8035_s21 + $0x74] ss:$24 sps:$4 sm:$0xff]  }
 0x208   : > { %10513 = vst [vmem:[#allocation38_spill] sm:$0xff] %v9527_v58  ;;  %v9531_v10 = vadd.f32 %v3443_v36, %v3251_v17  ;;  %v3253_v48 = vadd.f32 %v3252_v56, %v9043_v1 }
 0x209   : > { %v3254_v33 = vpop.f32.mrf.mxu1  ;;  %v3447_v25 = vpop.f32.mrf.mxu0 }
 0x20a   : > { %10514 = vst [vmem:[#allocation39_spill] sm:$0xff] %v9531_v10  ;;  %v9538_v8 = vadd.f32 %v3445_v12, %v3253_v48  ;;  %v3255_v52 = vadd.f32 %v3254_v33, %v9048_v21 }
 0x20b   : > { %v3256_v4 = vpop.f32.mrf.mxu1  ;;  %v3449_v58 = vpop.f32.mrf.mxu0 }
 0x20c   : > { %10515 = vst [vmem:[#allocation40_spill] sm:$0xff] %v9538_v8  ;;  %v9543_v41 = vadd.f32 %v3447_v25, %v3255_v52  ;;  %v3257_v36 = vadd.f32 %v3256_v4, %v9051_v20  ;;  %v10518_v25 = vld [vmem:[#allocation23_spill] sm:$0xff] }
 0x20d   : > { %v3260_v1 = vpop.f32.mrf.mxu1  ;;  %v3453_v17 = vpop.f32.mrf.mxu0  ;;  %3725 = vmatmul.mubr.bf16.gmra.mxu1 %v9535_v11  ;;  %5072 = vmatmul.mubr.bf16.gmra.mxu0 %v7735_v15  ;;  %v7747_v8 = vld [vmem:[%s8035_s21 + $0x70] ss:$24 sps:$4 sm:$0xff]   ;;  %v10519_v15 = vld [vmem:[#allocation24_spill] sm:$0xff] }
 0x20e   : > { %10516 = vst [vmem:[#allocation41_spill] sm:$0xff] %v9543_v41  ;;  %v9547_v56 = vadd.f32 %v3449_v58, %v3257_v36  ;;  %v3261_v21 = vadd.f32 %v3260_v1, %v9054_v23  ;;  %5114 = vmatprep.mubr.bf16.mxu1 %v7746_v39  ;;  %5307 = vmatprep.mubr.bf16.mxu0 %v7749_v61  ;;  %v7744_v41 = vld [vmem:[%s8035_s21 + $0x68] ss:$24 sps:$4 sm:$0xff]   ;;  %v7752_v58 = vld [vmem:[%s8035_s21 + $0x9c] ss:$24 sps:$4 sm:$0xff]  }
 0x20f   : > { %v3262_v12 = vpop.f32.mrf.mxu1  ;;  %v3455_v48 = vpop.f32.mrf.mxu0  ;;  %v7755_v36 = vld [vmem:[%s8035_s21 + $0xa4] ss:$24 sps:$4 sm:$0xff]  }
 0x210   : > { %10517 = vst [vmem:[#allocation42_spill] sm:$0xff] %v9547_v56  ;;  %v9550_v33 = vadd.f32 %v3453_v17, %v3261_v21  ;;  %v3263_v20 = vadd.f32 %v3262_v12, %v10518_v25  ;;  %v10520_v61 = vld [vmem:[#allocation25_spill] sm:$0xff] }
 0x211   : > { %v3264_v52 = vpop.f32.mrf.mxu1  ;;  %v3457_v4 = vpop.f32.mrf.mxu0 }
 0x212   : > { %v9555_v10 = vadd.f32 %v3455_v48, %v3263_v20  ;;  %v3265_v42 = vadd.f32 %v3264_v52, %v10519_v15  ;;  %v7750_v15 = vld [vmem:[%s8035_s21 + $0x98] ss:$24 sps:$4 sm:$0xff]  }
 0x213   : > { %v3266_v56 = vpop.f32.mrf.mxu1  ;;  %v3459_v23 = vpop.f32.mrf.mxu0 }
 0x214   : > { %v9560_v39 = vadd.f32 %v3457_v4, %v3265_v42  ;;  %v3267_v1 = vadd.f32 %v3266_v56, %v10520_v61  ;;  %v7753_v61 = vld [vmem:[%s8035_s21 + $0xa0] ss:$24 sps:$4 sm:$0xff]  }
 0x215   : > { %v3270_v17 = vpop.f32.mrf.mxu1  ;;  %v3463_v21 = vpop.f32.mrf.mxu0  ;;  %5115 = vmatmul.mubr.bf16.vlgmr.msra.gmra.mxu1 %v7744_v41  ;;  %5308 = vmatmul.mubr.bf16.vlgmr.msra.gmra.mxu0 %v7747_v8 }
 0x216   : > { %v9563_v12 = vadd.f32 %v3459_v23, %v3267_v1  ;;  %v3271_v48 = vadd.f32 %v3270_v17, %v9094_v34  ;;  %5124 = vmatprep.mubr.bf16.mxu1 %v7752_v58  ;;  %5317 = vmatprep.mubr.bf16.mxu0 %v7755_v36  ;;  %v7758_v23 = vld [vmem:[%s8035_s21 + $0xcc] ss:$24 sps:$4 sm:$0xff]  }
 0x217   : > { %v3272_v25 = vpop.f32.mrf.mxu1  ;;  %v3465_v20 = vpop.f32.mrf.mxu0  ;;  %v7761_v1 = vld [vmem:[%s8035_s21 + $0xd4] ss:$24 sps:$4 sm:$0xff]  }
 0x218   : > { %10521 = vst [vmem:[#allocation23_spill] sm:$0xff] %v9563_v12  ;;  %v9566_v42 = vadd.f32 %v3463_v21, %v3271_v48  ;;  %v3273_v52 = vadd.f32 %v3272_v25, %v9099_v28 }
 0x219   : > { %v3274_v56 = vpop.f32.mrf.mxu1  ;;  %v3467_v4 = vpop.f32.mrf.mxu0 }
 0x21a   : > { %v9571_v41 = vadd.f32 %v3465_v20, %v3273_v52  ;;  %v3275_v8 = vadd.f32 %v3274_v56, %v9110_v16  ;;  %v7756_v56 = vld [vmem:[%s8035_s21 + $0xc8] ss:$24 sps:$4 sm:$0xff]  }
 0x21b   : > { %v3276_v12 = vpop.f32.mrf.mxu1  ;;  %v3469_v34 = vpop.f32.mrf.mxu0 }
 0x21c   : > { %v9576_v58 = vadd.f32 %v3467_v4, %v3275_v8  ;;  %v3277_v36 = vadd.f32 %v3276_v12, %v9119_v47  ;;  %v7759_v4 = vld [vmem:[%s8035_s21 + $0xd0] ss:$24 sps:$4 sm:$0xff]   ;;  %v7764_v8 = vld [vmem:[%s8035_s21 + $0xfc] ss:$24 sps:$4 sm:$0xff]  }
 0x21d   : > { %v3280_v17 = vpop.f32.mrf.mxu1  ;;  %v3473_v28 = vpop.f32.mrf.mxu0  ;;  %5125 = vmatmul.mubr.bf16.gmra.mxu1 %v7750_v15  ;;  %5318 = vmatmul.mubr.bf16.gmra.mxu0 %v7753_v61 }
 0x21e   : > { %v9579_v21 = vadd.f32 %v3469_v34, %v3277_v36  ;;  %v3281_v16 = vadd.f32 %v3280_v17, %v9128_v63  ;;  %5134 = vmatprep.mubr.bf16.mxu1 %v7758_v23  ;;  %5327 = vmatprep.mubr.bf16.mxu0 %v7761_v1  ;;  %v7767_v34 = vld [vmem:[%s8035_s21 + $0x104] ss:$24 sps:$4 sm:$0xff]  }
 0x21f   : > { %v3282_v48 = vpop.f32.mrf.mxu1  ;;  %v3475_v25 = vpop.f32.mrf.mxu0 }
 0x220   : > { %v9582_v20 = vadd.f32 %v3473_v28, %v3281_v16  ;;  %v3283_v52 = vadd.f32 %v3282_v48, %v9139_v9 }
 0x221   : > { %v3284_v47 = vpop.f32.mrf.mxu1  ;;  %v3477_v12 = vpop.f32.mrf.mxu0 }
 0x222   : > { %v9587_v15 = vadd.f32 %v3475_v25, %v3283_v52  ;;  %v3285_v61 = vadd.f32 %v3284_v47, %v9150_v27 }
 0x223   : > { %v3286_v36 = vpop.f32.mrf.mxu1  ;;  %v3479_v63 = vpop.f32.mrf.mxu0 }
 0x224   : > { %v9592_v23 = vadd.f32 %v3477_v12, %v3285_v61  ;;  %v3287_v1 = vadd.f32 %v3286_v36, %v9159_v14  ;;  %v7762_v12 = vld [vmem:[%s8035_s21 + $0xf8] ss:$24 sps:$4 sm:$0xff]   ;;  %v7770_v36 = vld [vmem:[%s8035_s21 + $0x12c] ss:$24 sps:$4 sm:$0xff]  }
 0x225   : > { %v3290_v17 = vpop.f32.mrf.mxu1  ;;  %v3483_v9 = vpop.f32.mrf.mxu0  ;;  %5135 = vmatmul.mubr.bf16.gmra.mxu1 %v7756_v56  ;;  %5328 = vmatmul.mubr.bf16.gmra.mxu0 %v7759_v4  ;;  %v7765_v61 = vld [vmem:[%s8035_s21 + $0x100] ss:$24 sps:$4 sm:$0xff]  }
 0x226   : > { %v9595_v28 = vadd.f32 %v3479_v63, %v3287_v1  ;;  %v3291_v27 = vadd.f32 %v3290_v17, %v9168_v50  ;;  %5144 = vmatprep.mubr.bf16.mxu1 %v7764_v8  ;;  %5337 = vmatprep.mubr.bf16.mxu0 %v7767_v34  ;;  %v7773_v63 = vld [vmem:[%s8035_s21 + $0x134] ss:$24 sps:$4 sm:$0xff]  }
 0x227   : > { %v3292_v16 = vpop.f32.mrf.mxu1  ;;  %v3485_v48 = vpop.f32.mrf.mxu0 }
 0x228   : > { %v9598_v25 = vadd.f32 %v3483_v9, %v3291_v27  ;;  %v3293_v52 = vadd.f32 %v3292_v16, %v9179_v5 }
 0x229   : > { %v3294_v14 = vpop.f32.mrf.mxu1  ;;  %v3487_v47 = vpop.f32.mrf.mxu0 }
 0x22a   : > { %v9603_v56 = vadd.f32 %v3485_v48, %v3293_v52  ;;  %v3295_v4 = vadd.f32 %v3294_v14, %v9190_v26 }
 0x22b   : > { %v3296_v1 = vpop.f32.mrf.mxu1  ;;  %v3489_v50 = vpop.f32.mrf.mxu0 }
 0x22c   : > { %v9608_v8 = vadd.f32 %v3487_v47, %v3295_v4  ;;  %v3297_v34 = vadd.f32 %v3296_v1, %v9199_v55  ;;  %v7768_v47 = vld [vmem:[%s8035_s21 + $0x128] ss:$24 sps:$4 sm:$0xff]  }
 0x22d   : > { %v3300_v17 = vpop.f32.mrf.mxu1  ;;  %v3493_v5 = vpop.f32.mrf.mxu0  ;;  %5145 = vmatmul.mubr.bf16.gmra.mxu1 %v7762_v12  ;;  %5338 = vmatmul.mubr.bf16.gmra.mxu0 %v7765_v61  ;;  %v7771_v4 = vld [vmem:[%s8035_s21 + $0x130] ss:$24 sps:$4 sm:$0xff]   ;;  %v7776_v61 = vld [vmem:[%s8035_s21 + $0x15c] ss:$24 sps:$4 sm:$0xff]  }
 0x22e   : > { %v9611_v9 = vadd.f32 %v3489_v50, %v3297_v34  ;;  %v3301_v27 = vadd.f32 %v3300_v17, %v9208_v60  ;;  %5154 = vmatprep.mubr.bf16.mxu1 %v7770_v36  ;;  %5347 = vmatprep.mubr.bf16.mxu0 %v7773_v63  ;;  %v10524_v36 = vld [vmem:[#allocation26_spill] sm:$0xff] }
 0x22f   : > { %v3302_v26 = vpop.f32.mrf.mxu1  ;;  %v3495_v16 = vpop.f32.mrf.mxu0 }
 0x230   : > { %v9614_v48 = vadd.f32 %v3493_v5, %v3301_v27  ;;  %v3303_v52 = vadd.f32 %v3302_v26, %v9219_v45  ;;  %v10526_v27 = vld [vmem:[#allocation5_spill] sm:$0xff] }
 0x231   : > { %v3304_v14 = vpop.f32.mrf.mxu1  ;;  %v3497_v55 = vpop.f32.mrf.mxu0 }
 0x232   : > { %v9619_v1 = vadd.f32 %v3495_v16, %v3303_v52  ;;  %v3305_v12 = vadd.f32 %v3304_v14, %v9230_v46  ;;  %v10527_v16 = vld [vmem:[#allocation11_spill] sm:$0xff] }
 0x233   : > { %v3306_v50 = vpop.f32.mrf.mxu1  ;;  %v3499_v34 = vpop.f32.mrf.mxu0 }
 0x234   : > { %10522 = vst [vmem:[#allocation24_spill] sm:$0xff] %v9619_v1  ;;  %v9623_v60 = vadd.f32 %v3497_v55, %v3305_v12  ;;  %v3307_v63 = vadd.f32 %v3306_v50, %v10524_v36  ;;  %v10529_v55 = vld [vmem:[#allocation6_spill] sm:$0xff]  ;;  %v7774_v36 = vld [vmem:[%s8035_s21 + $0x158] ss:$24 sps:$4 sm:$0xff]  }
 0x235   : > { %v3310_v17 = vpop.f32.mrf.mxu1  ;;  %v3503_v5 = vpop.f32.mrf.mxu0  ;;  %5155 = vmatmul.mubr.bf16.gmra.mxu1 %v7768_v47  ;;  %5348 = vmatmul.mubr.bf16.gmra.mxu0 %v7771_v4  ;;  %v10531_v47 = vld [vmem:[#allocation7_spill] sm:$0xff] }
 0x236   : > { %10523 = vst [vmem:[#allocation25_spill] sm:$0xff] %v9623_v60  ;;  %v9626_v45 = vadd.f32 %v3499_v34, %v3307_v63  ;;  %v3311_v26 = vadd.f32 %v3310_v17, %v10526_v27  ;;  %5164 = vmatprep.mubr.bf16.mxu1 %v7776_v61  ;;  %5357 = vmatprep.mubr.bf16.mxu0 %v10527_v16  ;;  %v7779_v34 = vld [vmem:[%s8035_s21 + $0x18c] ss:$24 sps:$4 sm:$0xff]   ;;  %v10533_v61 = vld [vmem:[#allocation8_spill] sm:$0xff] }
 0x237   : > { %v3312_v46 = vpop.f32.mrf.mxu1  ;;  %v3505_v52 = vpop.f32.mrf.mxu0 }
 0x238   : > { %10525 = vst [vmem:[#allocation26_spill] sm:$0xff] %v9626_v45  ;;  %v9630_v14 = vadd.f32 %v3503_v5, %v3311_v26  ;;  %v3313_v12 = vadd.f32 %v3312_v46, %v10529_v55  ;;  %v10534_v26 = vld [vmem:[#allocation14_spill] sm:$0xff] }
 0x239   : > { %v3314_v60 = vpop.f32.mrf.mxu1  ;;  %v3507_v50 = vpop.f32.mrf.mxu0 }
 0x23a   : > { %10528 = vst [vmem:[#allocation5_spill] sm:$0xff] %v9630_v14  ;;  %v9634_v1 = vadd.f32 %v3505_v52, %v3313_v12  ;;  %v3315_v4 = vadd.f32 %v3314_v60, %v10531_v47  ;;  %v10536_v52 = vld [vmem:[#allocation9_spill] sm:$0xff]  ;;  %v10537_v60 = vld [vmem:[#allocation15_spill] sm:$0xff] }
 0x23b   : > { %v3316_v63 = vpop.f32.mrf.mxu1  ;;  %v3509_v45 = vpop.f32.mrf.mxu0 }
 0x23c   : > { %10530 = vst [vmem:[#allocation11_spill] sm:$0xff] %v9634_v1  ;;  %v9638_v17 = vadd.f32 %v3507_v50, %v3315_v4  ;;  %v3317_v27 = vadd.f32 %v3316_v63, %v10533_v61  ;;  %v10538_v4 = vld [vmem:[#allocation10_spill] sm:$0xff] }
 0x23d   : > { %v3320_v16 = vpop.f32.mrf.mxu1  ;;  %v3513_v5 = vpop.f32.mrf.mxu0  ;;  %5165 = vmatmul.mubr.bf16.gmra.mxu1 %v7774_v36  ;;  %5358 = vmatmul.mubr.bf16.gmra.mxu0 %v10534_v26  ;;  %v7777_v1 = vld [vmem:[%s8035_s21 + $0x188] ss:$24 sps:$4 sm:$0xff]   ;;  %v10539_v36 = vld [vmem:[#allocation27_spill] sm:$0xff] }
 0x23e   : > { %10532 = vst [vmem:[#allocation6_spill] sm:$0xff] %v9638_v17  ;;  %v9642_v46 = vadd.f32 %v3509_v45, %v3317_v27  ;;  %v3321_v55 = vadd.f32 %v3320_v16, %v10536_v52  ;;  %5174 = vmatprep.mubr.bf16.mxu1 %v7779_v34  ;;  %5367 = vmatprep.mubr.bf16.mxu0 %v10537_v60  ;;  %v7782_v45 = vld [vmem:[%s8035_s21 + $0x1bc] ss:$24 sps:$4 sm:$0xff]  }
 0x23f   : > { %v3322_v12 = vpop.f32.mrf.mxu1  ;;  %v3515_v47 = vpop.f32.mrf.mxu0  ;;  %v10541_v34 = vld [vmem:[#allocation12_spill] sm:$0xff] }
 0x240   : > { %10535 = vst [vmem:[#allocation7_spill] sm:$0xff] %v9642_v46  ;;  %v9646_v50 = vadd.f32 %v3513_v5, %v3321_v55  ;;  %v3323_v17 = vadd.f32 %v3322_v12, %v10538_v4 }
 0x241   : > { %v3324_v63 = vpop.f32.mrf.mxu1  ;;  %v3517_v61 = vpop.f32.mrf.mxu0 }
 0x242   : > { %v9650_v14 = vadd.f32 %v3515_v47, %v3323_v17  ;;  %v3325_v26 = vadd.f32 %v3324_v63, %v10539_v36  ;;  %v10543_v17 = vld [vmem:[#allocation13_spill] sm:$0xff] }
 0x243   : > { %v3326_v27 = vpop.f32.mrf.mxu1  ;;  %v3519_v46 = vpop.f32.mrf.mxu0 }
 0x244   : > { %v9654_v16 = vadd.f32 %v3517_v61, %v3325_v26  ;;  %v3327_v52 = vadd.f32 %v3326_v27, %v10541_v34  ;;  %v10544_v61 = vld [vmem:[#allocation28_spill] sm:$0xff] }
 0x245   : > { %v3330_v60 = vpop.f32.mrf.mxu1  ;;  %v3523_v5 = vpop.f32.mrf.mxu0  ;;  %5175 = vmatmul.mubr.bf16.gmra.mxu1 %v7777_v1  ;;  %5368 = vmatmul.mubr.bf16.gmra.mxu0 %v9381_v3  ;;  %v7780_v34 = vld [vmem:[%s8035_s21 + $0x1b8] ss:$24 sps:$4 sm:$0xff]   ;;  %v10545_v1 = vld [vmem:[#allocation29_spill] sm:$0xff] }
 0x246   : > { %10540 = vst [vmem:[#allocation8_spill] sm:$0xff] %v9654_v16  ;;  %v9658_v55 = vadd.f32 %v3519_v46, %v3327_v52  ;;  %v3331_v12 = vadd.f32 %v3330_v60, %v10543_v17  ;;  %5184 = vmatprep.mubr.bf16.mxu1 %v7782_v45  ;;  %5377 = vmatprep.mubr.bf16.mxu0 %v9388_v6  ;;  %v7785_v46 = vld [vmem:[%s8035_s21 + $0x1ec] ss:$24 sps:$4 sm:$0xff]   ;;  %v10546_v45 = vld [vmem:[#allocation16_spill] sm:$0xff] }
 0x247   : > { %v3332_v47 = vpop.f32.mrf.mxu1  ;;  %v3525_v4 = vpop.f32.mrf.mxu0 }
 0x248   : > { %10542 = vst [vmem:[#allocation14_spill] sm:$0xff] %v9658_v55  ;;  %v9662_v63 = vadd.f32 %v3523_v5, %v3331_v12  ;;  %v3333_v36 = vadd.f32 %v3332_v47, %v10544_v61 }
 0x249   : > { %v3334_v26 = vpop.f32.mrf.mxu1  ;;  %v3527_v27 = vpop.f32.mrf.mxu0 }
 0x24a   : > { %v9666_v16 = vadd.f32 %v3525_v4, %v3333_v36  ;;  %v3335_v3 = vadd.f32 %v3334_v26, %v10545_v1 }
 0x24b   : > { %v3336_v52 = vpop.f32.mrf.mxu1  ;;  %v3529_v55 = vpop.f32.mrf.mxu0 }
 0x24c   : > { %v9670_v60 = vadd.f32 %v3527_v27, %v3335_v3  ;;  %v3337_v6 = vadd.f32 %v3336_v52, %v10546_v45  ;;  %v7783_v3 = vld [vmem:[%s8035_s21 + $0x1e8] ss:$24 sps:$4 sm:$0xff]  }
 0x24d   : > { %v3340_v17 = vpop.f32.mrf.mxu1  ;;  %v3533_v5 = vpop.f32.mrf.mxu0  ;;  %5185 = vmatmul.mubr.bf16.gmra.mxu1 %v7780_v34  ;;  %5378 = vmatmul.mubr.bf16.gmra.mxu0 %v9403_v32 }
 0x24e   : > { %v9674_v12 = vadd.f32 %v3529_v55, %v3337_v6  ;;  %v3341_v47 = vadd.f32 %v3340_v17, %v9377_v53  ;;  %5194 = vmatprep.mubr.bf16.mxu1 %v7785_v46  ;;  %5387 = vmatprep.mubr.bf16.mxu0 %v9410_v51  ;;  %v7788_v55 = vld [vmem:[%s8035_s21 + $0x21c] ss:$24 sps:$4 sm:$0xff]  }
 0x24f   : > { %v3342_v4 = vpop.f32.mrf.mxu1  ;;  %v3535_v61 = vpop.f32.mrf.mxu0 }
 0x250   : > { %v9678_v36 = vadd.f32 %v3533_v5, %v3341_v47  ;;  %v3343_v26 = vadd.f32 %v3342_v4, %v9384_v43  ;;  %v10547_v47 = vld [vmem:[#allocation17_spill] sm:$0xff] }
 0x251   : > { %v3344_v27 = vpop.f32.mrf.mxu1  ;;  %v3537_v1 = vpop.f32.mrf.mxu0 }
 0x252   : > { %v9682_v52 = vadd.f32 %v3535_v61, %v3343_v26  ;;  %v3345_v32 = vadd.f32 %v3344_v27, %v9391_v31  ;;  %v7786_v26 = vld [vmem:[%s8035_s21 + $0x218] ss:$24 sps:$4 sm:$0xff]   ;;  %v10548_v27 = vld [vmem:[#allocation18_spill] sm:$0xff] }
 0x253   : > { %v3346_v34 = vpop.f32.mrf.mxu1  ;;  %v3539_v45 = vpop.f32.mrf.mxu0 }
 0x254   : > { %v9686_v53 = vadd.f32 %v3537_v1, %v3345_v32  ;;  %v3347_v51 = vadd.f32 %v3346_v34, %v9395_v59  ;;  %v7791_v1 = vld [vmem:[%s8035_s21 + $0x24c] ss:$24 sps:$4 sm:$0xff]   ;;  %v10549_v32 = vld [vmem:[#allocation19_spill] sm:$0xff] }
 0x255   : > { %v3576_v46 = vpop.f32.mrf.mxu1  ;;  %v9689_v6 = vpop.f32.mrf.mxu0  ;;  %5195 = vmatmul.mubr.bf16.gmra.mxu1 %v7783_v3  ;;  %5388 = vmatmul.mubr.bf16.gmra.mxu0 %v9425_v57 }
 0x256   : > { %v9692_v43 = vadd.f32 %v3539_v45, %v3347_v51  ;;  %v9695_v17 = vadd.f32 %v3576_v46, %v9399_v35  ;;  %5204 = vmatprep.mubr.bf16.mxu1 %v7788_v55  ;;  %5397 = vmatprep.mubr.bf16.mxu0 %v9432_v62 }
 0x257   : > { %v3578_v31 = vpop.f32.mrf.mxu1  ;;  %v9698_v5 = vpop.f32.mrf.mxu0 }
 0x258   : > { %v9701_v59 = vadd.f32 %v3578_v31, %v10547_v47  ;;  %v10552_v31 = vld [vmem:[#allocation20_spill] sm:$0xff] }
 0x259   : > { %v3580_v4 = vpop.f32.mrf.mxu1  ;;  %v9703_v61 = vpop.f32.mrf.mxu0 }
 0x25a   : > { %v9707_v57 = vadd.f32 %v3580_v4, %v10548_v27 }
 0x25b   : > { %v3582_v35 = vpop.f32.mrf.mxu1  ;;  %v9710_v3 = vpop.f32.mrf.mxu0 }
 0x25c   : > { %v9713_v62 = vadd.f32 %v3582_v35, %v10549_v32  ;;  %v7789_v35 = vld [vmem:[%s8035_s21 + $0x248] ss:$24 sps:$4 sm:$0xff]  }
 0x25d   : > { %v3586_v55 = vpop.f32.mrf.mxu1  ;;  %v9715_v34 = vpop.f32.mrf.mxu0  ;;  %5205 = vmatmul.mubr.bf16.gmra.mxu1 %v7786_v26  ;;  %5398 = vmatmul.mubr.bf16.gmra.mxu0 %v9447_v18  ;;  %v10553_v32 = vld [vmem:[#allocation21_spill] sm:$0xff]  ;;  %v7794_v18 = vld [vmem:[%s8035_s21 + $0x27c] ss:$24 sps:$4 sm:$0xff]  }
 0x25e   : > { %v9719_v45 = vadd.f32 %v3586_v55, %v9421_v7  ;;  %5214 = vmatprep.mubr.bf16.mxu1 %v7791_v1  ;;  %5407 = vmatprep.mubr.bf16.mxu0 %v9454_v19  ;;  %v10554_v1 = vld [vmem:[#allocation22_spill] sm:$0xff] }
 0x25f   : > { %v3588_v51 = vpop.f32.mrf.mxu1  ;;  %v9722_v46 = vpop.f32.mrf.mxu0 }
 0x260   : > { %10550 = vst [vmem:[#allocation9_spill] sm:$0xff] %v9719_v45  ;;  %10551 = vst [vmem:[#allocation15_spill] sm:$0xff] %v9722_v46  ;;  %v9725_v47 = vadd.f32 %v3588_v51, %v10552_v31 }
 0x261   : > { %v3590_v4 = vpop.f32.mrf.mxu1  ;;  %v9727_v27 = vpop.f32.mrf.mxu0 }
 0x262   : > { %v9731_v26 = vadd.f32 %v3590_v4, %v10553_v32 }
 0x263   : > { %v3592_v7 = vpop.f32.mrf.mxu1  ;;  %v9734_v55 = vpop.f32.mrf.mxu0 }
 0x264   : > { %v9737_v19 = vadd.f32 %v3592_v7, %v10554_v1 }
 0x265   : > { %v3596_v45 = vpop.f32.mrf.mxu1  ;;  %v9739_v46 = vpop.f32.mrf.mxu0  ;;  %5215 = vmatmul.mubr.bf16.gmra.mxu1 %v7789_v35  ;;  %5408 = vmatmul.mubr.bf16.gmra.mxu0 %v9469_v13  ;;  %v7797_v13 = vld [vmem:[%s8035_s21 + $0x2ac] ss:$24 sps:$4 sm:$0xff]  }
 0x266   : > { %10555 = vst [vmem:[#allocation10_spill] sm:$0xff] %v9737_v19  ;;  %10556 = vst [vmem:[#allocation27_spill] sm:$0xff] %v9739_v46  ;;  %v9743_v51 = vadd.f32 %v3596_v45, %v9443_v38  ;;  %5224 = vmatprep.mubr.bf16.mxu1 %v7794_v18  ;;  %5417 = vmatprep.mubr.bf16.mxu0 %v9476_v24  ;;  %v7792_v19 = vld [vmem:[%s8035_s21 + $0x278] ss:$24 sps:$4 sm:$0xff]   ;;  %v10559_v46 = vld [vmem:[#allocation30_spill] sm:$0xff] }
 0x267   : > { %v3598_v31 = vpop.f32.mrf.mxu1  ;;  %v9746_v4 = vpop.f32.mrf.mxu0  ;;  %v10561_v18 = vld [vmem:[#allocation31_spill] sm:$0xff] }
 0x268   : > { %10557 = vst [vmem:[#allocation12_spill] sm:$0xff] %v9743_v51  ;;  %10558 = vst [vmem:[#allocation13_spill] sm:$0xff] %v9746_v4  ;;  %v9749_v32 = vadd.f32 %v3598_v31, %v9450_v2 }
 0x269   : > { %v3600_v7 = vpop.f32.mrf.mxu1  ;;  %v9751_v1 = vpop.f32.mrf.mxu0 }
 0x26a   : > { %v9755_v35 = vadd.f32 %v3600_v7, %v10559_v46 }
 0x26b   : > { %v3602_v38 = vpop.f32.mrf.mxu1  ;;  %v9758_v45 = vpop.f32.mrf.mxu0 }
 0x26c   : > { %10560 = vst [vmem:[#allocation28_spill] sm:$0xff] %v9755_v35  ;;  %v9761_v24 = vadd.f32 %v3602_v38, %v10561_v18  ;;  %v10564_v35 = vld [vmem:[#allocation32_spill] sm:$0xff] }
 0x26d   : > { %v3606_v51 = vpop.f32.mrf.mxu1  ;;  %v9763_v4 = vpop.f32.mrf.mxu0  ;;  %5225 = vmatmul.mubr.bf16.gmra.mxu1 %v7792_v19  ;;  %5418 = vmatmul.mubr.bf16.gmra.mxu0 %v9491_v49  ;;  %v7800_v49 = vld [vmem:[%s8035_s21 + $0x2dc] ss:$24 sps:$4 sm:$0xff]  }
 0x26e   : > { %10562 = vst [vmem:[#allocation29_spill] sm:$0xff] %v9761_v24  ;;  %v9767_v2 = vadd.f32 %v3606_v51, %v9465_v54  ;;  %5234 = vmatprep.mubr.bf16.mxu1 %v7797_v13  ;;  %5427 = vmatprep.mubr.bf16.mxu0 %v9498_v0  ;;  %v7795_v24 = vld [vmem:[%s8035_s21 + $0x2a8] ss:$24 sps:$4 sm:$0xff]  }
 0x26f   : > { %v3608_v46 = vpop.f32.mrf.mxu1  ;;  %v9770_v31 = vpop.f32.mrf.mxu0  ;;  %v10567_v13 = vld [vmem:[#allocation33_spill] sm:$0xff] }
 0x270   : > { %10563 = vst [vmem:[#allocation16_spill] sm:$0xff] %v9767_v2  ;;  %v9773_v7 = vadd.f32 %v3608_v46, %v9472_v37 }
 0x271   : > { %v3610_v38 = vpop.f32.mrf.mxu1  ;;  %v9775_v18 = vpop.f32.mrf.mxu0 }
 0x272   : > { %v9779_v19 = vadd.f32 %v3610_v38, %v10564_v35 }
 0x273   : > { %v3612_v54 = vpop.f32.mrf.mxu1  ;;  %v9782_v51 = vpop.f32.mrf.mxu0 }
 0x274   : > { %10565 = vst [vmem:[#allocation17_spill] sm:$0xff] %v9779_v19  ;;  %10566 = vst [vmem:[#allocation18_spill] sm:$0xff] %v9782_v51  ;;  %v9785_v0 = vadd.f32 %v3612_v54, %v10567_v13  ;;  %v7806_v51 = vld [vmem:[%s8035_s21 + $0x314] ss:$24 sps:$4 sm:$0xff]  }
 0x275   : > { %v3616_v2 = vpop.f32.mrf.mxu1  ;;  %v9787_v37 = vpop.f32.mrf.mxu0  ;;  %5235 = vmatmul.mubr.bf16.gmra.mxu1 %v7795_v24  ;;  %5428 = vmatmul.mubr.bf16.gmra.mxu0 %v9513_v30  ;;  %v7803_v30 = vld [vmem:[%s8035_s21 + $0x30c] ss:$24 sps:$4 sm:$0xff]  }
 0x276   : > { %10568 = vst [vmem:[#allocation19_spill] sm:$0xff] %v9785_v0  ;;  %10569 = vst [vmem:[#allocation20_spill] sm:$0xff] %v9787_v37  ;;  %v9791_v46 = vadd.f32 %v3616_v2, %v9487_v29  ;;  %5244 = vmatprep.mubr.bf16.mxu1 %v7800_v49  ;;  %5437 = vmatprep.mubr.bf16.mxu0 %v9520_v40  ;;  %v7798_v0 = vld [vmem:[%s8035_s21 + $0x2d8] ss:$24 sps:$4 sm:$0xff]   ;;  %v10573_v37 = vld [vmem:[#allocation34_spill] sm:$0xff] }
 0x277   : > { %v3618_v35 = vpop.f32.mrf.mxu1  ;;  %v9794_v38 = vpop.f32.mrf.mxu0  ;;  %v10576_v40 = vld [vmem:[#allocation35_spill] sm:$0xff] }
 0x278   : > { %10570 = vst [vmem:[#allocation21_spill] sm:$0xff] %v9791_v46  ;;  %v9797_v19 = vadd.f32 %v3618_v35, %v9494_v22  ;;  %v7804_v46 = vld [vmem:[%s8035_s21 + $0x310] ss:$24 sps:$4 sm:$0xff]  }
 0x279   : > { %v3620_v54 = vpop.f32.mrf.mxu1  ;;  %v9799_v13 = vpop.f32.mrf.mxu0 }
 0x27a   : > { %10571 = vst [vmem:[#allocation22_spill] sm:$0xff] %v9797_v19  ;;  %10572 = vst [vmem:[#allocation30_spill] sm:$0xff] %v9799_v13  ;;  %v9803_v24 = vadd.f32 %v3620_v54, %v10573_v37  ;;  %v10581_v19 = vld [vmem:[#allocation36_spill] sm:$0xff] }
 0x27b   : > { %v3622_v29 = vpop.f32.mrf.mxu1  ;;  %v9807_v2 = vpop.f32.mrf.mxu0  ;;  %v7812_v13 = vld [vmem:[%s8035_s21 + $0x344] ss:$24 sps:$4 sm:$0xff]  }
 0x27c   : > { %10574 = vst [vmem:[#allocation31_spill] sm:$0xff] %v9803_v24  ;;  %10575 = vst [vmem:[#allocation32_spill] sm:$0xff] %v9807_v2  ;;  %v9810_v49 = vadd.f32 %v3622_v29, %v10576_v40 }
 0x27d   : > { %v3626_v22 = vpop.f32.mrf.mxu1  ;;  %v9812_v35 = vpop.f32.mrf.mxu0  ;;  %5245 = vmatmul.mubr.bf16.gmra.mxu1 %v7798_v0  ;;  %5438 = vmatmul.mubr.bf16.gmra.mxu0 %v9535_v11  ;;  %v7809_v11 = vld [vmem:[%s8035_s21 + $0x33c] ss:$24 sps:$4 sm:$0xff]  }
 0x27e   : > { %10577 = vst [vmem:[#allocation33_spill] sm:$0xff] %v9810_v49  ;;  %10578 = vst [vmem:[#allocation34_spill] sm:$0xff] %v9812_v35  ;;  %v9816_v37 = vadd.f32 %v3626_v22, %v9509_v44  ;;  %5254 = vmatprep.mubr.bf16.mxu1 %v7803_v30  ;;  %5447 = vmatprep.mubr.bf16.mxu0 %v7806_v51  ;;  %v7801_v49 = vld [vmem:[%s8035_s21 + $0x308] ss:$24 sps:$4 sm:$0xff]  }
 0x27f   : > { %v3628_v54 = vpop.f32.mrf.mxu1  ;;  %v9818_v24 = vpop.f32.mrf.mxu0  ;;  %v10584_v35 = vld [vmem:[#allocation37_spill] sm:$0xff]  ;;  %v10587_v30 = vld [vmem:[#allocation38_spill] sm:$0xff] }
 0x280   : > { %10579 = vst [vmem:[#allocation35_spill] sm:$0xff] %v9816_v37  ;;  %10580 = vst [vmem:[#allocation43_spill] sm:$0xff] %v9818_v24  ;;  %v9821_v2 = vadd.f32 %v3628_v54, %v10581_v19 }
 0x281   : > { %v3630_v29 = vpop.f32.mrf.mxu1  ;;  %v9823_v40 = vpop.f32.mrf.mxu0 }
 0x282   : > { %10582 = vst [vmem:[#allocation36_spill] sm:$0xff] %v9821_v2  ;;  %10583 = vst [vmem:[#allocation44_spill] sm:$0xff] %v9823_v40  ;;  %v9828_v0 = vadd.f32 %v3630_v29, %v10584_v35  ;;  %v10590_v2 = vld [vmem:[#allocation39_spill] sm:$0xff] }
 0x283   : > { %v3632_v44 = vpop.f32.mrf.mxu1  ;;  %v9832_v51 = vpop.f32.mrf.mxu0 }
 0x284   : > { %10585 = vst [vmem:[#allocation37_spill] sm:$0xff] %v9828_v0  ;;  %10586 = vst [vmem:[#allocation45_spill] sm:$0xff] %v9832_v51  ;;  %v9835_v22 = vadd.f32 %v3632_v44, %v10587_v30  ;;  %v10591_v0 = vld [vmem:[#allocation40_spill] sm:$0xff] }
 0x285   : > { %v3636_v19 = vpop.f32.mrf.mxu1  ;;  %v9837_v54 = vpop.f32.mrf.mxu0  ;;  %5255 = vmatmul.mubr.bf16.gmra.mxu1 %v7801_v49  ;;  %5448 = vmatmul.mubr.bf16.gmra.mxu0 %v7804_v46  ;;  %v7807_v44 = vld [vmem:[%s8035_s21 + $0x338] ss:$24 sps:$4 sm:$0xff]  }
 0x286   : > { %10588 = vst [vmem:[#allocation38_spill] sm:$0xff] %v9835_v22  ;;  %10589 = vst [vmem:[#allocation46_spill] sm:$0xff] %v9837_v54  ;;  %v9840_v40 = vadd.f32 %v3636_v19, %v10590_v2  ;;  %5264 = vmatprep.mubr.bf16.mxu1 %v7809_v11  ;;  %5457 = vmatprep.mubr.bf16.mxu0 %v7812_v13  ;;  %v7810_v30 = vld [vmem:[%s8035_s21 + $0x340] ss:$24 sps:$4 sm:$0xff]   ;;  %v10595_v2 = vld [vmem:[#allocation42_spill] sm:$0xff] }
 0x287   : > { %v3638_v35 = vpop.f32.mrf.mxu1  ;;  %v9842_v29 = vpop.f32.mrf.mxu0  ;;  %v10593_v22 = vld [vmem:[#allocation41_spill] sm:$0xff] }
 0x288   : > { %v9845_v37 = vadd.f32 %v3638_v35, %v10591_v0 }
 0x289   : > { %v3640_v51 = vpop.f32.mrf.mxu1  ;;  %v9847_v24 = vpop.f32.mrf.mxu0 }
 0x28a   : > { %10592 = vst [vmem:[#allocation39_spill] sm:$0xff] %v9845_v37  ;;  %v9852_v54 = vadd.f32 %v3640_v51, %v10593_v22 }
 0x28b   : > { %v3642_v46 = vpop.f32.mrf.mxu1  ;;  %v9854_v49 = vpop.f32.mrf.mxu0 }
 0x28c   : > { %10594 = vst [vmem:[#allocation40_spill] sm:$0xff] %v9852_v54  ;;  %v9857_v11 = vadd.f32 %v3642_v46, %v10595_v2 }
 0x28d   : > { %v3646_v13 = vpop.f32.mrf.mxu1  ;;  %v9859_v19 = vpop.f32.mrf.mxu0  ;;  %5265 = vmatmul.mubr.bf16.gmra.mxu1 %v7807_v44  ;;  %5458 = vmatmul.mubr.bf16.gmra.mxu0 %v7810_v30  ;;  %v10600_v44 = vld [vmem:[#allocation23_spill] sm:$0xff] }
 0x28e   : > { %10596 = vst [vmem:[#allocation41_spill] sm:$0xff] %v9857_v11  ;;  %v9862_v0 = vadd.f32 %v3646_v13, %v9550_v33 }
 0x28f   : > { %v3648_v35 = vpop.f32.mrf.mxu1  ;;  %v9864_v37 = vpop.f32.mrf.mxu0 }
 0x290   : > { %10597 = vst [vmem:[#allocation42_spill] sm:$0xff] %v9862_v0  ;;  %v9867_v51 = vadd.f32 %v3648_v35, %v9555_v10 }
 0x291   : > { %v3650_v22 = vpop.f32.mrf.mxu1  ;;  %v9869_v54 = vpop.f32.mrf.mxu0 }
 0x292   : > { %10598 = vst [vmem:[#allocation47_spill] sm:$0xff] %v9867_v51  ;;  %v9872_v46 = vadd.f32 %v3650_v22, %v9560_v39 }
 0x293   : > { %v3652_v2 = vpop.f32.mrf.mxu1  ;;  %v9874_v11 = vpop.f32.mrf.mxu0 }
 0x294   : > { %10599 = vst [vmem:[#allocation48_spill] sm:$0xff] %v9872_v46  ;;  %v9877_v30 = vadd.f32 %v3652_v2, %v10600_v44 }
 0x295   : > { %v3656_v33 = vpop.f32.mrf.mxu1  ;;  %v9879_v13 = vpop.f32.mrf.mxu0 }
 0x296   : > { %10601 = vst [vmem:[#allocation23_spill] sm:$0xff] %v9877_v30  ;;  %v9882_v0 = vadd.f32 %v3656_v33, %v9566_v42 }
 0x297   : > { %v3658_v10 = vpop.f32.mrf.mxu1  ;;  %v9884_v35 = vpop.f32.mrf.mxu0 }
 0x298   : > { %10602 = vst [vmem:[#allocation49_spill] sm:$0xff] %v9882_v0  ;;  %v9887_v51 = vadd.f32 %v3658_v10, %v9571_v41 }
 0x299   : > { %v3660_v39 = vpop.f32.mrf.mxu1  ;;  %v9889_v22 = vpop.f32.mrf.mxu0 }
 0x29a   : > { %10603 = vst [vmem:[#allocation50_spill] sm:$0xff] %v9887_v51  ;;  %v9892_v46 = vadd.f32 %v3660_v39, %v9576_v58 }
 0x29b   : > { %v3662_v2 = vpop.f32.mrf.mxu1  ;;  %v9894_v44 = vpop.f32.mrf.mxu0 }
 0x29c   : > { %10604 = vst [vmem:[#allocation51_spill] sm:$0xff] %v9892_v46  ;;  %v9897_v30 = vadd.f32 %v3662_v2, %v9579_v21 }
 0x29d   : > { %v3666_v42 = vpop.f32.mrf.mxu1  ;;  %v9899_v33 = vpop.f32.mrf.mxu0 }
 0x29e   : > { %10605 = vst [vmem:[#allocation52_spill] sm:$0xff] %v9897_v30  ;;  %v9902_v0 = vadd.f32 %v3666_v42, %v9582_v20 }
 0x29f   : > { %v3668_v41 = vpop.f32.mrf.mxu1  ;;  %v9904_v10 = vpop.f32.mrf.mxu0 }
 0x2a0   : > { %10606 = vst [vmem:[#allocation53_spill] sm:$0xff] %v9902_v0  ;;  %v9907_v51 = vadd.f32 %v3668_v41, %v9587_v15 }
 0x2a1   : > { %v3670_v58 = vpop.f32.mrf.mxu1  ;;  %v9909_v39 = vpop.f32.mrf.mxu0 }
 0x2a2   : > { %10607 = vst [vmem:[#allocation54_spill] sm:$0xff] %v9907_v51  ;;  %v9912_v46 = vadd.f32 %v3670_v58, %v9592_v23 }
 0x2a3   : > { %v3672_v21 = vpop.f32.mrf.mxu1  ;;  %v9914_v2 = vpop.f32.mrf.mxu0 }
 0x2a4   : > { %10608 = vst [vmem:[#allocation55_spill] sm:$0xff] %v9912_v46  ;;  %v9917_v30 = vadd.f32 %v3672_v21, %v9595_v28 }
 0x2a5   : > { %v3676_v20 = vpop.f32.mrf.mxu1  ;;  %v9919_v42 = vpop.f32.mrf.mxu0 }
 0x2a6   : > { %10609 = vst [vmem:[#allocation56_spill] sm:$0xff] %v9917_v30  ;;  %v9922_v0 = vadd.f32 %v3676_v20, %v9598_v25 }
 0x2a7   : > { %v3678_v15 = vpop.f32.mrf.mxu1  ;;  %v9924_v41 = vpop.f32.mrf.mxu0 }
 0x2a8   : > { %10610 = vst [vmem:[#allocation57_spill] sm:$0xff] %v9922_v0  ;;  %v9927_v51 = vadd.f32 %v3678_v15, %v9603_v56 }
 0x2a9   : > { %v3680_v23 = vpop.f32.mrf.mxu1  ;;  %v9929_v58 = vpop.f32.mrf.mxu0 }
 0x2aa   : > { %10611 = vst [vmem:[#allocation58_spill] sm:$0xff] %v9927_v51  ;;  %10612 = vst [vmem:[#allocation59_spill] sm:$0xff] %v9929_v58  ;;  %v9932_v46 = vadd.f32 %v3680_v23, %v9608_v8  ;;  %v10619_v51 = vld [vmem:[#allocation24_spill] sm:$0xff] }
 0x2ab   : > { %v3682_v28 = vpop.f32.mrf.mxu1  ;;  %v9934_v21 = vpop.f32.mrf.mxu0 }
 0x2ac   : > { %10613 = vst [vmem:[#allocation60_spill] sm:$0xff] %v9932_v46  ;;  %10614 = vst [vmem:[#allocation61_spill] sm:$0xff] %v9934_v21  ;;  %v9937_v30 = vadd.f32 %v3682_v28, %v9611_v9  ;;  %v10622_v46 = vld [vmem:[#allocation25_spill] sm:$0xff] }
 0x2ad   : > { %v3686_v25 = vpop.f32.mrf.mxu1  ;;  %v9939_v20 = vpop.f32.mrf.mxu0 }
 0x2ae   : > { %10615 = vst [vmem:[#allocation62_spill] sm:$0xff] %v9937_v30  ;;  %10616 = vst [vmem:[#allocation63_spill] sm:$0xff] %v9939_v20  ;;  %v9942_v0 = vadd.f32 %v3686_v25, %v9614_v48  ;;  %v10625_v30 = vld [vmem:[#allocation26_spill] sm:$0xff] }
 0x2af   : > { %v3688_v56 = vpop.f32.mrf.mxu1  ;;  %v9944_v15 = vpop.f32.mrf.mxu0 }
 0x2b0   : > { %10617 = vst [vmem:[#allocation64_spill] sm:$0xff] %v9942_v0  ;;  %10618 = vst [vmem:[#allocation65_spill] sm:$0xff] %v9944_v15  ;;  %v9947_v58 = vadd.f32 %v3688_v56, %v10619_v51  ;;  %v10628_v0 = vld [vmem:[#allocation5_spill] sm:$0xff] }
 0x2b1   : > { %v3690_v8 = vpop.f32.mrf.mxu1  ;;  %v9949_v23 = vpop.f32.mrf.mxu0 }
 0x2b2   : > { %10620 = vst [vmem:[#allocation24_spill] sm:$0xff] %v9947_v58  ;;  %10621 = vst [vmem:[#allocation66_spill] sm:$0xff] %v9949_v23  ;;  %v9952_v21 = vadd.f32 %v3690_v8, %v10622_v46  ;;  %v10630_v58 = vld [vmem:[#allocation11_spill] sm:$0xff] }
 0x2b3   : > { %v3692_v9 = vpop.f32.mrf.mxu1  ;;  %v9954_v28 = vpop.f32.mrf.mxu0 }
 0x2b4   : > { %10623 = vst [vmem:[#allocation25_spill] sm:$0xff] %v9952_v21  ;;  %10624 = vst [vmem:[#allocation67_spill] sm:$0xff] %v9954_v28  ;;  %v9957_v20 = vadd.f32 %v3692_v9, %v10625_v30  ;;  %v10632_v21 = vld [vmem:[#allocation6_spill] sm:$0xff] }
 0x2b5   : > { %v3696_v48 = vpop.f32.mrf.mxu1  ;;  %v9959_v25 = vpop.f32.mrf.mxu0 }
 0x2b6   : > { %10626 = vst [vmem:[#allocation26_spill] sm:$0xff] %v9957_v20  ;;  %10627 = vst [vmem:[#allocation68_spill] sm:$0xff] %v9959_v25  ;;  %v9962_v15 = vadd.f32 %v3696_v48, %v10628_v0  ;;  %v10635_v20 = vld [vmem:[#allocation7_spill] sm:$0xff] }
 0x2b7   : > { %v3698_v51 = vpop.f32.mrf.mxu1  ;;  %v9964_v56 = vpop.f32.mrf.mxu0 }
 0x2b8   : > { %10629 = vst [vmem:[#allocation5_spill] sm:$0xff] %v9962_v15  ;;  %v9967_v23 = vadd.f32 %v3698_v51, %v10630_v58 }
 0x2b9   : > { %v3700_v46 = vpop.f32.mrf.mxu1  ;;  %v9969_v8 = vpop.f32.mrf.mxu0 }
 0x2ba   : > { %10631 = vst [vmem:[#allocation11_spill] sm:$0xff] %v9967_v23  ;;  %v9972_v28 = vadd.f32 %v3700_v46, %v10632_v21 }
 0x2bb   : > { %v3702_v30 = vpop.f32.mrf.mxu1  ;;  %v9974_v9 = vpop.f32.mrf.mxu0 }
 0x2bc   : > { %10633 = vst [vmem:[#allocation6_spill] sm:$0xff] %v9972_v28  ;;  %10634 = vst [vmem:[#allocation69_spill] sm:$0xff] %v9974_v9  ;;  %v9977_v25 = vadd.f32 %v3702_v30, %v10635_v20  ;;  %v10640_v28 = vld [vmem:[#allocation8_spill] sm:$0xff] }
 0x2bd   : > { %v3706_v0 = vpop.f32.mrf.mxu1  ;;  %v9979_v48 = vpop.f32.mrf.mxu0 }
 0x2be   : > { %10636 = vst [vmem:[#allocation7_spill] sm:$0xff] %v9977_v25  ;;  %10637 = vst [vmem:[#allocation70_spill] sm:$0xff] %v9979_v48  ;;  %v9982_v15 = vadd.f32 %v3706_v0, %v9646_v50  ;;  %v10642_v25 = vld [vmem:[#allocation14_spill] sm:$0xff] }
 0x2bf   : > { %v3708_v58 = vpop.f32.mrf.mxu1  ;;  %v9984_v51 = vpop.f32.mrf.mxu0 }
 0x2c0   : > { %10638 = vst [vmem:[#allocation71_spill] sm:$0xff] %v9982_v15  ;;  %v9987_v23 = vadd.f32 %v3708_v58, %v9650_v14 }
 0x2c1   : > { %v3710_v21 = vpop.f32.mrf.mxu1  ;;  %v9989_v46 = vpop.f32.mrf.mxu0 }
 0x2c2   : > { %10639 = vst [vmem:[#allocation72_spill] sm:$0xff] %v9987_v23  ;;  %v9992_v9 = vadd.f32 %v3710_v21, %v10640_v28 }
 0x2c3   : > { %v3712_v20 = vpop.f32.mrf.mxu1  ;;  %v9994_v30 = vpop.f32.mrf.mxu0 }
 0x2c4   : > { %10641 = vst [vmem:[#allocation8_spill] sm:$0xff] %v9992_v9  ;;  %v9997_v48 = vadd.f32 %v3712_v20, %v10642_v25 }
 0x2c5   : > { %v3716_v50 = vpop.f32.mrf.mxu1  ;;  %v9999_v0 = vpop.f32.mrf.mxu0 }
 0x2c6   : > { %10643 = vst [vmem:[#allocation14_spill] sm:$0xff] %v9997_v48  ;;  %10644 = vst [vmem:[#allocation73_spill] sm:$0xff] %v9999_v0  ;;  %v10002_v15 = vadd.f32 %v3716_v50, %v9662_v63  ;;  %v5534_v63 = vlaneseq }
 0x2c7   : > { %v3718_v14 = vpop.f32.mrf.mxu1  ;;  %v10004_v58 = vpop.f32.mrf.mxu0 }
 0x2c8   : > { %10645 = vst [vmem:[#allocation74_spill] sm:$0xff] %v10002_v15  ;;  %10646 = vst [vmem:[#allocation75_spill] sm:$0xff] %v10004_v58  ;;  %v10007_v23 = vadd.f32 %v3718_v14, %v9666_v16 }
 0x2c9   : > { %v3720_v28 = vpop.f32.mrf.mxu1  ;;  %v10009_v21 = vpop.f32.mrf.mxu0 }
 0x2ca   : > { %10647 = vst [vmem:[#allocation76_spill] sm:$0xff] %v10007_v23  ;;  %10648 = vst [vmem:[#allocation77_spill] sm:$0xff] %v10009_v21  ;;  %v10012_v9 = vadd.f32 %v3720_v28, %v9670_v60  ;;  %v5535_v60 = vshrl.u32 %v5534_v63, 7 }
 0x2cb   : > { %v3722_v25 = vpop.f32.mrf.mxu1  ;;  %v10014_v20 = vpop.f32.mrf.mxu0 }
 0x2cc   : > { %10649 = vst [vmem:[#allocation78_spill] sm:$0xff] %v10012_v9  ;;  %10650 = vst [vmem:[#allocation79_spill] sm:$0xff] %v10014_v20  ;;  %v10017_v48 = vadd.f32 %v3722_v25, %v9674_v12 }
 0x2cd   : > { %v3726_v50 = vpop.f32.mrf.mxu1  ;;  %v10019_v15 = vpop.f32.mrf.mxu0 }
 0x2ce   : > { %10651 = vst [vmem:[#allocation80_spill] sm:$0xff] %v10017_v48  ;;  %10652 = vst [vmem:[#allocation81_spill] sm:$0xff] %v10019_v15  ;;  %v10022_v58 = vadd.f32 %v3726_v50, %v9678_v36  ;;  %v5536_v50 = vsub.s32 0, %v5535_v60 }
 0x2cf   : > { %v3728_v16 = vpop.f32.mrf.mxu1  ;;  %v10024_v14 = vpop.f32.mrf.mxu0 }
 0x2d0   : > { %10653 = vst [vmem:[#allocation82_spill] sm:$0xff] %v10022_v58  ;;  %10654 = vst [vmem:[#allocation83_spill] sm:$0xff] %v10024_v14  ;;  %v10027_v23 = vadd.f32 %v3728_v16, %v9682_v52  ;;  %v5532_v52 = vld [vmem:[%s10436_s2] sm:$0x3]  ;;  %v5540_v16 = vsub.s32 1, %v5535_v60 }
 0x2d1   : > { %v3730_v28 = vpop.f32.mrf.mxu1  ;;  %v10029_v9 = vpop.f32.mrf.mxu0 }
 0x2d2   : > { %10655 = vst [vmem:[#allocation84_spill] sm:$0xff] %v10027_v23  ;;  %10656 = vst [vmem:[#allocation85_spill] sm:$0xff] %v10029_v9  ;;  %v10032_v12 = vadd.f32 %v3730_v28, %v9686_v53  ;;  %v5608_v53 = vld [vmem:[%s10437_s3] sm:$0x3]  ;;  %v10053_v15 = vrot.slane %v5532_v52, %v5540_v16 }
 0x2d3   : > { %v3732_v25 = vpop.f32.mrf.mxu1  ;;  %v10034_v48 = vpop.f32.mrf.mxu0  ;;  %v10056_v20 = vrot.slane %v5608_v53, %v5540_v16 }
 0x2d4   : > { %10657 = vst [vmem:[#allocation86_spill] sm:$0xff] %v10032_v12  ;;  %10658 = vst [vmem:[#allocation87_spill] sm:$0xff] %v10034_v48  ;;  %v10037_v36 = vadd.f32 %v3732_v25, %v9692_v43  ;;  %v10046_v43 = vrot.slane %v5532_v52, %v5536_v50 }
 0x2d5   : > { %v5116_v58 = vpop.f32.mrf.mxu1  ;;  %v5309_v14 = vpop.f32.mrf.mxu0 }
 0x2d6   : > { %10659 = vst [vmem:[#allocation88_spill] sm:$0xff] %v10037_v36  ;;  %v5117_v63 = vadd.f32 %v5116_v58, %v9689_v6  ;;  %v10050_v36 = vrot.slane %v5608_v53, %v5536_v50 }
 0x2d7   : > { %v5118_v28 = vpop.f32.mrf.mxu1  ;;  %v5311_v12 = vpop.f32.mrf.mxu0 }
 0x2d8   : > { %v5310_v48 = vadd.f32 %v5309_v14, %v5117_v63  ;;  %v5119_v25 = vadd.f32 %v5118_v28, %v9698_v5 }
 0x2d9   : > { %v5120_v23 = vpop.f32.mrf.mxu1  ;;  %v5313_v9 = vpop.f32.mrf.mxu0 }
 0x2da   : > { %v5468_v6 = vadd.f32 %v5310_v48, %v9695_v17  ;;  %v5312_v58 = vadd.f32 %v5311_v12, %v5119_v25  ;;  %v5121_v60 = vadd.f32 %v5120_v23, %v9703_v61 }
 0x2db   : > { %v5122_v21 = vpop.f32.mrf.mxu1  ;;  %v5315_v14 = vpop.f32.mrf.mxu0 }
 0x2dc   : > { %v5544_v5 = vmul.f32 %v10046_v43, %v5468_v6  ;;  %v5469_v50 = vadd.f32 %v5312_v58, %v9701_v59  ;;  %v5314_v63 = vadd.f32 %v5313_v9, %v5121_v60  ;;  %v5123_v28 = vadd.f32 %v5122_v21, %v9710_v3  ;;  %v10660_v21 = vld [vmem:[#allocation15_spill] sm:$0xff] }
 0x2dd   : > { %v5126_v0 = vpop.f32.mrf.mxu1  ;;  %v5319_v17 = vpop.f32.mrf.mxu0 }
 0x2de   : > { %v5620_v48 = vadd.f32 %v10050_v36, %v5544_v5  ;;  %v5545_v12 = vmul.f32 %v10053_v15, %v5469_v50  ;;  %v5470_v61 = vadd.f32 %v5314_v63, %v9707_v57  ;;  %v5316_v23 = vadd.f32 %v5315_v14, %v5123_v28  ;;  %v10661_v50 = vld [vmem:[#allocation9_spill] sm:$0xff] }
 0x2df   : > { %v5127_v52 = vadd.f32 %v5126_v0, %v9715_v34  ;;  %v5128_v53 = vpop.f32.mrf.mxu1  ;;  %v5321_v16 = vpop.f32.mrf.mxu0 }
 0x2e0   : > { %v5684_v25 = vmax.f32 %v5620_v48, 0.0  ;;  %v5621_v6 = vadd.f32 %v10056_v20, %v5545_v12  ;;  %v5546_v59 = vmul.f32 %v10046_v43, %v5470_v61  ;;  %v5471_v3 = vadd.f32 %v5316_v23, %v9713_v62 }
 0x2e1   : > { %v5320_v9 = vadd.f32 %v5319_v17, %v5127_v52  ;;  %v5129_v58 = vadd.f32 %v5128_v53, %v10660_v21  ;;  %v5130_v60 = vpop.f32.mrf.mxu1  ;;  %v5323_v5 = vpop.f32.mrf.mxu0 }
 0x2e2   : > { %5748 = vst [vmem:[%s10071_s26] sm:$0xff] %v5684_v25  ;;  %v5685_v57 = vmax.f32 %v5621_v6, 0.0  ;;  %v5622_v34 = vadd.f32 %v10050_v36, %v5546_v59  ;;  %v5547_v0 = vmul.f32 %v10053_v15, %v5471_v3  ;;  %v5131_v14 = vadd.f32 %v5130_v60, %v9727_v27  ;;  %v10662_v3 = vld [vmem:[#allocation27_spill] sm:$0xff] }
 0x2e3   : > { %v5472_v62 = vadd.f32 %v5320_v9, %v10661_v50  ;;  %v5322_v63 = vadd.f32 %v5321_v16, %v5129_v58  ;;  %v5132_v28 = vpop.f32.mrf.mxu1  ;;  %v5325_v17 = vpop.f32.mrf.mxu0 }
 0x2e4   : > { %5749 = vst [vmem:[%s10071_s26 + $0x8] sm:$0xff] %v5685_v57  ;;  %v5686_v48 = vmax.f32 %v5622_v34, 0.0  ;;  %v5623_v12 = vadd.f32 %v10056_v20, %v5547_v0  ;;  %v5324_v61 = vadd.f32 %v5323_v5, %v5131_v14  ;;  %v5133_v23 = vadd.f32 %v5132_v28, %v9734_v55  ;;  %v10664_v0 = vld [vmem:[#allocation13_spill] sm:$0xff] }
 0x2e5   : > { %v5548_v52 = vmul.f32 %v10046_v43, %v5472_v62  ;;  %v5473_v53 = vadd.f32 %v5322_v63, %v9725_v47  ;;  %v5136_v25 = vpop.f32.mrf.mxu1  ;;  %v5329_v6 = vpop.f32.mrf.mxu0  ;;  %v10663_v47 = vld [vmem:[#allocation10_spill] sm:$0xff] }
 0x2e6   : > { %5750 = vst [vmem:[%s10071_s26 + $0x10] sm:$0xff] %v5686_v48  ;;  %v5687_v27 = vmax.f32 %v5623_v12, 0.0  ;;  %v5474_v16 = vadd.f32 %v5324_v61, %v9731_v26  ;;  %v5326_v59 = vadd.f32 %v5325_v17, %v5133_v23  ;;  %v5137_v9 = vadd.f32 %v5136_v25, %v10662_v3  ;;  %v10665_v48 = vld [vmem:[#allocation12_spill] sm:$0xff] }
 0x2e7   : > { %v5624_v21 = vadd.f32 %v10050_v36, %v5548_v52  ;;  %v5549_v58 = vmul.f32 %v10053_v15, %v5473_v53  ;;  %v5138_v60 = vpop.f32.mrf.mxu1  ;;  %v5331_v55 = vpop.f32.mrf.mxu0 }
 0x2e8   : > { %5751 = vst [vmem:[%s10071_s26 + $0x18] sm:$0xff] %v5687_v27  ;;  %v5550_v5 = vmul.f32 %v10046_v43, %v5474_v16  ;;  %v5475_v57 = vadd.f32 %v5326_v59, %v10663_v47  ;;  %v5330_v34 = vadd.f32 %v5329_v6, %v5137_v9  ;;  %v5139_v14 = vadd.f32 %v5138_v60, %v10664_v0  ;;  %v10666_v47 = vld [vmem:[#allocation28_spill] sm:$0xff] }
 0x2e9   : > { %v5688_v50 = vmax.f32 %v5624_v21, 0.0  ;;  %v5625_v26 = vadd.f32 %v10056_v20, %v5549_v58  ;;  %v5140_v62 = vpop.f32.mrf.mxu1  ;;  %v5333_v63 = vpop.f32.mrf.mxu0 }
 0x2ea   : > { %v5626_v28 = vadd.f32 %v10050_v36, %v5550_v5  ;;  %v5551_v17 = vmul.f32 %v10053_v15, %v5475_v57  ;;  %v5476_v12 = vadd.f32 %v5330_v34, %v10665_v48  ;;  %v5332_v61 = vadd.f32 %v5331_v55, %v5139_v14 }
 0x2eb   : > { %5752 = vst [vmem:[%s10071_s26 + $0x20] sm:$0xff] %v5688_v50  ;;  %v5689_v23 = vmax.f32 %v5625_v26, 0.0  ;;  %v5141_v52 = vadd.f32 %v5140_v62, %v9751_v1  ;;  %v5142_v53 = vpop.f32.mrf.mxu1  ;;  %v5335_v25 = vpop.f32.mrf.mxu0 }
 0x2ec   : > { %v5690_v6 = vmax.f32 %v5626_v28, 0.0  ;;  %v5627_v27 = vadd.f32 %v10056_v20, %v5551_v17  ;;  %v5552_v16 = vmul.f32 %v10046_v43, %v5476_v12  ;;  %v5477_v59 = vadd.f32 %v5332_v61, %v9749_v32  ;;  %v10668_v12 = vld [vmem:[#allocation16_spill] sm:$0xff] }
 0x2ed   : > { %5753 = vst [vmem:[%s10071_s26 + $0x28] sm:$0xff] %v5689_v23  ;;  %v5334_v3 = vadd.f32 %v5333_v63, %v5141_v52  ;;  %v5143_v9 = vadd.f32 %v5142_v53, %v9758_v45  ;;  %v5146_v21 = vpop.f32.mrf.mxu1  ;;  %v5339_v58 = vpop.f32.mrf.mxu0  ;;  %v10667_v63 = vld [vmem:[#allocation29_spill] sm:$0xff] }
 0x2ee   : > { %5754 = vst [vmem:[%s10071_s26 + $0x30] sm:$0xff] %v5690_v6  ;;  %v5691_v60 = vmax.f32 %v5627_v27, 0.0  ;;  %v5628_v1 = vadd.f32 %v10050_v36, %v5552_v16  ;;  %v5553_v55 = vmul.f32 %v10053_v15, %v5477_v59  ;;  %v5147_v5 = vadd.f32 %v5146_v21, %v9763_v4 }
 0x2ef   : > { %v5478_v57 = vadd.f32 %v5334_v3, %v10666_v47  ;;  %v5336_v34 = vadd.f32 %v5335_v25, %v5143_v9  ;;  %v5148_v0 = vpop.f32.mrf.mxu1  ;;  %v5341_v32 = vpop.f32.mrf.mxu0  ;;  %v10669_v3 = vld [vmem:[#allocation18_spill] sm:$0xff] }
 0x2f0   : > { %5755 = vst [vmem:[%s10071_s26 + $0x38] sm:$0xff] %v5691_v60  ;;  %v5692_v14 = vmax.f32 %v5628_v1, 0.0  ;;  %v5629_v45 = vadd.f32 %v10056_v20, %v5553_v55  ;;  %v5340_v50 = vadd.f32 %v5339_v58, %v5147_v5  ;;  %v5149_v26 = vadd.f32 %v5148_v0, %v9770_v31  ;;  %v10670_v5 = vld [vmem:[#allocation17_spill] sm:$0xff] }
 0x2f1   : > { %v5554_v62 = vmul.f32 %v10046_v43, %v5478_v57  ;;  %v5479_v28 = vadd.f32 %v5336_v34, %v10667_v63  ;;  %v5150_v17 = vpop.f32.mrf.mxu1  ;;  %v5343_v48 = vpop.f32.mrf.mxu0 }
 0x2f2   : > { %5756 = vst [vmem:[%s10071_s26 + $0x40] sm:$0xff] %v5692_v14  ;;  %v5693_v4 = vmax.f32 %v5629_v45, 0.0  ;;  %v5480_v61 = vadd.f32 %v5340_v50, %v10668_v12  ;;  %v5342_v23 = vadd.f32 %v5341_v32, %v5149_v26  ;;  %v5151_v52 = vadd.f32 %v5150_v17, %v9775_v18 }
 0x2f3   : > { %v5630_v53 = vadd.f32 %v10050_v36, %v5554_v62  ;;  %v5555_v25 = vmul.f32 %v10053_v15, %v5479_v28  ;;  %v5152_v6 = vpop.f32.mrf.mxu1  ;;  %v5345_v31 = vpop.f32.mrf.mxu0  ;;  %v10672_v62 = vld [vmem:[#allocation19_spill] sm:$0xff] }
 0x2f4   : > { %5757 = vst [vmem:[%s10071_s26 + $0x48] sm:$0xff] %v5693_v4  ;;  %v5556_v27 = vmul.f32 %v10046_v43, %v5480_v61  ;;  %v5481_v16 = vadd.f32 %v5342_v23, %v9773_v7  ;;  %v5344_v59 = vadd.f32 %v5343_v48, %v5151_v52  ;;  %v5153_v9 = vadd.f32 %v5152_v6, %v10669_v3  ;;  %v10671_v7 = vld [vmem:[#allocation20_spill] sm:$0xff]  ;;  %v10673_v52 = vld [vmem:[#allocation30_spill] sm:$0xff] }
 0x2f5   : > { %v5694_v21 = vmax.f32 %v5630_v53, 0.0  ;;  %v5631_v58 = vadd.f32 %v10056_v20, %v5555_v25  ;;  %v5156_v18 = vpop.f32.mrf.mxu1  ;;  %v5349_v60 = vpop.f32.mrf.mxu0  ;;  %v10674_v25 = vld [vmem:[#allocation21_spill] sm:$0xff] }
 0x2f6   : > { %v5632_v1 = vadd.f32 %v10050_v36, %v5556_v27  ;;  %v5557_v55 = vmul.f32 %v10053_v15, %v5481_v16  ;;  %v5482_v47 = vadd.f32 %v5344_v59, %v10670_v5  ;;  %v5346_v57 = vadd.f32 %v5345_v31, %v5153_v9  ;;  %v10675_v9 = vld [vmem:[#allocation32_spill] sm:$0xff] }
 0x2f7   : > { %5758 = vst [vmem:[%s10071_s26 + $0x50] sm:$0xff] %v5694_v21  ;;  %v5695_v34 = vmax.f32 %v5631_v58, 0.0  ;;  %v5157_v0 = vadd.f32 %v5156_v18, %v10671_v7  ;;  %v5158_v32 = vpop.f32.mrf.mxu1  ;;  %v5351_v14 = vpop.f32.mrf.mxu0  ;;  %v10676_v18 = vld [vmem:[#allocation22_spill] sm:$0xff] }
 0x2f8   : > { %v5696_v45 = vmax.f32 %v5632_v1, 0.0  ;;  %v5633_v50 = vadd.f32 %v10056_v20, %v5557_v55  ;;  %v5558_v26 = vmul.f32 %v10046_v43, %v5482_v47  ;;  %v5483_v63 = vadd.f32 %v5346_v57, %v10672_v62  ;;  %v10677_v47 = vld [vmem:[#allocation31_spill] sm:$0xff]  ;;  %v10678_v7 = vld [vmem:[#allocation34_spill] sm:$0xff]  ;;  %v10679_v62 = vld [vmem:[#allocation33_spill] sm:$0xff] }
 0x2f9   : > { %5759 = vst [vmem:[%s10071_s26 + $0x58] sm:$0xff] %v5695_v34  ;;  %v5350_v28 = vadd.f32 %v5349_v60, %v5157_v0  ;;  %v5159_v17 = vadd.f32 %v5158_v32, %v9794_v38  ;;  %v5160_v48 = vpop.f32.mrf.mxu1  ;;  %v5353_v4 = vpop.f32.mrf.mxu0 }
 0x2fa   : > { %5760 = vst [vmem:[%s10071_s26 + $0x60] sm:$0xff] %v5696_v45  ;;  %v5697_v12 = vmax.f32 %v5633_v50, 0.0  ;;  %v5634_v61 = vadd.f32 %v10050_v36, %v5558_v26  ;;  %v5559_v23 = vmul.f32 %v10053_v15, %v5483_v63  ;;  %v5161_v53 = vadd.f32 %v5160_v48, %v10673_v52 }
 0x2fb   : > { %v5484_v6 = vadd.f32 %v5350_v28, %v10674_v25  ;;  %v5352_v31 = vadd.f32 %v5351_v14, %v5159_v17  ;;  %v5162_v27 = vpop.f32.mrf.mxu1  ;;  %v5355_v16 = vpop.f32.mrf.mxu0  ;;  %v10680_v17 = vld [vmem:[#allocation43_spill] sm:$0xff] }
 0x2fc   : > { %5761 = vst [vmem:[%s10071_s26 + $0x68] sm:$0xff] %v5697_v12  ;;  %v5698_v59 = vmax.f32 %v5634_v61, 0.0  ;;  %v5635_v38 = vadd.f32 %v10056_v20, %v5559_v23  ;;  %v5354_v3 = vadd.f32 %v5353_v4, %v5161_v53  ;;  %v5163_v21 = vadd.f32 %v5162_v27, %v10675_v9  ;;  %v10681_v25 = vld [vmem:[#allocation35_spill] sm:$0xff] }
 0x2fd   : > { %v5560_v58 = vmul.f32 %v10046_v43, %v5484_v6  ;;  %v5485_v60 = vadd.f32 %v5352_v31, %v10676_v18  ;;  %v5166_v1 = vpop.f32.mrf.mxu1  ;;  %v5359_v55 = vpop.f32.mrf.mxu0  ;;  %v10683_v18 = vld [vmem:[#allocation36_spill] sm:$0xff] }
 0x2fe   : > { %5762 = vst [vmem:[%s10071_s26 + $0x70] sm:$0xff] %v5698_v59  ;;  %v5699_v5 = vmax.f32 %v5635_v38, 0.0  ;;  %v5486_v57 = vadd.f32 %v5354_v3, %v10677_v47  ;;  %v5356_v34 = vadd.f32 %v5355_v16, %v5163_v21  ;;  %v5167_v0 = vadd.f32 %v5166_v1, %v10678_v7  ;;  %v10682_v16 = vld [vmem:[#allocation44_spill] sm:$0xff] }
 0x2ff   : > { %v5636_v32 = vadd.f32 %v10050_v36, %v5560_v58  ;;  %v5561_v14 = vmul.f32 %v10053_v15, %v5485_v60  ;;  %v5168_v45 = vpop.f32.mrf.mxu1  ;;  %v5361_v50 = vpop.f32.mrf.mxu0 }
 0x300   : > { %5763 = vst [vmem:[%s10071_s26 + $0x78] sm:$0xff] %v5699_v5  ;;  %v5562_v26 = vmul.f32 %v10046_v43, %v5486_v57  ;;  %v5487_v63 = vadd.f32 %v5356_v34, %v10679_v62  ;;  %v5360_v28 = vadd.f32 %v5359_v55, %v5167_v0  ;;  %v5169_v48 = vadd.f32 %v5168_v45, %v10680_v17  ;;  %v10684_v55 = vld [vmem:[#allocation45_spill] sm:$0xff] }
 0x301   : > { %v5700_v4 = vmax.f32 %v5636_v32, 0.0  ;;  %v5637_v12 = vadd.f32 %v10056_v20, %v5561_v14  ;;  %v5170_v61 = vpop.f32.mrf.mxu1  ;;  %v5363_v23 = vpop.f32.mrf.mxu0  ;;  %v10685_v32 = vld [vmem:[#allocation46_spill] sm:$0xff]  ;;  %v10686_v45 = vld [vmem:[#allocation37_spill] sm:$0xff] }
 0x302   : > { %v5638_v52 = vadd.f32 %v10050_v36, %v5562_v26  ;;  %v5563_v53 = vmul.f32 %v10053_v15, %v5487_v63  ;;  %v5488_v6 = vadd.f32 %v5360_v28, %v10681_v25  ;;  %v5362_v31 = vadd.f32 %v5361_v50, %v5169_v48 }
 0x303   : > { %5764 = vst [vmem:[%s10071_s26 + $0x80] sm:$0xff] %v5700_v4  ;;  %v5701_v27 = vmax.f32 %v5637_v12, 0.0  ;;  %v5171_v59 = vadd.f32 %v5170_v61, %v10682_v16  ;;  %v5172_v38 = vpop.f32.mrf.mxu1  ;;  %v5365_v3 = vpop.f32.mrf.mxu0  ;;  %v10687_v61 = vld [vmem:[#allocation38_spill] sm:$0xff] }
 0x304   : > { %v5702_v9 = vmax.f32 %v5638_v52, 0.0  ;;  %v5639_v21 = vadd.f32 %v10056_v20, %v5563_v53  ;;  %v5564_v58 = vmul.f32 %v10046_v43, %v5488_v6  ;;  %v5489_v60 = vadd.f32 %v5362_v31, %v10683_v18 }
 0x305   : > { %5765 = vst [vmem:[%s10071_s26 + $0x88] sm:$0xff] %v5701_v27  ;;  %v5364_v1 = vadd.f32 %v5363_v23, %v5171_v59  ;;  %v5173_v5 = vadd.f32 %v5172_v38, %v10684_v55  ;;  %v5176_v47 = vpop.f32.mrf.mxu1  ;;  %v5369_v57 = vpop.f32.mrf.mxu0 }
 0x306   : > { %5766 = vst [vmem:[%s10071_s26 + $0x90] sm:$0xff] %v5702_v9  ;;  %v5703_v34 = vmax.f32 %v5639_v21, 0.0  ;;  %v5640_v7 = vadd.f32 %v10050_v36, %v5564_v58  ;;  %v5565_v0 = vmul.f32 %v10053_v15, %v5489_v60  ;;  %v5177_v14 = vadd.f32 %v5176_v47, %v10685_v32  ;;  %v10688_v9 = vld [vmem:[#allocation39_spill] sm:$0xff]  ;;  %v10689_v47 = vld [vmem:[#allocation40_spill] sm:$0xff] }
 0x307   : > { %v5490_v50 = vadd.f32 %v5364_v1, %v10686_v45  ;;  %v5366_v26 = vadd.f32 %v5365_v3, %v5173_v5  ;;  %v5178_v62 = vpop.f32.mrf.mxu1  ;;  %v5371_v63 = vpop.f32.mrf.mxu0 }
 0x308   : > { %5767 = vst [vmem:[%s10071_s26 + $0x98] sm:$0xff] %v5703_v34  ;;  %v5704_v28 = vmax.f32 %v5640_v7, 0.0  ;;  %v5641_v17 = vadd.f32 %v10056_v20, %v5565_v0  ;;  %v5370_v48 = vadd.f32 %v5369_v57, %v5177_v14  ;;  %v5179_v4 = vadd.f32 %v5178_v62, %v9842_v29 }
 0x309   : > { %v5566_v12 = vmul.f32 %v10046_v43, %v5490_v50  ;;  %v5491_v23 = vadd.f32 %v5366_v26, %v10687_v61  ;;  %v5180_v52 = vpop.f32.mrf.mxu1  ;;  %v5373_v53 = vpop.f32.mrf.mxu0  ;;  %v10690_v26 = vld [vmem:[#allocation41_spill] sm:$0xff] }
 0x30a   : > { %5768 = vst [vmem:[%s10071_s26 + $0xa0] sm:$0xff] %v5704_v28  ;;  %v5705_v25 = vmax.f32 %v5641_v17, 0.0  ;;  %v5492_v6 = vadd.f32 %v5370_v48, %v9840_v40  ;;  %v5372_v31 = vadd.f32 %v5371_v63, %v5179_v4  ;;  %v5181_v27 = vadd.f32 %v5180_v52, %v9847_v24 }
 0x30b   : > { %v5642_v16 = vadd.f32 %v10050_v36, %v5566_v12  ;;  %v5567_v59 = vmul.f32 %v10053_v15, %v5491_v23  ;;  %v5182_v38 = vpop.f32.mrf.mxu1  ;;  %v5375_v29 = vpop.f32.mrf.mxu0  ;;  %v10691_v23 = vld [vmem:[#allocation42_spill] sm:$0xff] }
 0x30c   : > { %5769 = vst [vmem:[%s10071_s26 + $0xa8] sm:$0xff] %v5705_v25  ;;  %v5568_v3 = vmul.f32 %v10046_v43, %v5492_v6  ;;  %v5493_v21 = vadd.f32 %v5372_v31, %v10688_v9  ;;  %v5374_v58 = vadd.f32 %v5373_v53, %v5181_v27  ;;  %v5183_v18 = vadd.f32 %v5182_v38, %v9854_v49  ;;  %v10692_v38 = vld [vmem:[#allocation47_spill] sm:$0xff] }
 0x30d   : > { %v5706_v60 = vmax.f32 %v5642_v16, 0.0  ;;  %v5643_v40 = vadd.f32 %v10056_v20, %v5567_v59  ;;  %v5186_v24 = vpop.f32.mrf.mxu1  ;;  %v5379_v1 = vpop.f32.mrf.mxu0 }
 0x30e   : > { %v5644_v55 = vadd.f32 %v10050_v36, %v5568_v3  ;;  %v5569_v5 = vmul.f32 %v10053_v15, %v5493_v21  ;;  %v5494_v57 = vadd.f32 %v5374_v58, %v10689_v47  ;;  %v5376_v34 = vadd.f32 %v5375_v29, %v5183_v18  ;;  %v10693_v21 = vld [vmem:[#allocation48_spill] sm:$0xff] }
 0x30f   : > { %5770 = vst [vmem:[%s10071_s26 + $0xb0] sm:$0xff] %v5706_v60  ;;  %v5707_v7 = vmax.f32 %v5643_v40, 0.0  ;;  %v5187_v0 = vadd.f32 %v5186_v24, %v9859_v19  ;;  %v5188_v32 = vpop.f32.mrf.mxu1  ;;  %v5381_v49 = vpop.f32.mrf.mxu0 }
 0x310   : > { %v5708_v14 = vmax.f32 %v5644_v55, 0.0  ;;  %v5645_v45 = vadd.f32 %v10056_v20, %v5569_v5  ;;  %v5570_v50 = vmul.f32 %v10046_v43, %v5494_v57  ;;  %v5495_v62 = vadd.f32 %v5376_v34, %v10690_v26  ;;  %v10694_v5 = vld [vmem:[#allocation23_spill] sm:$0xff] }
 0x311   : > { %5771 = vst [vmem:[%s10071_s26 + $0xb8] sm:$0xff] %v5707_v7  ;;  %v5380_v63 = vadd.f32 %v5379_v1, %v5187_v0  ;;  %v5189_v28 = vadd.f32 %v5188_v32, %v9864_v37  ;;  %v5190_v17 = vpop.f32.mrf.mxu1  ;;  %v5383_v48 = vpop.f32.mrf.mxu0 }
 0x312   : > { %5772 = vst [vmem:[%s10071_s26 + $0xc0] sm:$0xff] %v5708_v14  ;;  %v5709_v4 = vmax.f32 %v5645_v45, 0.0  ;;  %v5646_v19 = vadd.f32 %v10050_v36, %v5570_v50  ;;  %v5571_v12 = vmul.f32 %v10053_v15, %v5495_v62  ;;  %v5191_v61 = vadd.f32 %v5190_v17, %v9869_v54  ;;  %v10695_v45 = vld [vmem:[#allocation49_spill] sm:$0xff] }
 0x313   : > { %v5496_v52 = vadd.f32 %v5380_v63, %v10691_v23  ;;  %v5382_v53 = vadd.f32 %v5381_v49, %v5189_v28  ;;  %v5192_v25 = vpop.f32.mrf.mxu1  ;;  %v5385_v6 = vpop.f32.mrf.mxu0 }
 0x314   : > { %5773 = vst [vmem:[%s10071_s26 + $0xc8] sm:$0xff] %v5709_v4  ;;  %v5710_v31 = vmax.f32 %v5646_v19, 0.0  ;;  %v5647_v37 = vadd.f32 %v10056_v20, %v5571_v12  ;;  %v5384_v27 = vadd.f32 %v5383_v48, %v5191_v61  ;;  %v5193_v16 = vadd.f32 %v5192_v25, %v9874_v11  ;;  %v10696_v19 = vld [vmem:[#allocation50_spill] sm:$0xff] }
 0x315   : > { %v5572_v59 = vmul.f32 %v10046_v43, %v5496_v52  ;;  %v5497_v29 = vadd.f32 %v5382_v53, %v10692_v38  ;;  %v5196_v3 = vpop.f32.mrf.mxu1  ;;  %v5389_v9 = vpop.f32.mrf.mxu0 }
 0x316   : > { %5774 = vst [vmem:[%s10071_s26 + $0xd0] sm:$0xff] %v5710_v31  ;;  %v5711_v54 = vmax.f32 %v5647_v37, 0.0  ;;  %v5498_v58 = vadd.f32 %v5384_v27, %v10693_v21  ;;  %v5386_v18 = vadd.f32 %v5385_v6, %v5193_v16  ;;  %v5197_v60 = vadd.f32 %v5196_v3, %v9879_v13  ;;  %v10697_v37 = vld [vmem:[#allocation51_spill] sm:$0xff]  ;;  %v10698_v21 = vld [vmem:[#allocation52_spill] sm:$0xff] }
 0x317   : > { %v5648_v40 = vadd.f32 %v10050_v36, %v5572_v59  ;;  %v5573_v24 = vmul.f32 %v10053_v15, %v5497_v29  ;;  %v5198_v1 = vpop.f32.mrf.mxu1  ;;  %v5391_v11 = vpop.f32.mrf.mxu0 }
 0x318   : > { %5775 = vst [vmem:[%s10071_s26 + $0xd8] sm:$0xff] %v5711_v54  ;;  %v5574_v55 = vmul.f32 %v10046_v43, %v5498_v58  ;;  %v5499_v47 = vadd.f32 %v5386_v18, %v10694_v5  ;;  %v5390_v57 = vadd.f32 %v5389_v9, %v5197_v60  ;;  %v5199_v34 = vadd.f32 %v5198_v1, %v9884_v35 }
 0x319   : > { %v5712_v7 = vmax.f32 %v5648_v40, 0.0  ;;  %v5649_v0 = vadd.f32 %v10056_v20, %v5573_v24  ;;  %v5200_v13 = vpop.f32.mrf.mxu1  ;;  %v5393_v32 = vpop.f32.mrf.mxu0  ;;  %v10699_v40 = vld [vmem:[#allocation53_spill] sm:$0xff] }
 0x31a   : > { %v5650_v49 = vadd.f32 %v10050_v36, %v5574_v55  ;;  %v5575_v14 = vmul.f32 %v10053_v15, %v5499_v47  ;;  %v5500_v50 = vadd.f32 %v5390_v57, %v10695_v45  ;;  %v5392_v26 = vadd.f32 %v5391_v11, %v5199_v34  ;;  %v10700_v34 = vld [vmem:[#allocation54_spill] sm:$0xff] }
 0x31b   : > { %5776 = vst [vmem:[%s10071_s26 + $0xe0] sm:$0xff] %v5712_v7  ;;  %v5713_v62 = vmax.f32 %v5649_v0, 0.0  ;;  %v5201_v63 = vadd.f32 %v5200_v13, %v9889_v22  ;;  %v5202_v28 = vpop.f32.mrf.mxu1  ;;  %v5395_v35 = vpop.f32.mrf.mxu0 }
 0x31c   : > { %v5714_v17 = vmax.f32 %v5650_v49, 0.0  ;;  %v5651_v48 = vadd.f32 %v10056_v20, %v5575_v14  ;;  %v5576_v4 = vmul.f32 %v10046_v43, %v5500_v50  ;;  %v5501_v12 = vadd.f32 %v5392_v26, %v10696_v19  ;;  %v10701_v26 = vld [vmem:[#allocation55_spill] sm:$0xff] }
 0x31d   : > { %5777 = vst [vmem:[%s10071_s26 + $0xe8] sm:$0xff] %v5713_v62  ;;  %v5394_v61 = vadd.f32 %v5393_v32, %v5201_v63  ;;  %v5203_v23 = vadd.f32 %v5202_v28, %v9894_v44  ;;  %v5206_v52 = vpop.f32.mrf.mxu1  ;;  %v5399_v53 = vpop.f32.mrf.mxu0 }
 0x31e   : > { %5778 = vst [vmem:[%s10071_s26 + $0xf0] sm:$0xff] %v5714_v17  ;;  %v5715_v25 = vmax.f32 %v5651_v48, 0.0  ;;  %v5652_v22 = vadd.f32 %v10050_v36, %v5576_v4  ;;  %v5577_v6 = vmul.f32 %v10053_v15, %v5501_v12  ;;  %v5207_v31 = vadd.f32 %v5206_v52, %v9899_v33  ;;  %v10702_v12 = vld [vmem:[#allocation56_spill] sm:$0xff] }
 0x31f   : > { %v5502_v27 = vadd.f32 %v5394_v61, %v10697_v37  ;;  %v5396_v16 = vadd.f32 %v5395_v35, %v5203_v23  ;;  %v5208_v59 = vpop.f32.mrf.mxu1  ;;  %v5401_v38 = vpop.f32.mrf.mxu0 }
 0x320   : > { %5779 = vst [vmem:[%s10071_s26 + $0xf8] sm:$0xff] %v5715_v25  ;;  %v5716_v29 = vmax.f32 %v5652_v22, 0.0  ;;  %v5653_v44 = vadd.f32 %v10056_v20, %v5577_v6  ;;  %v5400_v3 = vadd.f32 %v5399_v53, %v5207_v31  ;;  %v5209_v9 = vadd.f32 %v5208_v59, %v9904_v10  ;;  %v10703_v31 = vld [vmem:[#allocation59_spill] sm:$0xff] }
 0x321   : > { %v5578_v54 = vmul.f32 %v10046_v43, %v5502_v27  ;;  %v5503_v58 = vadd.f32 %v5396_v16, %v10698_v21  ;;  %v5210_v18 = vpop.f32.mrf.mxu1  ;;  %v5403_v60 = vpop.f32.mrf.mxu0  ;;  %v10704_v27 = vld [vmem:[#allocation57_spill] sm:$0xff] }
 0x322   : > { %5780 = vst [vmem:[%s10071_s26 + $0x100] sm:$0xff] %v5716_v29  ;;  %v5717_v33 = vmax.f32 %v5653_v44, 0.0  ;;  %v5504_v24 = vadd.f32 %v5400_v3, %v10699_v40  ;;  %v5402_v1 = vadd.f32 %v5401_v38, %v5209_v9  ;;  %v5211_v11 = vadd.f32 %v5210_v18, %v9909_v39  ;;  %v10705_v9 = vld [vmem:[#allocation61_spill] sm:$0xff] }
 0x323   : > { %v5654_v55 = vadd.f32 %v10050_v36, %v5578_v54  ;;  %v5579_v5 = vmul.f32 %v10053_v15, %v5503_v58  ;;  %v5212_v47 = vpop.f32.mrf.mxu1  ;;  %v5405_v10 = vpop.f32.mrf.mxu0  ;;  %v10706_v58 = vld [vmem:[#allocation58_spill] sm:$0xff] }
 0x324   : > { %5781 = vst [vmem:[%s10071_s26 + $0x108] sm:$0xff] %v5717_v33  ;;  %v5580_v57 = vmul.f32 %v10046_v43, %v5504_v24  ;;  %v5505_v7 = vadd.f32 %v5402_v1, %v10700_v34  ;;  %v5404_v0 = vadd.f32 %v5403_v60, %v5211_v11  ;;  %v5213_v13 = vadd.f32 %v5212_v47, %v9914_v2  ;;  %v10707_v24 = vld [vmem:[#allocation60_spill] sm:$0xff] }
 0x325   : > { %v5718_v32 = vmax.f32 %v5654_v55, 0.0  ;;  %v5655_v49 = vadd.f32 %v10056_v20, %v5579_v5  ;;  %v5216_v39 = vpop.f32.mrf.mxu1  ;;  %v5409_v14 = vpop.f32.mrf.mxu0  ;;  %v10708_v55 = vld [vmem:[#allocation63_spill] sm:$0xff] }
 0x326   : > { %v5656_v45 = vadd.f32 %v10050_v36, %v5580_v57  ;;  %v5581_v50 = vmul.f32 %v10053_v15, %v5505_v7  ;;  %v5506_v62 = vadd.f32 %v5404_v0, %v10701_v26  ;;  %v5406_v63 = vadd.f32 %v5405_v10, %v5213_v13  ;;  %v10709_v0 = vld [vmem:[#allocation62_spill] sm:$0xff] }
 0x327   : > { %5782 = vst [vmem:[%s10071_s26 + $0x110] sm:$0xff] %v5718_v32  ;;  %v5719_v28 = vmax.f32 %v5655_v49, 0.0  ;;  %v5217_v35 = vadd.f32 %v5216_v39, %v9919_v42  ;;  %v5218_v17 = vpop.f32.mrf.mxu1  ;;  %v5411_v2 = vpop.f32.mrf.mxu0  ;;  %v10710_v49 = vld [vmem:[#allocation65_spill] sm:$0xff] }
 0x328   : > { %v5720_v48 = vmax.f32 %v5656_v45, 0.0  ;;  %v5657_v4 = vadd.f32 %v10056_v20, %v5581_v50  ;;  %v5582_v19 = vmul.f32 %v10046_v43, %v5506_v62  ;;  %v5507_v61 = vadd.f32 %v5406_v63, %v10702_v12 }
 0x329   : > { %5783 = vst [vmem:[%s10071_s26 + $0x118] sm:$0xff] %v5719_v28  ;;  %v5410_v23 = vadd.f32 %v5409_v14, %v5217_v35  ;;  %v5219_v52 = vadd.f32 %v5218_v17, %v9924_v41  ;;  %v5220_v53 = vpop.f32.mrf.mxu1  ;;  %v5413_v25 = vpop.f32.mrf.mxu0  ;;  %v10711_v28 = vld [vmem:[#allocation64_spill] sm:$0xff] }
 0x32a   : > { %5784 = vst [vmem:[%s10071_s26 + $0x120] sm:$0xff] %v5720_v48  ;;  %v5721_v22 = vmax.f32 %v5657_v4, 0.0  ;;  %v5658_v42 = vadd.f32 %v10050_v36, %v5582_v19  ;;  %v5583_v6 = vmul.f32 %v10053_v15, %v5507_v61  ;;  %v5221_v37 = vadd.f32 %v5220_v53, %v10703_v31  ;;  %v10712_v48 = vld [vmem:[#allocation66_spill] sm:$0xff]  ;;  %v10713_v53 = vld [vmem:[#allocation24_spill] sm:$0xff] }
 0x32b   : > { %v5508_v16 = vadd.f32 %v5410_v23, %v10704_v27  ;;  %v5412_v59 = vadd.f32 %v5411_v2, %v5219_v52  ;;  %v5222_v38 = vpop.f32.mrf.mxu1  ;;  %v5415_v29 = vpop.f32.mrf.mxu0 }
 0x32c   : > { %5785 = vst [vmem:[%s10071_s26 + $0x128] sm:$0xff] %v5721_v22  ;;  %v5722_v44 = vmax.f32 %v5658_v42, 0.0  ;;  %v5659_v41 = vadd.f32 %v10056_v20, %v5583_v6  ;;  %v5414_v3 = vadd.f32 %v5413_v25, %v5221_v37  ;;  %v5223_v54 = vadd.f32 %v5222_v38, %v10705_v9  ;;  %v10714_v42 = vld [vmem:[#allocation67_spill] sm:$0xff]  ;;  %v10715_v38 = vld [vmem:[#allocation68_spill] sm:$0xff] }
 0x32d   : > { %v5584_v21 = vmul.f32 %v10046_v43, %v5508_v16  ;;  %v5509_v18 = vadd.f32 %v5412_v59, %v10706_v58  ;;  %v5226_v60 = vpop.f32.mrf.mxu1  ;;  %v5419_v33 = vpop.f32.mrf.mxu0 }
 0x32e   : > { %5786 = vst [vmem:[%s10071_s26 + $0x130] sm:$0xff] %v5722_v44  ;;  %v5723_v40 = vmax.f32 %v5659_v41, 0.0  ;;  %v5510_v1 = vadd.f32 %v5414_v3, %v10707_v24  ;;  %v5416_v11 = vadd.f32 %v5415_v29, %v5223_v54  ;;  %v5227_v5 = vadd.f32 %v5226_v60, %v10708_v55  ;;  %v10716_v44 = vld [vmem:[#allocation25_spill] sm:$0xff] }
 0x32f   : > { %v5660_v47 = vadd.f32 %v10050_v36, %v5584_v21  ;;  %v5585_v10 = vmul.f32 %v10053_v15, %v5509_v18  ;;  %v5228_v57 = vpop.f32.mrf.mxu1  ;;  %v5421_v34 = vpop.f32.mrf.mxu0 }
 0x330   : > { %5787 = vst [vmem:[%s10071_s26 + $0x138] sm:$0xff] %v5723_v40  ;;  %v5586_v7 = vmul.f32 %v10046_v43, %v5510_v1  ;;  %v5511_v13 = vadd.f32 %v5416_v11, %v10709_v0  ;;  %v5420_v32 = vadd.f32 %v5419_v33, %v5227_v5  ;;  %v5229_v39 = vadd.f32 %v5228_v57, %v10710_v49  ;;  %v10717_v40 = vld [vmem:[#allocation26_spill] sm:$0xff]  ;;  %v10718_v5 = vld [vmem:[#allocation5_spill] sm:$0xff] }
 0x331   : > { %v5724_v14 = vmax.f32 %v5660_v47, 0.0  ;;  %v5661_v45 = vadd.f32 %v10056_v20, %v5585_v10  ;;  %v5230_v50 = vpop.f32.mrf.mxu1  ;;  %v5423_v26 = vpop.f32.mrf.mxu0 }
 0x332   : > { %v5662_v62 = vadd.f32 %v10050_v36, %v5586_v7  ;;  %v5587_v63 = vmul.f32 %v10053_v15, %v5511_v13  ;;  %v5512_v35 = vadd.f32 %v5420_v32, %v10711_v28  ;;  %v5422_v17 = vadd.f32 %v5421_v34, %v5229_v39  ;;  %v10719_v32 = vld [vmem:[#allocation11_spill] sm:$0xff] }
 0x333   : > { %5788 = vst [vmem:[%s10071_s26 + $0x140] sm:$0xff] %v5724_v14  ;;  %v5725_v2 = vmax.f32 %v5661_v45, 0.0  ;;  %v5231_v4 = vadd.f32 %v5230_v50, %v10712_v48  ;;  %v5232_v19 = vpop.f32.mrf.mxu1  ;;  %v5425_v12 = vpop.f32.mrf.mxu0  ;;  %v10720_v14 = vld [vmem:[#allocation69_spill] sm:$0xff] }
 0x334   : > { %v5726_v61 = vmax.f32 %v5662_v62, 0.0  ;;  %v5663_v23 = vadd.f32 %v10056_v20, %v5587_v63  ;;  %v5588_v52 = vmul.f32 %v10046_v43, %v5512_v35  ;;  %v5513_v25 = vadd.f32 %v5422_v17, %v10713_v53  ;;  %v10721_v35 = vld [vmem:[#allocation6_spill] sm:$0xff] }
 0x335   : > { %5789 = vst [vmem:[%s10071_s26 + $0x148] sm:$0xff] %v5725_v2  ;;  %v5424_v22 = vadd.f32 %v5423_v26, %v5231_v4  ;;  %v5233_v6 = vadd.f32 %v5232_v19, %v10714_v42  ;;  %v5236_v31 = vpop.f32.mrf.mxu1  ;;  %v5429_v37 = vpop.f32.mrf.mxu0  ;;  %v10722_v4 = vld [vmem:[#allocation70_spill] sm:$0xff] }
 0x336   : > { %5790 = vst [vmem:[%s10071_s26 + $0x150] sm:$0xff] %v5726_v61  ;;  %v5727_v27 = vmax.f32 %v5663_v23, 0.0  ;;  %v5664_v16 = vadd.f32 %v10050_v36, %v5588_v52  ;;  %v5589_v59 = vmul.f32 %v10053_v15, %v5513_v25  ;;  %v5237_v29 = vadd.f32 %v5236_v31, %v10715_v38  ;;  %v10723_v25 = vld [vmem:[#allocation7_spill] sm:$0xff] }
 0x337   : > { %v5514_v41 = vadd.f32 %v5424_v22, %v10716_v44  ;;  %v5426_v3 = vadd.f32 %v5425_v12, %v5233_v6  ;;  %v5238_v9 = vpop.f32.mrf.mxu1  ;;  %v5431_v54 = vpop.f32.mrf.mxu0 }
 0x338   : > { %5791 = vst [vmem:[%s10071_s26 + $0x158] sm:$0xff] %v5727_v27  ;;  %v5728_v21 = vmax.f32 %v5664_v16, 0.0  ;;  %v5665_v58 = vadd.f32 %v10056_v20, %v5589_v59  ;;  %v5430_v18 = vadd.f32 %v5429_v37, %v5237_v29  ;;  %v5239_v60 = vadd.f32 %v5238_v9, %v9964_v56  ;;  %v10724_v29 = vld [vmem:[#allocation71_spill] sm:$0xff] }
 0x339   : > { %v5590_v33 = vmul.f32 %v10046_v43, %v5514_v41  ;;  %v5515_v24 = vadd.f32 %v5426_v3, %v10717_v40  ;;  %v5240_v1 = vpop.f32.mrf.mxu1  ;;  %v5433_v11 = vpop.f32.mrf.mxu0 }
 0x33a   : > { %5792 = vst [vmem:[%s10071_s26 + $0x160] sm:$0xff] %v5728_v21  ;;  %v5729_v55 = vmax.f32 %v5665_v58, 0.0  ;;  %v5516_v47 = vadd.f32 %v5430_v18, %v10718_v5  ;;  %v5432_v10 = vadd.f32 %v5431_v54, %v5239_v60  ;;  %v5241_v57 = vadd.f32 %v5240_v1, %v9969_v8  ;;  %v10725_v60 = vld [vmem:[#allocation72_spill] sm:$0xff]  ;;  %v10727_v5 = vld [vmem:[#allocation73_spill] sm:$0xff] }
 0x33b   : > { %v5666_v34 = vadd.f32 %v10050_v36, %v5590_v33  ;;  %v5591_v7 = vmul.f32 %v10053_v15, %v5515_v24  ;;  %v5242_v0 = vpop.f32.mrf.mxu1  ;;  %v5435_v56 = vpop.f32.mrf.mxu0  ;;  %v10726_v1 = vld [vmem:[#allocation8_spill] sm:$0xff] }
 0x33c   : > { %5793 = vst [vmem:[%s10071_s26 + $0x168] sm:$0xff] %v5729_v55  ;;  %v5592_v13 = vmul.f32 %v10046_v43, %v5516_v47  ;;  %v5517_v49 = vadd.f32 %v5432_v10, %v10719_v32  ;;  %v5434_v39 = vadd.f32 %v5433_v11, %v5241_v57  ;;  %v5243_v45 = vadd.f32 %v5242_v0, %v10720_v14  ;;  %v10728_v0 = vld [vmem:[#allocation14_spill] sm:$0xff]  ;;  %v10729_v32 = vld [vmem:[#allocation75_spill] sm:$0xff] }
 0x33d   : > { %v5730_v50 = vmax.f32 %v5666_v34, 0.0  ;;  %v5667_v26 = vadd.f32 %v10056_v20, %v5591_v7  ;;  %v5246_v8 = vpop.f32.mrf.mxu1  ;;  %v5439_v62 = vpop.f32.mrf.mxu0 }
 0x33e   : > { %v5668_v63 = vadd.f32 %v10050_v36, %v5592_v13  ;;  %v5593_v28 = vmul.f32 %v10053_v15, %v5517_v49  ;;  %v5518_v17 = vadd.f32 %v5434_v39, %v10721_v35  ;;  %v5436_v2 = vadd.f32 %v5435_v56, %v5243_v45 }
 0x33f   : > { %5794 = vst [vmem:[%s10071_s26 + $0x170] sm:$0xff] %v5730_v50  ;;  %v5731_v48 = vmax.f32 %v5667_v26, 0.0  ;;  %v5247_v19 = vadd.f32 %v5246_v8, %v10722_v4  ;;  %v5248_v12 = vpop.f32.mrf.mxu1  ;;  %v5441_v61 = vpop.f32.mrf.mxu0 }
 0x340   : > { %v5732_v23 = vmax.f32 %v5668_v63, 0.0  ;;  %v5669_v52 = vadd.f32 %v10056_v20, %v5593_v28  ;;  %v5594_v53 = vmul.f32 %v10046_v43, %v5518_v17  ;;  %v5519_v22 = vadd.f32 %v5436_v2, %v10723_v25  ;;  %v10731_v17 = vld [vmem:[#allocation77_spill] sm:$0xff]  ;;  %v10733_v25 = vld [vmem:[#allocation79_spill] sm:$0xff] }
 0x341   : > { %5795 = vst [vmem:[%s10071_s26 + $0x178] sm:$0xff] %v5731_v48  ;;  %v5440_v42 = vadd.f32 %v5439_v62, %v5247_v19  ;;  %v5249_v6 = vadd.f32 %v5248_v12, %v9984_v51  ;;  %v5250_v31 = vpop.f32.mrf.mxu1  ;;  %v5443_v37 = vpop.f32.mrf.mxu0  ;;  %v10730_v62 = vld [vmem:[#allocation74_spill] sm:$0xff] }
 0x342   : > { %5796 = vst [vmem:[%s10071_s26 + $0x180] sm:$0xff] %v5732_v23  ;;  %v5733_v27 = vmax.f32 %v5669_v52, 0.0  ;;  %v5670_v16 = vadd.f32 %v10050_v36, %v5594_v53  ;;  %v5595_v59 = vmul.f32 %v10053_v15, %v5519_v22  ;;  %v5251_v38 = vadd.f32 %v5250_v31, %v9989_v46  ;;  %v10732_v23 = vld [vmem:[#allocation76_spill] sm:$0xff] }
 0x343   : > { %v5520_v44 = vadd.f32 %v5440_v42, %v10724_v29  ;;  %v5442_v41 = vadd.f32 %v5441_v61, %v5249_v6  ;;  %v5252_v3 = vpop.f32.mrf.mxu1  ;;  %v5445_v9 = vpop.f32.mrf.mxu0 }
 0x344   : > { %5797 = vst [vmem:[%s10071_s26 + $0x188] sm:$0xff] %v5733_v27  ;;  %v5734_v54 = vmax.f32 %v5670_v16, 0.0  ;;  %v5671_v51 = vadd.f32 %v10056_v20, %v5595_v59  ;;  %v5444_v21 = vadd.f32 %v5443_v37, %v5251_v38  ;;  %v5253_v58 = vadd.f32 %v5252_v3, %v9994_v30  ;;  %v10734_v16 = vld [vmem:[#allocation81_spill] sm:$0xff]  ;;  %v10735_v38 = vld [vmem:[#allocation78_spill] sm:$0xff] }
 0x345   : > { %v5596_v18 = vmul.f32 %v10046_v43, %v5520_v44  ;;  %v5521_v33 = vadd.f32 %v5442_v41, %v10725_v60  ;;  %v5256_v40 = vpop.f32.mrf.mxu1  ;;  %v5449_v24 = vpop.f32.mrf.mxu0  ;;  %v10737_v60 = vld [vmem:[#allocation80_spill] sm:$0xff] }
 0x346   : > { %5798 = vst [vmem:[%s10071_s26 + $0x190] sm:$0xff] %v5734_v54  ;;  %v5735_v46 = vmax.f32 %v5671_v51, 0.0  ;;  %v5522_v11 = vadd.f32 %v5444_v21, %v10726_v1  ;;  %v5446_v55 = vadd.f32 %v5445_v9, %v5253_v58  ;;  %v5257_v47 = vadd.f32 %v5256_v40, %v10727_v5  ;;  %v10736_v21 = vld [vmem:[#allocation83_spill] sm:$0xff]  ;;  %v10738_v1 = vld [vmem:[#allocation82_spill] sm:$0xff]  ;;  %v10739_v5 = vld [vmem:[#allocation85_spill] sm:$0xff] }
 0x347   : > { %v5672_v10 = vadd.f32 %v10050_v36, %v5596_v18  ;;  %v5597_v57 = vmul.f32 %v10053_v15, %v5521_v33  ;;  %v5258_v34 = vpop.f32.mrf.mxu1  ;;  %v5451_v30 = vpop.f32.mrf.mxu0 }
 0x348   : > { %5799 = vst [vmem:[%s10071_s26 + $0x198] sm:$0xff] %v5735_v46  ;;  %v5598_v7 = vmul.f32 %v10046_v43, %v5522_v11  ;;  %v5523_v56 = vadd.f32 %v5446_v55, %v10728_v0  ;;  %v5450_v13 = vadd.f32 %v5449_v24, %v5257_v47  ;;  %v5259_v49 = vadd.f32 %v5258_v34, %v10729_v32 }
 0x349   : > { %v5736_v39 = vmax.f32 %v5672_v10, 0.0  ;;  %v5673_v14 = vadd.f32 %v10056_v20, %v5597_v57  ;;  %v5260_v45 = vpop.f32.mrf.mxu1  ;;  %v5453_v50 = vpop.f32.mrf.mxu0 }
 0x34a   : > { %v5674_v26 = vadd.f32 %v10050_v36, %v5598_v7  ;;  %v5599_v8 = vmul.f32 %v10053_v15, %v5523_v56  ;;  %v5524_v63 = vadd.f32 %v5450_v13, %v10730_v62  ;;  %v5452_v28 = vadd.f32 %v5451_v30, %v5259_v49  ;;  %v10740_v7 = vld [vmem:[#allocation84_spill] sm:$0xff]  ;;  %v10741_v13 = vld [vmem:[#allocation87_spill] sm:$0xff] }
 0x34b   : > { %5800 = vst [vmem:[%s10071_s26 + $0x1a0] sm:$0xff] %v5736_v39  ;;  %v5737_v35 = vmax.f32 %v5673_v14, 0.0  ;;  %v5261_v2 = vadd.f32 %v5260_v45, %v10731_v17  ;;  %v5262_v48 = vpop.f32.mrf.mxu1  ;;  %v5455_v4 = vpop.f32.mrf.mxu0 }
 0x34c   : > { %v5738_v19 = vmax.f32 %v5674_v26, 0.0  ;;  %v5675_v12 = vadd.f32 %v10056_v20, %v5599_v8  ;;  %v5600_v61 = vmul.f32 %v10046_v43, %v5524_v63  ;;  %v5525_v52 = vadd.f32 %v5452_v28, %v10732_v23  ;;  %v10742_v26 = vld [vmem:[#allocation86_spill] sm:$0xff] }
 0x34d   : > { %5801 = vst [vmem:[%s10071_s26 + $0x1a8] sm:$0xff] %v5737_v35  ;;  %v5454_v53 = vadd.f32 %v5453_v50, %v5261_v2  ;;  %v5263_v22 = vadd.f32 %v5262_v48, %v10733_v25  ;;  %v5266_v42 = vpop.f32.mrf.mxu1  ;;  %v5459_v6 = vpop.f32.mrf.mxu0  ;;  %v10743_v2 = vld [vmem:[#allocation88_spill] sm:$0xff] }
 0x34e   : > { %5802 = vst [vmem:[%s10071_s26 + $0x1b0] sm:$0xff] %v5738_v19  ;;  %v5739_v31 = vmax.f32 %v5675_v12, 0.0  ;;  %v5676_v37 = vadd.f32 %v10050_v36, %v5600_v61  ;;  %v5601_v27 = vmul.f32 %v10053_v15, %v5525_v52  ;;  %v5267_v59 = vadd.f32 %v5266_v42, %v10734_v16 }
 0x34f   : > { %v5526_v29 = vadd.f32 %v5454_v53, %v10735_v38  ;;  %v5456_v44 = vadd.f32 %v5455_v4, %v5263_v22  ;;  %v5268_v41 = vpop.f32.mrf.mxu1  ;;  %v5461_v3 = vpop.f32.mrf.mxu0 }
 0x350   : > { %5803 = vst [vmem:[%s10071_s26 + $0x1b8] sm:$0xff] %v5739_v31  ;;  %v5740_v9 = vmax.f32 %v5676_v37, 0.0  ;;  %v5677_v54 = vadd.f32 %v10056_v20, %v5601_v27  ;;  %v5460_v51 = vadd.f32 %v5459_v6, %v5267_v59  ;;  %v5269_v58 = vadd.f32 %v5268_v41, %v10736_v21 }
 0x351   : > { %v5602_v18 = vmul.f32 %v10046_v43, %v5526_v29  ;;  %v5527_v33 = vadd.f32 %v5456_v44, %v10737_v60  ;;  %v5270_v40 = vpop.f32.mrf.mxu1  ;;  %v5463_v24 = vpop.f32.mrf.mxu0 }
 0x352   : > { %5804 = vst [vmem:[%s10071_s26 + $0x1c0] sm:$0xff] %v5740_v9  ;;  %v5741_v46 = vmax.f32 %v5677_v54, 0.0  ;;  %v5528_v11 = vadd.f32 %v5460_v51, %v10738_v1  ;;  %v5462_v55 = vadd.f32 %v5461_v3, %v5269_v58  ;;  %v5271_v47 = vadd.f32 %v5270_v40, %v10739_v5 }
 0x353   : > { %v5678_v10 = vadd.f32 %v10050_v36, %v5602_v18  ;;  %v5603_v57 = vmul.f32 %v10053_v15, %v5527_v33  ;;  %v5272_v34 = vpop.f32.mrf.mxu1  ;;  %v5465_v14 = vpop.f32.mrf.mxu0 }
 0x354   : > { %5805 = vst [vmem:[%s10071_s26 + $0x1c8] sm:$0xff] %v5741_v46  ;;  %v5604_v30 = vmul.f32 %v10046_v43, %v5528_v11  ;;  %v5529_v0 = vadd.f32 %v5462_v55, %v10740_v7  ;;  %v5464_v56 = vadd.f32 %v5463_v24, %v5271_v47  ;;  %v5273_v32 = vadd.f32 %v5272_v34, %v10741_v13 }
 0x355   : > { %v5742_v49 = vmax.f32 %v5678_v10, 0.0  ;;  %v5679_v39 = vadd.f32 %v10056_v20, %v5603_v57 }
 0x356   : > { %v5680_v45 = vadd.f32 %v10050_v36, %v5604_v30  ;;  %v5605_v50 = vmul.f32 %v10053_v15, %v5529_v0  ;;  %v5530_v8 = vadd.f32 %v5464_v56, %v10742_v26  ;;  %v5466_v62 = vadd.f32 %v5465_v14, %v5273_v32 }
 0x357   : > { %5806 = vst [vmem:[%s10071_s26 + $0x1d0] sm:$0xff] %v5742_v49  ;;  %v5743_v63 = vmax.f32 %v5679_v39, 0.0 }
 0x358   : > { %v5744_v28 = vmax.f32 %v5680_v45, 0.0  ;;  %v5681_v35 = vadd.f32 %v10056_v20, %v5605_v50  ;;  %v5606_v17 = vmul.f32 %v10046_v43, %v5530_v8  ;;  %v5531_v48 = vadd.f32 %v5466_v62, %v10743_v2 }
 0x359   : > { %5807 = vst [vmem:[%s10071_s26 + $0x1d8] sm:$0xff] %v5743_v63 }
 0x35a   : > { %5808 = vst [vmem:[%s10071_s26 + $0x1e0] sm:$0xff] %v5744_v28  ;;  %v5745_v4 = vmax.f32 %v5681_v35, 0.0  ;;  %v5682_v19 = vadd.f32 %v10050_v36, %v5606_v17  ;;  %v5607_v12 = vmul.f32 %v10053_v15, %v5531_v48 }
 0x35c   : > { %5809 = vst [vmem:[%s10071_s26 + $0x1e8] sm:$0xff] %v5745_v4  ;;  %v5746_v61 = vmax.f32 %v5682_v19, 0.0  ;;  %v5683_v23 = vadd.f32 %v10056_v20, %v5607_v12 }
 0x35e   : > { %5810 = vst [vmem:[%s10071_s26 + $0x1f0] sm:$0xff] %v5746_v61  ;;  %v5747_v36 = vmax.f32 %v5683_v23, 0.0 }
 0x360   : > { %5811 = vst [vmem:[%s10071_s26 + $0x1f8] sm:$0xff] %v5747_v36 }
 0x361   : > { %7846 = shalt.err (!%p7843_p5)
}
 0x362   : > { %s7847_s21 = scalar_lea.hbm %s10381_s7, 8192  ;;  %s7851_s14 = scalar_lea.hbm %s10438_s4, 16384 }
 0x363   : > { %p7848_p6 = scmp.ne.s32.totalorder %s10381_s7, %s7847_s21  ;;  %p7852_p10 = scmp.lt.s32.totalorder %s10381_s7, %s10438_s4 }
 0x364   : > { %p7853_p11 = scmp.lt.s32.totalorder %s7851_s14, %s7847_s21 }
 0x365   : > { %p7849_p7 = pnand %p7848_p6, %p7979_p4 }
 0x366   : > { %p7854_p12 = por %p7853_p11, %p7852_p10 }
 0x367   : > { %p7850_p9 = pneg %p7849_p7 }
 0x369   : > { %p7855_p13 = pnand %p7854_p12, %p7850_p9 }
 0x36b   : > { %7858 = shalt.err (!%p7855_p13)
}
 0x36c   : > { %s7912_s26 = smov 256   ;;  %s7913_s29 = smov 16  }
 0x36d   : > { %6949 = dma.vmem_to_hbm [thread:$0]  (%p7979_p4), %s10383_s30, 8192, %s10381_s7, %s10389_s18, %s7912_s26, %s7912_s26, %s7913_s29  }
 0x36e PF: > { %p6955_p0 = scmp.ge.s32.totalorder %s7909_s20, 2  ;;  %s5843_s5 = sand.u32 1, %s7889_s15  }
 0x36f   : > { %s5844_s6 = scalar_lea.sflag [#allocation3], %s5843_s5 }
 0x370   : > { %p6952_p1 = pnand %p6955_p0, %p7986_p8 }
 0x372   : > { %p6953_p2 = pneg %p6952_p1 }
 0x374   : > { %7884 = dma.done.wait (%p6953_p2), %s5844_s6, 8192  }
 0x375   : > { %7886 = vsyncadd (%p6953_p2), %s5844_s6, 4294959104  ;;  %s17_s20 = sadd.s32 1, %s7909_s20   ;;  %s10744_s15 = smov %s7893_s16 }
 0x376   : > { %p14_p3 = scmp.ge.s32.totalorder %s17_s20, 4   ;;  %s10745_s16 = smov %s7897_s17 }
 0x377   : > { %s10746_s17 = smov %s7992_s28  ;;  %s10747_s18 = smov %s7905_s19 }
 0x378   : > { %s10748_s19 = smov %s10750_s23  ;;  %16 = sbr.rel (!%p14_p3) target bundleno = 4 (0x4), region = 84 }
 0x37d   :  { %5849 = vsyncpa [#allocation3], 1 }
 0x37e   :  { %5851 = vsyncpa [#allocation3 + $0x1], 1 }

</bundles_post_ra>
